<compile_context>
chip_gen: v6e
topology: v6e:2x2x1
jax: 0.10.0
libtpu: 0.0.40
codegen_flags: <defaults>
</compile_context>

<pallas_src>
import functools

import jax
import jax.numpy as jnp
from jax.experimental import pallas as pl
from jax.experimental.pallas import tpu as pltpu

LANE = 128
USE_BF16 = True                         # bf16 MXU operands (f32 accumulate/epilogue)
_MXU_DTYPE = jnp.bfloat16 if USE_BF16 else jnp.float32
_VMEM_LIMIT = 32 * 1024 * 1024          # safe on v5e/v6e/v7x; blocks here are tiny


# ----------------------------------------------------------------------------
# small helpers
# ----------------------------------------------------------------------------
def _rup(x, m):
    return ((x + m - 1) // m) * m


def _pad_last(x, target):
    pad = target - x.shape[-1]
    if pad == 0:
        return x
    return jnp.pad(x, [(0, 0)] * (x.ndim - 1) + [(0, pad)])


def _pick_m_tile(m, cap=512):
    for t in (cap, 512, 256, 128, 64, 32, 16, 8):
        if t <= m and m % t == 0:
            return t
    return m


def _compiler_params(n_axes):
    return pltpu.CompilerParams(
        dimension_semantics=("parallel",) * n_axes,
        vmem_limit_bytes=_VMEM_LIMIT,
    )


# ----------------------------------------------------------------------------
# Pallas kernels
# ----------------------------------------------------------------------------
def _mm_bias_relu_kernel(x_ref, w_ref, b_ref, o_ref):
    # (mt, K) @ (K, N)  ->  + shift  ->  relu
    y = jnp.dot(x_ref[0], w_ref[0], preferred_element_type=jnp.float32)
    y = y + b_ref[...]
    o_ref[0] = jnp.maximum(y, 0.0).astype(o_ref.dtype)


def _matmul_bias_relu(x, w_e, shift, *, out_dtype, m_tile_cap=512):
    """x: (E, M, K) ; w_e: (E, K, N) folded per-estimator weight ; shift: (1, N) f32."""
    E, M, K = x.shape
    N = w_e.shape[-1]
    mt = _pick_m_tile(M, m_tile_cap)
    return pl.pallas_call(
        _mm_bias_relu_kernel,
        out_shape=jax.ShapeDtypeStruct((E, M, N), out_dtype),
        grid=(E, M // mt),
        in_specs=[
            pl.BlockSpec((1, mt, K), lambda e, m: (e, m, 0)),
            pl.BlockSpec((1, K, N), lambda e, m: (e, 0, 0)),
            pl.BlockSpec((1, N), lambda e, m: (0, 0)),
        ],
        out_specs=pl.BlockSpec((1, mt, N), lambda e, m: (e, m, 0)),
        compiler_params=_compiler_params(2),
    )(x, w_e, shift)


def _make_conv3x3_kernel(stride, ho, wo, per):
    def kernel(x_ref, w_ref, b_ref, o_ref, acc_ref):
        # x_ref: (1, per, s*s, Hph, Wph, C) stride-phase-split, spatially padded input
        # w_ref: (1, 3, 3, C, N) per-estimator folded weight;  b_ref: (1, N)
        c = x_ref.shape[-1]
        acc_ref[...] = jnp.zeros_like(acc_ref)
        for kh in range(3):                       # 9 shifted matmuls, unrolled
            for kw in range(3):
                p = (kh % stride) * stride + (kw % stride)
                dh, dw = kh // stride, kw // stride
                tap = x_ref[0, :, p, dh:dh + ho, dw:dw + wo, :]   # (per, ho, wo, C)
                tap = tap.reshape(per * ho * wo, c)
                acc_ref[...] += jnp.dot(tap, w_ref[0, kh, kw],
                                        preferred_element_type=jnp.float32)
        o_ref[0] = jnp.maximum(acc_ref[...] + b_ref[...], 0.0).astype(o_ref.dtype)
    return kernel


def _conv3x3_bn_relu(x_ph, w_e, shift, *, stride, ho, wo, per, out_dtype):
    """x_ph: (E, per, s*s, Hph, Wph, C) ; w_e: (E, 3, 3, C, N) ; shift: (1, N)."""
    E, _per, nph, hph, wph, C = x_ph.shape
    N = w_e.shape[-1]
    m2 = per * ho * wo
    return pl.pallas_call(
        _make_conv3x3_kernel(stride, ho, wo, per),
        out_shape=jax.ShapeDtypeStruct((E, m2, N), out_dtype),
        grid=(E,),
        in_specs=[
            pl.BlockSpec((1, per, nph, hph, wph, C),
                         lambda e: (e, 0, 0, 0, 0, 0)),
            pl.BlockSpec((1, 3, 3, C, N), lambda e: (e, 0, 0, 0, 0)),
            pl.BlockSpec((1, N), lambda e: (0, 0)),
        ],
        out_specs=pl.BlockSpec((1, m2, N), lambda e: (e, 0, 0)),
        scratch_shapes=[pltpu.VMEM((m2, N), jnp.float32)],
        compiler_params=_compiler_params(1),
    )(x_ph, w_e, shift)


def _conv3_shortcut_kernel(h_ref, r_ref, w3_ref, ws_ref, b_ref, o_ref):
    # main 1x1 conv + shortcut 1x1 conv + combined BN shift + relu, one HBM write
    y = jnp.dot(h_ref[0], w3_ref[0], preferred_element_type=jnp.float32)
    y = y + jnp.dot(r_ref[0], ws_ref[0], preferred_element_type=jnp.float32)
    o_ref[0] = jnp.maximum(y + b_ref[...], 0.0).astype(o_ref.dtype)


def _conv3_shortcut(h2, xs, w3_e, ws_e, shift, *, m_tile_cap=512):
    E, M, C = h2.shape
    K = xs.shape[-1]
    N = w3_e.shape[-1]
    mt = _pick_m_tile(M, m_tile_cap)
    return pl.pallas_call(
        _conv3_shortcut_kernel,
        out_shape=jax.ShapeDtypeStruct((E, M, N), jnp.float32),
        grid=(E, M // mt),
        in_specs=[
            pl.BlockSpec((1, mt, C), lambda e, m: (e, m, 0)),
            pl.BlockSpec((1, mt, K), lambda e, m: (e, m, 0)),
            pl.BlockSpec((1, C, N), lambda e, m: (e, 0, 0)),
            pl.BlockSpec((1, K, N), lambda e, m: (e, 0, 0)),
            pl.BlockSpec((1, N), lambda e, m: (0, 0)),
        ],
        out_specs=pl.BlockSpec((1, mt, N), lambda e, m: (e, m, 0)),
        compiler_params=_compiler_params(2),
    )(h2, xs, w3_e, ws_e, shift)


def _conv3_identity_kernel(h_ref, r_ref, w3_ref, b_ref, o_ref):
    y = jnp.dot(h_ref[0], w3_ref[0], preferred_element_type=jnp.float32)
    y = y + r_ref[0].astype(jnp.float32) + b_ref[...]
    o_ref[0] = jnp.maximum(y, 0.0).astype(o_ref.dtype)


def _conv3_identity(h2, res, w3_e, shift, *, m_tile_cap=512):
    E, M, C = h2.shape
    R = res.shape[-1]
    N = w3_e.shape[-1]
    mt = _pick_m_tile(M, m_tile_cap)
    return pl.pallas_call(
        _conv3_identity_kernel,
        out_shape=jax.ShapeDtypeStruct((E, M, N), jnp.float32),
        grid=(E, M // mt),
        in_specs=[
            pl.BlockSpec((1, mt, C), lambda e, m: (e, m, 0)),
            pl.BlockSpec((1, mt, R), lambda e, m: (e, m, 0)),
            pl.BlockSpec((1, C, N), lambda e, m: (e, 0, 0)),
            pl.BlockSpec((1, N), lambda e, m: (0, 0)),
        ],
        out_specs=pl.BlockSpec((1, mt, N), lambda e, m: (e, m, 0)),
        compiler_params=_compiler_params(2),
    )(h2, res, w3_e, shift)


# ----------------------------------------------------------------------------
# Parameter prep: masks, BN folding, weight folding/padding
# ----------------------------------------------------------------------------
def make_masks(channels, num_estimators, scale):
    keep = max(1, int(round(channels / scale)))
    idx = jnp.arange(channels)
    rows = []
    for e in range(num_estimators):
        start = (e * channels) // num_estimators
        rows.append((((idx - start) % channels) < keep).astype(jnp.float32))
    return jnp.stack(rows)                                  # (E, C)


def fold_bn(gamma, beta, mean, var, eps=1e-5):
    scale = gamma / jnp.sqrt(var + eps)
    shift = beta - mean * scale
    return scale, shift


def init_bottleneck_params(key, in_planes, planes, stride, num_estimators, scale):
    expansion = 4
    keys = jax.random.split(key, 8)

    def conv_w(k, cout, cin, ksz):
        fan_in = cin * ksz * ksz
        return jax.random.normal(k, (cout, cin, ksz, ksz), jnp.float32) / jnp.sqrt(fan_in)

    def bn(k, c):
        k1, k2, k3, k4 = jax.random.split(k, 4)
        gamma = 1.0 + 0.1 * jax.random.normal(k1, (c,), jnp.float32)
        beta = 0.1 * jax.random.normal(k2, (c,), jnp.float32)
        mean = 0.1 * jax.random.normal(k3, (c,), jnp.float32)
        var = 1.0 + 0.1 * jax.random.uniform(k4, (c,), jnp.float32)
        return fold_bn(gamma, beta, mean, var)

    params = {
        "w1": conv_w(keys[0], planes, in_planes, 1),
        "bn1": bn(keys[1], planes),
        "w2": conv_w(keys[2], planes, planes, 3),
        "bn2": bn(keys[3], planes),
        "w3": conv_w(keys[4], expansion * planes, planes, 1),
        "bn3": bn(keys[5], expansion * planes),
        "mask1": make_masks(in_planes, num_estimators, scale),
        "mask2": make_masks(planes, num_estimators, scale),
        "mask3": make_masks(planes, num_estimators, scale),
    }
    has_shortcut = (stride != 1) or (in_planes != expansion * planes)
    if has_shortcut:
        params["ws"] = conv_w(keys[6], expansion * planes, in_planes, 1)
        params["bns"] = bn(keys[7], expansion * planes)
        params["mask_s"] = make_masks(in_planes, num_estimators, scale)
    return params, has_shortcut


def prepare_folded_params(params, has_shortcut):
    """Fold per-estimator channel mask + BN scale into conv weights, pad channels to 128."""
    w1 = params["w1"]; s1, b1 = params["bn1"]
    w2 = params["w2"]; s2, b2 = params["bn2"]
    w3 = params["w3"]; s3, b3 = params["bn3"]
    m1, m2, m3 = params["mask1"], params["mask2"], params["mask3"]

    c_in = w1.shape[1]
    planes = w1.shape[0]
    c_out = w3.shape[0]
    Kp, Cp, Np = _rup(c_in, LANE), _rup(planes, LANE), _rup(c_out, LANE)

    def fold_1x1(w, mask, scale, k_pad, n_pad):
        wt = w[:, :, 0, 0].T * scale[None, :]                      # (Cin, Cout)
        we = mask[:, :, None] * wt[None]                           # (E, Cin, Cout)
        we = jnp.pad(we, ((0, 0), (0, k_pad - we.shape[1]), (0, n_pad - we.shape[2])))
        return we.astype(_MXU_DTYPE)

    def pad_shift(b, n_pad):
        return jnp.pad(b, (0, n_pad - b.shape[0])).reshape(1, n_pad).astype(jnp.float32)

    folded = {
        "w1_e": fold_1x1(w1, m1, s1, Kp, Cp),
        "shift1": pad_shift(b1, Cp),
        "shift2": pad_shift(b2, Cp),
        "w3_e": fold_1x1(w3, m3, s3, Cp, Np),
    }

    # conv2: OIHW -> (3, 3, Cin, Cout), BN scale on Cout, per-estimator mask on Cin.
    w2t = jnp.transpose(w2, (2, 3, 1, 0)) * s2[None, None, None, :]
    w2e = m2[:, None, None, :, None] * w2t[None]                   # (E, 3, 3, Cin, Cout)
    w2e = jnp.pad(w2e, ((0, 0), (0, 0), (0, 0),
                        (0, Cp - w2e.shape[3]), (0, Cp - w2e.shape[4])))
    folded["w2_e"] = w2e.astype(_MXU_DTYPE)

    if has_shortcut:
        ws = params["ws"]; ss, bs = params["bns"]; ms = params["mask_s"]
        folded["ws_e"] = fold_1x1(ws, ms, ss, Kp, Np)
        folded["shift3"] = pad_shift(b3, Np) + pad_shift(bs, Np)   # combined shift
    else:
        folded["shift3"] = pad_shift(b3, Np)
    return folded


# ----------------------------------------------------------------------------
# Bottleneck forward (Pallas hot path)
# ----------------------------------------------------------------------------
@functools.partial(jax.jit, static_argnames=("stride", "num_estimators",
                                             "out_channels", "has_shortcut"))
def bottleneck_forward(x_nchw, folded, *, stride, num_estimators, out_channels,
                       has_shortcut):
    B, c_in, H, W = x_nchw.shape
    E = num_estimators
    assert B % E == 0
    per = B // E
    s = stride
    Kp = folded["w1_e"].shape[1]
    Cp = folded["w1_e"].shape[2]
    Np = folded["w3_e"].shape[2]
    Ho = (H - 1) // s + 1
    Wo = (W - 1) // s + 1

    # NCHW -> NHWC, zero-pad channels to lane width, group samples by estimator.
    x = jnp.transpose(x_nchw, (0, 2, 3, 1))
    x = _pad_last(x, Kp)
    xg = x.reshape(E, per, H, W, Kp)

    # conv1 (1x1) + bn1 + relu: one big (per*H*W, Kp) @ (Kp, Cp) matmul per estimator.
    h1 = _matmul_bias_relu(xg.reshape(E, per * H * W, Kp).astype(_MXU_DTYPE),
                           folded["w1_e"], folded["shift1"], out_dtype=_MXU_DTYPE)

    # conv2 (3x3, stride, pad=1) + bn2 + relu.
    # Spatial pad + stride-phase split in XLA (~1x the input bytes, NOT 9x im2col);
    # the 9 shifted matmuls are accumulated inside the kernel.
    h1 = h1.reshape(E, per, H, W, Cp)
    Hph, Wph = Ho + 2 // s, Wo + 2 // s
    Hp, Wp = s * Hph, s * Wph
    h1p = jnp.pad(h1, ((0, 0), (0, 0), (1, Hp - H - 1), (1, Wp - W - 1), (0, 0)))
    phases = [h1p[:, :, ph::s, pw::s, :] for ph in range(s) for pw in range(s)]
    x2 = jnp.stack(phases, axis=2)                 # (E, per, s*s, Hph, Wph, Cp)
    h2 = _conv3x3_bn_relu(x2, folded["w2_e"], folded["shift2"],
                          stride=s, ho=Ho, wo=Wo, per=per, out_dtype=_MXU_DTYPE)

    # conv3 (1x1) + bn3 + shortcut + relu fused into one kernel / one HBM write.
    if has_shortcut:
        xs = xg[:, :, ::s, ::s, :].reshape(E, per * Ho * Wo, Kp)
        out = _conv3_shortcut(h2, xs.astype(_MXU_DTYPE), folded["w3_e"],
                              folded["ws_e"], folded["shift3"])
    else:
        res = xg.reshape(E, per * H * W, Kp)       # identity shortcut (Kp == Np here)
        out = _conv3_identity(h2, res, folded["w3_e"], folded["shift3"])

    out = out.reshape(E, per, Ho, Wo, Np)[..., :out_channels]
    out = out.reshape(B, Ho, Wo, out_channels)
    return jnp.transpose(out, (0, 3, 1, 2))        # NHWC -> NCHW


# ----------------------------------------------------------------------------
# Pure-JAX reference (for correctness check)
# ----------------------------------------------------------------------------
def reference_forward(x_nchw, params, has_shortcut, *, stride, num_estimators):
    B = x_nchw.shape[0]
    est_idx = jnp.arange(B) // (B // num_estimators)

    def masked_conv(x, mask, w, st, pad):
        xm = x * mask[est_idx][:, :, None, None]
        return jax.lax.conv_general_dilated(
            xm, w, (st, st), [(pad, pad), (pad, pad)],
            dimension_numbers=("NCHW", "OIHW", "NCHW"))

    def bn(x, sb):
        s, b = sb
        return x * s[None, :, None, None] + b[None, :, None, None]

    h = jax.nn.relu(bn(masked_conv(x_nchw, params["mask1"], params["w1"], 1, 0), params["bn1"]))
    h = jax.nn.relu(bn(masked_conv(h, params["mask2"], params["w2"], stride, 1), params["bn2"]))
    h = bn(masked_conv(h, params["mask3"], params["w3"], 1, 0), params["bn3"])
    if has_shortcut:
        sc = bn(masked_conv(x_nchw, params["mask_s"], params["ws"], stride, 0), params["bns"])
    else:
        sc = x_nchw
    return jax.nn.relu(h + sc)


# ----------------------------------------------------------------------------
if __name__ == "__main__":
    key = jax.random.PRNGKey(0)
    kx, kp = jax.random.split(key)

    num_estimators = 4
    in_planes, planes, stride, scale = 16, 8, 2, 2.0
    B, H, W = 8, 16, 16                                     # B divisible by num_estimators

    x = jax.random.normal(kx, (B, in_planes, H, W), jnp.float32)
    params, has_shortcut = init_bottleneck_params(
        kp, in_planes, planes, stride, num_estimators, scale)
    folded = prepare_folded_params(params, has_shortcut)

    out = bottleneck_forward(x, folded, stride=stride, num_estimators=num_estimators,
                             out_channels=4 * planes, has_shortcut=has_shortcut)
    out = jax.block_until_ready(out)

    ref = reference_forward(x, params, has_shortcut,
                            stride=stride, num_estimators=num_estimators)

    assert out.shape == (B, 4 * planes, H // stride, W // stride), out.shape
    err = jnp.abs(out - ref)
    tol = 6e-2 + 3e-2 * jnp.abs(ref)          # bf16 MXU operands vs f32 reference
    max_err = float(jnp.max(err))
    assert bool(jnp.all(err <= tol)), f"max abs error vs reference: {max_err}"
    print("KERNEL_OK")
</pallas_src>

<mosaic_0001>
module attributes {stable_mosaic.version = 11 : i64} {
  func.func @_mm_bias_relu_kernel(%arg0: i32, %arg1: i32, %arg2: memref<1x512x128xbf16, #tpu.memory_space<vmem>>, %arg3: memref<1x128x128xbf16, #tpu.memory_space<vmem>>, %arg4: memref<1x128xf32, #tpu.memory_space<vmem>>, %arg5: memref<1x512x128xbf16, #tpu.memory_space<vmem>>) attributes {dimension_semantics = [#tpu.dimension_semantics<parallel>, #tpu.dimension_semantics<parallel>], iteration_bounds = array<i64: 4, 1>, scalar_prefetch = 0 : i64, scratch_operands = 0 : i64, tpu.core_type = #tpu.core_type<tc>, window_params = [{transform_indices = @transform_0, window_bounds = array<i64: 1, 512, 128>}, {transform_indices = @transform_1, window_bounds = array<i64: 1, 128, 128>}, {pipeline_mode = #tpu.pipeline_mode<synchronous>, transform_indices = @transform_2, window_bounds = array<i64: 1, 128>}, {transform_indices = @transform_3, window_bounds = array<i64: 1, 512, 128>}]} {
    %c0 = arith.constant 0 : index
    %c0_0 = arith.constant 0 : index
    %c0_1 = arith.constant 0 : index
    %0 = vector.load %arg2[%c0, %c0_0, %c0_1] : memref<1x512x128xbf16, #tpu.memory_space<vmem>>, vector<1x512x128xbf16>
    %1 = vector.shape_cast %0 : vector<1x512x128xbf16> to vector<512x128xbf16>
    %c0_2 = arith.constant 0 : index
    %c0_3 = arith.constant 0 : index
    %c0_4 = arith.constant 0 : index
    %2 = vector.load %arg3[%c0_2, %c0_3, %c0_4] : memref<1x128x128xbf16, #tpu.memory_space<vmem>>, vector<1x128x128xbf16>
    %3 = vector.shape_cast %2 : vector<1x128x128xbf16> to vector<128x128xbf16>
    %cst = arith.constant dense<0.000000e+00> : vector<512x128xf32>
    %4 = tpu.matmul %1, %3, %cst {dimension_numbers = #tpu.dot_dimension_numbers<[1], [0], [0], [1], [0, 0, 1, 1], [], []>} : vector<512x128xbf16>, vector<128x128xbf16>, vector<512x128xf32> -> vector<512x128xf32>
    %c0_5 = arith.constant 0 : index
    %c0_6 = arith.constant 0 : index
    %5 = vector.load %arg4[%c0_5, %c0_6] : memref<1x128xf32, #tpu.memory_space<vmem>>, vector<1x128xf32>
    %6 = vector.broadcast %5 : vector<1x128xf32> to vector<512x128xf32>
    %7 = arith.addf %4, %6 : vector<512x128xf32>
    %cst_7 = arith.constant 0.000000e+00 : f32
    %8 = vector.broadcast %cst_7 : f32 to vector<512x128xf32>
    %9 = arith.maximumf %7, %8 : vector<512x128xf32>
    %10 = arith.truncf %9 : vector<512x128xf32> to vector<512x128xbf16>
    %c0_8 = arith.constant 0 : index
    %c0_9 = arith.constant 0 : index
    %c0_10 = arith.constant 0 : index
    %11 = vector.load %arg5[%c0_8, %c0_9, %c0_10] : memref<1x512x128xbf16, #tpu.memory_space<vmem>>, vector<1x512x128xbf16>
    %12 = vector.shape_cast %11 : vector<1x512x128xbf16> to vector<512x128xbf16>
    %13 = vector.shape_cast %10 : vector<512x128xbf16> to vector<1x512x128xbf16>
    tpu.vector_store %arg5[%c0_8, %c0_9, %c0_10], %13 {strides = array<i32>} : memref<1x512x128xbf16, #tpu.memory_space<vmem>>, vector<1x512x128xbf16>,
    return
  }
  func.func @transform_0(%arg0: i32, %arg1: i32) -> (i32, i32, i32) {
    %c0_i32 = arith.constant 0 : i32
    %c0_i32_0 = arith.constant 0 : i32
    return %arg0, %arg1, %c0_i32 : i32, i32, i32
  }
  func.func @transform_1(%arg0: i32, %arg1: i32) -> (i32, i32, i32) {
    %c0_i32 = arith.constant 0 : i32
    %c0_i32_0 = arith.constant 0 : i32
    %c0_i32_1 = arith.constant 0 : i32
    return %arg0, %c0_i32, %c0_i32_0 : i32, i32, i32
  }
  func.func @transform_2(%arg0: i32, %arg1: i32) -> (i32, i32) {
    %c0_i32 = arith.constant 0 : i32
    %c0_i32_0 = arith.constant 0 : i32
    %c0_i32_1 = arith.constant 0 : i32
    return %c0_i32, %c0_i32_0 : i32, i32
  }
  func.func @transform_3(%arg0: i32, %arg1: i32) -> (i32, i32, i32) {
    %c0_i32 = arith.constant 0 : i32
    %c0_i32_0 = arith.constant 0 : i32
    return %arg0, %arg1, %c0_i32 : i32, i32, i32
  }
}

module attributes {stable_mosaic.version = 11 : i64} {
  func.func @kernel(%arg0: i32, %arg1: memref<1x2x4x9x9x128xbf16, #tpu.memory_space<vmem>>, %arg2: memref<1x3x3x128x128xbf16, #tpu.memory_space<vmem>>, %arg3: memref<1x128xf32, #tpu.memory_space<vmem>>, %arg4: memref<1x128x128xbf16, #tpu.memory_space<vmem>>, %arg5: memref<128x128xf32, #tpu.memory_space<vmem>>) attributes {dimension_semantics = [#tpu.dimension_semantics<parallel>], iteration_bounds = array<i64: 4>, scalar_prefetch = 0 : i64, scratch_operands = 1 : i64, tpu.core_type = #tpu.core_type<tc>, window_params = [{transform_indices = @transform_0, window_bounds = array<i64: 1, 2, 4, 9, 9, 128>}, {transform_indices = @transform_1, window_bounds = array<i64: 1, 3, 3, 128, 128>}, {pipeline_mode = #tpu.pipeline_mode<synchronous>, transform_indices = @transform_2, window_bounds = array<i64: 1, 128>}, {transform_indices = @transform_3, window_bounds = array<i64: 1, 128, 128>}]} {
    %cst = arith.constant 0.000000e+00 : f32
    %0 = vector.broadcast %cst : f32 to vector<128x128xf32>
    %c0 = arith.constant 0 : index
    %c0_0 = arith.constant 0 : index
    %1 = vector.load %arg5[%c0, %c0_0] : memref<128x128xf32, #tpu.memory_space<vmem>>, vector<128x128xf32>
    tpu.vector_store %arg5[%c0, %c0_0], %0 {strides = array<i32>} : memref<128x128xf32, #tpu.memory_space<vmem>>, vector<128x128xf32>,
    %c0_1 = arith.constant 0 : index
    %c0_2 = arith.constant 0 : index
    %c0_3 = arith.constant 0 : index
    %c0_4 = arith.constant 0 : index
    %c0_5 = arith.constant 0 : index
    %c0_6 = arith.constant 0 : index
    %2 = vector.load %arg1[%c0_1, %c0_2, %c0_3, %c0_4, %c0_5, %c0_6] : memref<1x2x4x9x9x128xbf16, #tpu.memory_space<vmem>>, vector<1x2x1x8x8x128xbf16>
    %3 = vector.shape_cast %2 : vector<1x2x1x8x8x128xbf16> to vector<2x8x8x128xbf16>
    %4 = vector.shape_cast %3 : vector<2x8x8x128xbf16> to vector<128x128xbf16>
    %c0_7 = arith.constant 0 : index
    %c0_8 = arith.constant 0 : index
    %5 = vector.load %arg5[%c0_7, %c0_8] : memref<128x128xf32, #tpu.memory_space<vmem>>, vector<128x128xf32>
    %c0_9 = arith.constant 0 : index
    %c0_10 = arith.constant 0 : index
    %c0_11 = arith.constant 0 : index
    %c0_12 = arith.constant 0 : index
    %c0_13 = arith.constant 0 : index
    %6 = vector.load %arg2[%c0_9, %c0_10, %c0_11, %c0_12, %c0_13] : memref<1x3x3x128x128xbf16, #tpu.memory_space<vmem>>, vector<1x1x1x128x128xbf16>
    %7 = vector.shape_cast %6 : vector<1x1x1x128x128xbf16> to vector<128x128xbf16>
    %cst_14 = arith.constant dense<0.000000e+00> : vector<128x128xf32>
    %8 = tpu.matmul %4, %7, %cst_14 {dimension_numbers = #tpu.dot_dimension_numbers<[1], [0], [0], [1], [0, 0, 1, 1], [], []>} : vector<128x128xbf16>, vector<128x128xbf16>, vector<128x128xf32> -> vector<128x128xf32>
    %9 = arith.addf %5, %8 : vector<128x128xf32>
    %c0_15 = arith.constant 0 : index
    %c0_16 = arith.constant 0 : index
    %10 = vector.load %arg5[%c0_15, %c0_16] : memref<128x128xf32, #tpu.memory_space<vmem>>, vector<128x128xf32>
    tpu.vector_store %arg5[%c0_15, %c0_16], %9 {strides = array<i32>} : memref<128x128xf32, #tpu.memory_space<vmem>>, vector<128x128xf32>,
    %c0_17 = arith.constant 0 : index
    %c0_18 = arith.constant 0 : index
    %c1 = arith.constant 1 : index
    %c0_19 = arith.constant 0 : index
    %c0_20 = arith.constant 0 : index
    %c0_21 = arith.constant 0 : index
    %11 = vector.load %arg1[%c0_17, %c0_18, %c1, %c0_19, %c0_20, %c0_21] : memref<1x2x4x9x9x128xbf16, #tpu.memory_space<vmem>>, vector<1x2x1x8x8x128xbf16>
    %12 = vector.shape_cast %11 : vector<1x2x1x8x8x128xbf16> to vector<2x8x8x128xbf16>
    %13 = vector.shape_cast %12 : vector<2x8x8x128xbf16> to vector<128x128xbf16>
    %c0_22 = arith.constant 0 : index
    %c0_23 = arith.constant 0 : index
    %14 = vector.load %arg5[%c0_22, %c0_23] : memref<128x128xf32, #tpu.memory_space<vmem>>, vector<128x128xf32>
    %c0_24 = arith.constant 0 : index
    %c0_25 = arith.constant 0 : index
    %c1_26 = arith.constant 1 : index
    %c0_27 = arith.constant 0 : index
    %c0_28 = arith.constant 0 : index
    %15 = vector.load %arg2[%c0_24, %c0_25, %c1_26, %c0_27, %c0_28] : memref<1x3x3x128x128xbf16, #tpu.memory_space<vmem>>, vector<1x1x1x128x128xbf16>
    %16 = vector.shape_cast %15 : vector<1x1x1x128x128xbf16> to vector<128x128xbf16>
    %cst_29 = arith.constant dense<0.000000e+00> : vector<128x128xf32>
    %17 = tpu.matmul %13, %16, %cst_29 {dimension_numbers = #tpu.dot_dimension_numbers<[1], [0], [0], [1], [0, 0, 1, 1], [], []>} : vector<128x128xbf16>, vector<128x128xbf16>, vector<128x128xf32> -> vector<128x128xf32>
    %18 = arith.addf %14, %17 : vector<128x128xf32>
    %c0_30 = arith.constant 0 : index
    %c0_31 = arith.constant 0 : index
    %19 = vector.load %arg5[%c0_30, %c0_31] : memref<128x128xf32, #tpu.memory_space<vmem>>, vector<128x128xf32>
    tpu.vector_store %arg5[%c0_30, %c0_31], %18 {strides = array<i32>} : memref<128x128xf32, #tpu.memory_space<vmem>>, vector<128x128xf32>,
    %c0_32 = arith.constant 0 : index
    %c0_33 = arith.constant 0 : index
    %c0_34 = arith.constant 0 : index
    %c0_35 = arith.constant 0 : index
    %c1_36 = arith.constant 1 : index
    %c0_37 = arith.constant 0 : index
    %20 = vector.load %arg1[%c0_32, %c0_33, %c0_34, %c0_35, %c1_36, %c0_37] : memref<1x2x4x9x9x128xbf16, #tpu.memory_space<vmem>>, vector<1x2x1x8x8x128xbf16>
    %21 = vector.shape_cast %20 : vector<1x2x1x8x8x128xbf16> to vector<2x8x8x128xbf16>
    %22 = vector.shape_cast %21 : vector<2x8x8x128xbf16> to vector<128x128xbf16>
    %c0_38 = arith.constant 0 : index
    %c0_39 = arith.constant 0 : index
    %23 = vector.load %arg5[%c0_38, %c0_39] : memref<128x128xf32, #tpu.memory_space<vmem>>, vector<128x128xf32>
    %c0_40 = arith.constant 0 : index
    %c0_41 = arith.constant 0 : index
    %c2 = arith.constant 2 : index
    %c0_42 = arith.constant 0 : index
    %c0_43 = arith.constant 0 : index
    %24 = vector.load %arg2[%c0_40, %c0_41, %c2, %c0_42, %c0_43] : memref<1x3x3x128x128xbf16, #tpu.memory_space<vmem>>, vector<1x1x1x128x128xbf16>
    %25 = vector.shape_cast %24 : vector<1x1x1x128x128xbf16> to vector<128x128xbf16>
    %cst_44 = arith.constant dense<0.000000e+00> : vector<128x128xf32>
    %26 = tpu.matmul %22, %25, %cst_44 {dimension_numbers = #tpu.dot_dimension_numbers<[1], [0], [0], [1], [0, 0, 1, 1], [], []>} : vector<128x128xbf16>, vector<128x128xbf16>, vector<128x128xf32> -> vector<128x128xf32>
    %27 = arith.addf %23, %26 : vector<128x128xf32>
    %c0_45 = arith.constant 0 : index
    %c0_46 = arith.constant 0 : index
    %28 = vector.load %arg5[%c0_45, %c0_46] : memref<128x128xf32, #tpu.memory_space<vmem>>, vector<128x128xf32>
    tpu.vector_store %arg5[%c0_45, %c0_46], %27 {strides = array<i32>} : memref<128x128xf32, #tpu.memory_space<vmem>>, vector<128x128xf32>,
    %c0_47 = arith.constant 0 : index
    %c0_48 = arith.constant 0 : index
    %c2_49 = arith.constant 2 : index
    %c0_50 = arith.constant 0 : index
    %c0_51 = arith.constant 0 : index
    %c0_52 = arith.constant 0 : index
    %29 = vector.load %arg1[%c0_47, %c0_48, %c2_49, %c0_50, %c0_51, %c0_52] : memref<1x2x4x9x9x128xbf16, #tpu.memory_space<vmem>>, vector<1x2x1x8x8x128xbf16>
    %30 = vector.shape_cast %29 : vector<1x2x1x8x8x128xbf16> to vector<2x8x8x128xbf16>
    %31 = vector.shape_cast %30 : vector<2x8x8x128xbf16> to vector<128x128xbf16>
    %c0_53 = arith.constant 0 : index
    %c0_54 = arith.constant 0 : index
    %32 = vector.load %arg5[%c0_53, %c0_54] : memref<128x128xf32, #tpu.memory_space<vmem>>, vector<128x128xf32>
    %c0_55 = arith.constant 0 : index
    %c1_56 = arith.constant 1 : index
    %c0_57 = arith.constant 0 : index
    %c0_58 = arith.constant 0 : index
    %c0_59 = arith.constant 0 : index
    %33 = vector.load %arg2[%c0_55, %c1_56, %c0_57, %c0_58, %c0_59] : memref<1x3x3x128x128xbf16, #tpu.memory_space<vmem>>, vector<1x1x1x128x128xbf16>
    %34 = vector.shape_cast %33 : vector<1x1x1x128x128xbf16> to vector<128x128xbf16>
    %cst_60 = arith.constant dense<0.000000e+00> : vector<128x128xf32>
    %35 = tpu.matmul %31, %34, %cst_60 {dimension_numbers = #tpu.dot_dimension_numbers<[1], [0], [0], [1], [0, 0, 1, 1], [], []>} : vector<128x128xbf16>, vector<128x128xbf16>, vector<128x128xf32> -> vector<128x128xf32>
    %36 = arith.addf %32, %35 : vector<128x128xf32>
    %c0_61 = arith.constant 0 : index
    %c0_62 = arith.constant 0 : index
    %37 = vector.load %arg5[%c0_61, %c0_62] : memref<128x128xf32, #tpu.memory_space<vmem>>, vector<128x128xf32>
    tpu.vector_store %arg5[%c0_61, %c0_62], %36 {strides = array<i32>} : memref<128x128xf32, #tpu.memory_space<vmem>>, vector<128x128xf32>,
    %c0_63 = arith.constant 0 : index
    %c0_64 = arith.constant 0 : index
    %c3 = arith.constant 3 : index
    %c0_65 = arith.constant 0 : index
    %c0_66 = arith.constant 0 : index
    %c0_67 = arith.constant 0 : index
    %38 = vector.load %arg1[%c0_63, %c0_64, %c3, %c0_65, %c0_66, %c0_67] : memref<1x2x4x9x9x128xbf16, #tpu.memory_space<vmem>>, vector<1x2x1x8x8x128xbf16>
    %39 = vector.shape_cast %38 : vector<1x2x1x8x8x128xbf16> to vector<2x8x8x128xbf16>
    %40 = vector.shape_cast %39 : vector<2x8x8x128xbf16> to vector<128x128xbf16>
    %c0_68 = arith.constant 0 : index
    %c0_69 = arith.constant 0 : index
    %41 = vector.load %arg5[%c0_68, %c0_69] : memref<128x128xf32, #tpu.memory_space<vmem>>, vector<128x128xf32>
    %c0_70 = arith.constant 0 : index
    %c1_71 = arith.constant 1 : index
    %c1_72 = arith.constant 1 : index
    %c0_73 = arith.constant 0 : index
    %c0_74 = arith.constant 0 : index
    %42 = vector.load %arg2[%c0_70, %c1_71, %c1_72, %c0_73, %c0_74] : memref<1x3x3x128x128xbf16, #tpu.memory_space<vmem>>, vector<1x1x1x128x128xbf16>
    %43 = vector.shape_cast %42 : vector<1x1x1x128x128xbf16> to vector<128x128xbf16>
    %cst_75 = arith.constant dense<0.000000e+00> : vector<128x128xf32>
    %44 = tpu.matmul %40, %43, %cst_75 {dimension_numbers = #tpu.dot_dimension_numbers<[1], [0], [0], [1], [0, 0, 1, 1], [], []>} : vector<128x128xbf16>, vector<128x128xbf16>, vector<128x128xf32> -> vector<128x128xf32>
    %45 = arith.addf %41, %44 : vector<128x128xf32>
    %c0_76 = arith.constant 0 : index
    %c0_77 = arith.constant 0 : index
    %46 = vector.load %arg5[%c0_76, %c0_77] : memref<128x128xf32, #tpu.memory_space<vmem>>, vector<128x128xf32>
    tpu.vector_store %arg5[%c0_76, %c0_77], %45 {strides = array<i32>} : memref<128x128xf32, #tpu.memory_space<vmem>>, vector<128x128xf32>,
    %c0_78 = arith.constant 0 : index
    %c0_79 = arith.constant 0 : index
    %c2_80 = arith.constant 2 : index
    %c0_81 = arith.constant 0 : index
    %c1_82 = arith.constant 1 : index
    %c0_83 = arith.constant 0 : index
    %47 = vector.load %arg1[%c0_78, %c0_79, %c2_80, %c0_81, %c1_82, %c0_83] : memref<1x2x4x9x9x128xbf16, #tpu.memory_space<vmem>>, vector<1x2x1x8x8x128xbf16>
    %48 = vector.shape_cast %47 : vector<1x2x1x8x8x128xbf16> to vector<2x8x8x128xbf16>
    %49 = vector.shape_cast %48 : vector<2x8x8x128xbf16> to vector<128x128xbf16>
    %c0_84 = arith.constant 0 : index
    %c0_85 = arith.constant 0 : index
    %50 = vector.load %arg5[%c0_84, %c0_85] : memref<128x128xf32, #tpu.memory_space<vmem>>, vector<128x128xf32>
    %c0_86 = arith.constant 0 : index
    %c1_87 = arith.constant 1 : index
    %c2_88 = arith.constant 2 : index
    %c0_89 = arith.constant 0 : index
    %c0_90 = arith.constant 0 : index
    %51 = vector.load %arg2[%c0_86, %c1_87, %c2_88, %c0_89, %c0_90] : memref<1x3x3x128x128xbf16, #tpu.memory_space<vmem>>, vector<1x1x1x128x128xbf16>
    %52 = vector.shape_cast %51 : vector<1x1x1x128x128xbf16> to vector<128x128xbf16>
    %cst_91 = arith.constant dense<0.000000e+00> : vector<128x128xf32>
    %53 = tpu.matmul %49, %52, %cst_91 {dimension_numbers = #tpu.dot_dimension_numbers<[1], [0], [0], [1], [0, 0, 1, 1], [], []>} : vector<128x128xbf16>, vector<128x128xbf16>, vector<128x128xf32> -> vector<128x128xf32>
    %54 = arith.addf %50, %53 : vector<128x128xf32>
    %c0_92 = arith.constant 0 : index
    %c0_93 = arith.constant 0 : index
    %55 = vector.load %arg5[%c0_92, %c0_93] : memref<128x128xf32, #tpu.memory_space<vmem>>, vector<128x128xf32>
    tpu.vector_store %arg5[%c0_92, %c0_93], %54 {strides = array<i32>} : memref<128x128xf32, #tpu.memory_space<vmem>>, vector<128x128xf32>,
    %c0_94 = arith.constant 0 : index
    %c0_95 = arith.constant 0 : index
    %c0_96 = arith.constant 0 : index
    %c1_97 = arith.constant 1 : index
    %c0_98 = arith.constant 0 : index
    %c0_99 = arith.constant 0 : index
    %56 = vector.load %arg1[%c0_94, %c0_95, %c0_96, %c1_97, %c0_98, %c0_99] : memref<1x2x4x9x9x128xbf16, #tpu.memory_space<vmem>>, vector<1x2x1x8x8x128xbf16>
    %57 = vector.shape_cast %56 : vector<1x2x1x8x8x128xbf16> to vector<2x8x8x128xbf16>
    %58 = vector.shape_cast %57 : vector<2x8x8x128xbf16> to vector<128x128xbf16>
    %c0_100 = arith.constant 0 : index
    %c0_101 = arith.constant 0 : index
    %59 = vector.load %arg5[%c0_100, %c0_101] : memref<128x128xf32, #tpu.memory_space<vmem>>, vector<128x128xf32>
    %c0_102 = arith.constant 0 : index
    %c2_103 = arith.constant 2 : index
    %c0_104 = arith.constant 0 : index
    %c0_105 = arith.constant 0 : index
    %c0_106 = arith.constant 0 : index
    %60 = vector.load %arg2[%c0_102, %c2_103, %c0_104, %c0_105, %c0_106] : memref<1x3x3x128x128xbf16, #tpu.memory_space<vmem>>, vector<1x1x1x128x128xbf16>
    %61 = vector.shape_cast %60 : vector<1x1x1x128x128xbf16> to vector<128x128xbf16>
    %cst_107 = arith.constant dense<0.000000e+00> : vector<128x128xf32>
    %62 = tpu.matmul %58, %61, %cst_107 {dimension_numbers = #tpu.dot_dimension_numbers<[1], [0], [0], [1], [0, 0, 1, 1], [], []>} : vector<128x128xbf16>, vector<128x128xbf16>, vector<128x128xf32> -> vector<128x128xf32>
    %63 = arith.addf %59, %62 : vector<128x128xf32>
    %c0_108 = arith.constant 0 : index
    %c0_109 = arith.constant 0 : index
    %64 = vector.load %arg5[%c0_108, %c0_109] : memref<128x128xf32, #tpu.memory_space<vmem>>, vector<128x128xf32>
    tpu.vector_store %arg5[%c0_108, %c0_109], %63 {strides = array<i32>} : memref<128x128xf32, #tpu.memory_space<vmem>>, vector<128x128xf32>,
    %c0_110 = arith.constant 0 : index
    %c0_111 = arith.constant 0 : index
    %c1_112 = arith.constant 1 : index
    %c1_113 = arith.constant 1 : index
    %c0_114 = arith.constant 0 : index
    %c0_115 = arith.constant 0 : index
    %65 = vector.load %arg1[%c0_110, %c0_111, %c1_112, %c1_113, %c0_114, %c0_115] : memref<1x2x4x9x9x128xbf16, #tpu.memory_space<vmem>>, vector<1x2x1x8x8x128xbf16>
    %66 = vector.shape_cast %65 : vector<1x2x1x8x8x128xbf16> to vector<2x8x8x128xbf16>
    %67 = vector.shape_cast %66 : vector<2x8x8x128xbf16> to vector<128x128xbf16>
    %c0_116 = arith.constant 0 : index
    %c0_117 = arith.constant 0 : index
    %68 = vector.load %arg5[%c0_116, %c0_117] : memref<128x128xf32, #tpu.memory_space<vmem>>, vector<128x128xf32>
    %c0_118 = arith.constant 0 : index
    %c2_119 = arith.constant 2 : index
    %c1_120 = arith.constant 1 : index
    %c0_121 = arith.constant 0 : index
    %c0_122 = arith.constant 0 : index
    %69 = vector.load %arg2[%c0_118, %c2_119, %c1_120, %c0_121, %c0_122] : memref<1x3x3x128x128xbf16, #tpu.memory_space<vmem>>, vector<1x1x1x128x128xbf16>
    %70 = vector.shape_cast %69 : vector<1x1x1x128x128xbf16> to vector<128x128xbf16>
    %cst_123 = arith.constant dense<0.000000e+00> : vector<128x128xf32>
    %71 = tpu.matmul %67, %70, %cst_123 {dimension_numbers = #tpu.dot_dimension_numbers<[1], [0], [0], [1], [0, 0, 1, 1], [], []>} : vector<128x128xbf16>, vector<128x128xbf16>, vector<128x128xf32> -> vector<128x128xf32>
    %72 = arith.addf %68, %71 : vector<128x128xf32>
    %c0_124 = arith.constant 0 : index
    %c0_125 = arith.constant 0 : index
    %73 = vector.load %arg5[%c0_124, %c0_125] : memref<128x128xf32, #tpu.memory_space<vmem>>, vector<128x128xf32>
    tpu.vector_store %arg5[%c0_124, %c0_125], %72 {strides = array<i32>} : memref<128x128xf32, #tpu.memory_space<vmem>>, vector<128x128xf32>,
    %c0_126 = arith.constant 0 : index
    %c0_127 = arith.constant 0 : index
    %c0_128 = arith.constant 0 : index
    %c1_129 = arith.constant 1 : index
    %c1_130 = arith.constant 1 : index
    %c0_131 = arith.constant 0 : index
    %74 = vector.load %arg1[%c0_126, %c0_127, %c0_128, %c1_129, %c1_130, %c0_131] : memref<1x2x4x9x9x128xbf16, #tpu.memory_space<vmem>>, vector<1x2x1x8x8x128xbf16>
    %75 = vector.shape_cast %74 : vector<1x2x1x8x8x128xbf16> to vector<2x8x8x128xbf16>
    %76 = vector.shape_cast %75 : vector<2x8x8x128xbf16> to vector<128x128xbf16>
    %c0_132 = arith.constant 0 : index
    %c0_133 = arith.constant 0 : index
    %77 = vector.load %arg5[%c0_132, %c0_133] : memref<128x128xf32, #tpu.memory_space<vmem>>, vector<128x128xf32>
    %c0_134 = arith.constant 0 : index
    %c2_135 = arith.constant 2 : index
    %c2_136 = arith.constant 2 : index
    %c0_137 = arith.constant 0 : index
    %c0_138 = arith.constant 0 : index
    %78 = vector.load %arg2[%c0_134, %c2_135, %c2_136, %c0_137, %c0_138] : memref<1x3x3x128x128xbf16, #tpu.memory_space<vmem>>, vector<1x1x1x128x128xbf16>
    %79 = vector.shape_cast %78 : vector<1x1x1x128x128xbf16> to vector<128x128xbf16>
    %cst_139 = arith.constant dense<0.000000e+00> : vector<128x128xf32>
    %80 = tpu.matmul %76, %79, %cst_139 {dimension_numbers = #tpu.dot_dimension_numbers<[1], [0], [0], [1], [0, 0, 1, 1], [], []>} : vector<128x128xbf16>, vector<128x128xbf16>, vector<128x128xf32> -> vector<128x128xf32>
    %81 = arith.addf %77, %80 : vector<128x128xf32>
    %c0_140 = arith.constant 0 : index
    %c0_141 = arith.constant 0 : index
    %82 = vector.load %arg5[%c0_140, %c0_141] : memref<128x128xf32, #tpu.memory_space<vmem>>, vector<128x128xf32>
    tpu.vector_store %arg5[%c0_140, %c0_141], %81 {strides = array<i32>} : memref<128x128xf32, #tpu.memory_space<vmem>>, vector<128x128xf32>,
    %c0_142 = arith.constant 0 : index
    %c0_143 = arith.constant 0 : index
    %83 = vector.load %arg5[%c0_142, %c0_143] : memref<128x128xf32, #tpu.memory_space<vmem>>, vector<128x128xf32>
    %c0_144 = arith.constant 0 : index
    %c0_145 = arith.constant 0 : index
    %84 = vector.load %arg3[%c0_144, %c0_145] : memref<1x128xf32, #tpu.memory_space<vmem>>, vector<1x128xf32>
    %85 = vector.broadcast %84 : vector<1x128xf32> to vector<128x128xf32>
    %86 = arith.addf %83, %85 : vector<128x128xf32>
    %cst_146 = arith.constant 0.000000e+00 : f32
    %87 = vector.broadcast %cst_146 : f32 to vector<128x128xf32>
    %88 = arith.maximumf %86, %87 : vector<128x128xf32>
    %89 = arith.truncf %88 : vector<128x128xf32> to vector<128x128xbf16>
    %c0_147 = arith.constant 0 : index
    %c0_148 = arith.constant 0 : index
    %c0_149 = arith.constant 0 : index
    %90 = vector.load %arg4[%c0_147, %c0_148, %c0_149] : memref<1x128x128xbf16, #tpu.memory_space<vmem>>, vector<1x128x128xbf16>
    %91 = vector.shape_cast %90 : vector<1x128x128xbf16> to vector<128x128xbf16>
    %92 = vector.shape_cast %89 : vector<128x128xbf16> to vector<1x128x128xbf16>
    tpu.vector_store %arg4[%c0_147, %c0_148, %c0_149], %92 {strides = array<i32>} : memref<1x128x128xbf16, #tpu.memory_space<vmem>>, vector<1x128x128xbf16>,
    return
  }
  func.func @transform_0(%arg0: i32) -> (i32, i32, i32, i32, i32, i32) {
    %c0_i32 = arith.constant 0 : i32
    %c0_i32_0 = arith.constant 0 : i32
    %c0_i32_1 = arith.constant 0 : i32
    %c0_i32_2 = arith.constant 0 : i32
    %c0_i32_3 = arith.constant 0 : i32
    %c0_i32_4 = arith.constant 0 : i32
    return %arg0, %c0_i32, %c0_i32_0, %c0_i32_1, %c0_i32_2, %c0_i32_3 : i32, i32, i32, i32, i32, i32
  }
  func.func @transform_1(%arg0: i32) -> (i32, i32, i32, i32, i32) {
    %c0_i32 = arith.constant 0 : i32
    %c0_i32_0 = arith.constant 0 : i32
    %c0_i32_1 = arith.constant 0 : i32
    %c0_i32_2 = arith.constant 0 : i32
    %c0_i32_3 = arith.constant 0 : i32
    return %arg0, %c0_i32, %c0_i32_0, %c0_i32_1, %c0_i32_2 : i32, i32, i32, i32, i32
  }
  func.func @transform_2(%arg0: i32) -> (i32, i32) {
    %c0_i32 = arith.constant 0 : i32
    %c0_i32_0 = arith.constant 0 : i32
    %c0_i32_1 = arith.constant 0 : i32
    return %c0_i32, %c0_i32_0 : i32, i32
  }
  func.func @transform_3(%arg0: i32) -> (i32, i32, i32) {
    %c0_i32 = arith.constant 0 : i32
    %c0_i32_0 = arith.constant 0 : i32
    %c0_i32_1 = arith.constant 0 : i32
    return %arg0, %c0_i32, %c0_i32_0 : i32, i32, i32
  }
}

module attributes {stable_mosaic.version = 11 : i64} {
  func.func @_conv3_shortcut_kernel(%arg0: i32, %arg1: i32, %arg2: memref<1x128x128xbf16, #tpu.memory_space<vmem>>, %arg3: memref<1x128x128xbf16, #tpu.memory_space<vmem>>, %arg4: memref<1x128x128xbf16, #tpu.memory_space<vmem>>, %arg5: memref<1x128x128xbf16, #tpu.memory_space<vmem>>, %arg6: memref<1x128xf32, #tpu.memory_space<vmem>>, %arg7: memref<1x128x128xf32, #tpu.memory_space<vmem>>) attributes {dimension_semantics = [#tpu.dimension_semantics<parallel>, #tpu.dimension_semantics<parallel>], iteration_bounds = array<i64: 4, 1>, scalar_prefetch = 0 : i64, scratch_operands = 0 : i64, tpu.core_type = #tpu.core_type<tc>, window_params = [{transform_indices = @transform_0, window_bounds = array<i64: 1, 128, 128>}, {transform_indices = @transform_1, window_bounds = array<i64: 1, 128, 128>}, {transform_indices = @transform_2, window_bounds = array<i64: 1, 128, 128>}, {transform_indices = @transform_3, window_bounds = array<i64: 1, 128, 128>}, {pipeline_mode = #tpu.pipeline_mode<synchronous>, transform_indices = @transform_4, window_bounds = array<i64: 1, 128>}, {transform_indices = @transform_5, window_bounds = array<i64: 1, 128, 128>}]} {
    %c0 = arith.constant 0 : index
    %c0_0 = arith.constant 0 : index
    %c0_1 = arith.constant 0 : index
    %0 = vector.load %arg2[%c0, %c0_0, %c0_1] : memref<1x128x128xbf16, #tpu.memory_space<vmem>>, vector<1x128x128xbf16>
    %1 = vector.shape_cast %0 : vector<1x128x128xbf16> to vector<128x128xbf16>
    %c0_2 = arith.constant 0 : index
    %c0_3 = arith.constant 0 : index
    %c0_4 = arith.constant 0 : index
    %2 = vector.load %arg4[%c0_2, %c0_3, %c0_4] : memref<1x128x128xbf16, #tpu.memory_space<vmem>>, vector<1x128x128xbf16>
    %3 = vector.shape_cast %2 : vector<1x128x128xbf16> to vector<128x128xbf16>
    %cst = arith.constant dense<0.000000e+00> : vector<128x128xf32>
    %4 = tpu.matmul %1, %3, %cst {dimension_numbers = #tpu.dot_dimension_numbers<[1], [0], [0], [1], [0, 0, 1, 1], [], []>} : vector<128x128xbf16>, vector<128x128xbf16>, vector<128x128xf32> -> vector<128x128xf32>
    %c0_5 = arith.constant 0 : index
    %c0_6 = arith.constant 0 : index
    %c0_7 = arith.constant 0 : index
    %5 = vector.load %arg3[%c0_5, %c0_6, %c0_7] : memref<1x128x128xbf16, #tpu.memory_space<vmem>>, vector<1x128x128xbf16>
    %6 = vector.shape_cast %5 : vector<1x128x128xbf16> to vector<128x128xbf16>
    %c0_8 = arith.constant 0 : index
    %c0_9 = arith.constant 0 : index
    %c0_10 = arith.constant 0 : index
    %7 = vector.load %arg5[%c0_8, %c0_9, %c0_10] : memref<1x128x128xbf16, #tpu.memory_space<vmem>>, vector<1x128x128xbf16>
    %8 = vector.shape_cast %7 : vector<1x128x128xbf16> to vector<128x128xbf16>
    %cst_11 = arith.constant dense<0.000000e+00> : vector<128x128xf32>
    %9 = tpu.matmul %6, %8, %cst_11 {dimension_numbers = #tpu.dot_dimension_numbers<[1], [0], [0], [1], [0, 0, 1, 1], [], []>} : vector<128x128xbf16>, vector<128x128xbf16>, vector<128x128xf32> -> vector<128x128xf32>
    %10 = arith.addf %4, %9 : vector<128x128xf32>
    %c0_12 = arith.constant 0 : index
    %c0_13 = arith.constant 0 : index
    %11 = vector.load %arg6[%c0_12, %c0_13] : memref<1x128xf32, #tpu.memory_space<vmem>>, vector<1x128xf32>
    %12 = vector.broadcast %11 : vector<1x128xf32> to vector<128x128xf32>
    %13 = arith.addf %10, %12 : vector<128x128xf32>
    %cst_14 = arith.constant 0.000000e+00 : f32
    %14 = vector.broadcast %cst_14 : f32 to vector<128x128xf32>
    %15 = arith.maximumf %13, %14 : vector<128x128xf32>
    %c0_15 = arith.constant 0 : index
    %c0_16 = arith.constant 0 : index
    %c0_17 = arith.constant 0 : index
    %16 = vector.load %arg7[%c0_15, %c0_16, %c0_17] : memref<1x128x128xf32, #tpu.memory_space<vmem>>, vector<1x128x128xf32>
    %17 = vector.shape_cast %16 : vector<1x128x128xf32> to vector<128x128xf32>
    %18 = vector.shape_cast %15 : vector<128x128xf32> to vector<1x128x128xf32>
    tpu.vector_store %arg7[%c0_15, %c0_16, %c0_17], %18 {strides = array<i32>} : memref<1x128x128xf32, #tpu.memory_space<vmem>>, vector<1x128x128xf32>,
    return
  }
  func.func @transform_0(%arg0: i32, %arg1: i32) -> (i32, i32, i32) {
    %c0_i32 = arith.constant 0 : i32
    %c0_i32_0 = arith.constant 0 : i32
    return %arg0, %arg1, %c0_i32 : i32, i32, i32
  }
  func.func @transform_1(%arg0: i32, %arg1: i32) -> (i32, i32, i32) {
    %c0_i32 = arith.constant 0 : i32
    %c0_i32_0 = arith.constant 0 : i32
    return %arg0, %arg1, %c0_i32 : i32, i32, i32
  }
  func.func @transform_2(%arg0: i32, %arg1: i32) -> (i32, i32, i32) {
    %c0_i32 = arith.constant 0 : i32
    %c0_i32_0 = arith.constant 0 : i32
    %c0_i32_1 = arith.constant 0 : i32
    return %arg0, %c0_i32, %c0_i32_0 : i32, i32, i32
  }
  func.func @transform_3(%arg0: i32, %arg1: i32) -> (i32, i32, i32) {
    %c0_i32 = arith.constant 0 : i32
    %c0_i32_0 = arith.constant 0 : i32
    %c0_i32_1 = arith.constant 0 : i32
    return %arg0, %c0_i32, %c0_i32_0 : i32, i32, i32
  }
  func.func @transform_4(%arg0: i32, %arg1: i32) -> (i32, i32) {
    %c0_i32 = arith.constant 0 : i32
    %c0_i32_0 = arith.constant 0 : i32
    %c0_i32_1 = arith.constant 0 : i32
    return %c0_i32, %c0_i32_0 : i32, i32
  }
  func.func @transform_5(%arg0: i32, %arg1: i32) -> (i32, i32, i32) {
    %c0_i32 = arith.constant 0 : i32
    %c0_i32_0 = arith.constant 0 : i32
    return %arg0, %arg1, %c0_i32 : i32, i32, i32
  }
}

</mosaic_0001>

<bundles_post_ra>
// kernel: bottleneck_forward.3
= control target key start
LH: loop header
LB: loop body
LE: loop exit
PB: predicated region body
PF: predicated region fallthrough
CT: control target
= control target key end

     0   :  { %s1950_s12 = smov 0   ;;  %s1952_s13 = smov 0   ;;  %s2141_s0 = inlined_call_operand.vmem [shape: bf16[4,512,128], index: 0, kind: input, shape index: {}]   ;;  %s2142_s1 = inlined_call_operand.vmem [shape: bf16[4,128,128], index: 1, kind: input, shape index: {}]   ;;  %s2143_s2 = inlined_call_operand.vmem [shape: f32[1,128], index: 2, kind: input, shape index: {}]   ;;  %s2144_s3 = inlined_call_operand.vmem [shape: bf16[4,512,128], index: 3, kind: output, shape index: {}]  }
   0x1   :  { %s1954_s14 = smov 0  }
   0x2 LB: > { %s25_s15 = sadd.s32 1, %s1924_s13  ;;  %p1334_p0 = scmp.ge.s32.totalorder %s1928_s14, 1  ;;  %s1928_s14 = sphi %s1954_s14, %s13_s14   ;;  %s1924_s13 = sphi %s1952_s13, %s2146_s13   ;;  %s1920_s12 = sphi %s1950_s12, %s2145_s12  }
   0x3   : > { %p27_p1 = scmp.ge.s32.totalorder %s25_s15, 4  ;;  %p168_p2 = scmp.lt.s32.totalorder %s1928_s14, 5 }
   0x5   : > { %s2148_s15 = smov (%p27_p1, %s25_s15), 0  ;;  %p169_p3 = pnand %p1334_p0, %p168_p2 }
   0x6   : > { %p206_p4 = scmp.lt.s32.totalorder (!%p169_p3), %s1920_s12, 3 }
   0x7   : > { %172 = sbr.rel (%p169_p3) target bundleno = 310 (0x136), region = 32 }
   0xc   : > { %s2150_s12 = smov (!%p206_p4, %s1920_s12), 3  ;;  %v2027_v40 = vld [vmem:[%s2143_s2] ss:$0 sm:$0xff] }
   0xd   : > { %s1449_s16 = sshll.u32 %s2150_s12, 6  ;;  %s1448_s20 = sshll.u32 %s2150_s12, 8 }
   0xe   : > { %s1974_s19 = scalar_lea.vmem %s2142_s1, %s1449_s16  ;;  %s1985_s23 = scalar_lea.vmem %s2141_s0, %s1448_s20 }
   0xf   : > { %v1866_v0 = vld [vmem:[%s1974_s19 + $0x38] sm:$0xff]   ;;  %v1867_v1 = vld [vmem:[%s1974_s19 + $0x30] sm:$0xff]   ;;  %v1868_v2 = vld [vmem:[%s1974_s19 + $0x28] sm:$0xff]   ;;  %s2042_s28 = scalar_lea.vmem %s2144_s3, %s1448_s20 }
  0x10   : > { %1746 = vmatprep.subr.bf16.mxu0 %v1866_v0  ;;  %1826 = vmatprep.subr.bf16.mxu1 %v1866_v0  ;;  %v1869_v3 = vld [vmem:[%s1974_s19 + $0x20] sm:$0xff]   ;;  %v1870_v6 = vld [vmem:[%s1974_s19 + $0x18] sm:$0xff]   ;;  %v1871_v7 = vld [vmem:[%s1974_s19 + $0x10] sm:$0xff]  }
  0x11   : > { %1747 = vmatpush3.bf16.msra.mxu0 %v1866_v0  ;;  %1834 = vmatpush3.bf16.msra.mxu1 %v1866_v0  ;;  %v1874_v4 = vld [vmem:[%s1985_s23] sm:$0xff]   ;;  %v1872_v8 = vld [vmem:[%s1974_s19 + $0x8] sm:$0xff]   ;;  %v1878_v12 = vld [vmem:[%s1985_s23 + $0x10] sm:$0xff]  }
  0x12   : > { %1748 = vmatprep.subr.bf16.mxu0 %v1867_v1  ;;  %1827 = vmatprep.subr.bf16.mxu1 %v1867_v1  ;;  %v1875_v5 = vld [vmem:[%s1985_s23 + $0x80] sm:$0xff]   ;;  %v1876_v10 = vld [vmem:[%s1985_s23 + $0x8] sm:$0xff]   ;;  %v1879_v13 = vld [vmem:[%s1985_s23 + $0x90] sm:$0xff]  }
  0x13   : > { %1762 = vmatprep.mubr.bf16.mxu0 %v1874_v4  ;;  %1794 = vmatprep.mubr.bf16.mxu1 %v1875_v5  ;;  %v1873_v9 = vld [vmem:[%s1974_s19] sm:$0xff]   ;;  %v1877_v11 = vld [vmem:[%s1985_s23 + $0x88] sm:$0xff]   ;;  %v1880_v14 = vld [vmem:[%s1985_s23 + $0x18] sm:$0xff]  }
  0x14   : > { %v1881_v15 = vld [vmem:[%s1985_s23 + $0x98] sm:$0xff]   ;;  %v1882_v16 = vld [vmem:[%s1985_s23 + $0x20] sm:$0xff]   ;;  %v1884_v18 = vld [vmem:[%s1985_s23 + $0x28] sm:$0xff]  }
  0x15   : > { %1749 = vmatpush3.bf16.msra.mxu0 %v1867_v1  ;;  %1835 = vmatpush3.bf16.msra.mxu1 %v1867_v1  ;;  %v1883_v17 = vld [vmem:[%s1985_s23 + $0xa0] sm:$0xff]   ;;  %v1885_v19 = vld [vmem:[%s1985_s23 + $0xa8] sm:$0xff]   ;;  %v1886_v20 = vld [vmem:[%s1985_s23 + $0x30] sm:$0xff]  }
  0x16   : > { %1750 = vmatprep.subr.bf16.mxu0 %v1868_v2  ;;  %1828 = vmatprep.subr.bf16.mxu1 %v1868_v2  ;;  %v1887_v21 = vld [vmem:[%s1985_s23 + $0xb0] sm:$0xff]   ;;  %v1888_v22 = vld [vmem:[%s1985_s23 + $0x38] sm:$0xff]   ;;  %v1890_v24 = vld [vmem:[%s1985_s23 + $0x40] sm:$0xff]  }
  0x17   : > { %v1889_v23 = vld [vmem:[%s1985_s23 + $0xb8] sm:$0xff]   ;;  %v1891_v25 = vld [vmem:[%s1985_s23 + $0xc0] sm:$0xff]   ;;  %v1892_v26 = vld [vmem:[%s1985_s23 + $0x48] sm:$0xff]  }
  0x18   : > { %v1893_v27 = vld [vmem:[%s1985_s23 + $0xc8] sm:$0xff]   ;;  %v1894_v28 = vld [vmem:[%s1985_s23 + $0x50] sm:$0xff]   ;;  %v1896_v30 = vld [vmem:[%s1985_s23 + $0x58] sm:$0xff]  }
  0x19   : > { %1751 = vmatpush3.bf16.msra.mxu0 %v1868_v2  ;;  %1836 = vmatpush3.bf16.msra.mxu1 %v1868_v2  ;;  %v1895_v29 = vld [vmem:[%s1985_s23 + $0xd0] sm:$0xff]   ;;  %v1897_v31 = vld [vmem:[%s1985_s23 + $0xd8] sm:$0xff]   ;;  %v1898_v32 = vld [vmem:[%s1985_s23 + $0x60] sm:$0xff]  }
  0x1a   : > { %1752 = vmatprep.subr.bf16.mxu0 %v1869_v3  ;;  %1829 = vmatprep.subr.bf16.mxu1 %v1869_v3  ;;  %v1899_v33 = vld [vmem:[%s1985_s23 + $0xe0] sm:$0xff]   ;;  %v1900_v34 = vld [vmem:[%s1985_s23 + $0x68] sm:$0xff]   ;;  %v1902_v36 = vld [vmem:[%s1985_s23 + $0x70] sm:$0xff]  }
  0x1b   : > { %v1901_v35 = vld [vmem:[%s1985_s23 + $0xe8] sm:$0xff]   ;;  %v1903_v37 = vld [vmem:[%s1985_s23 + $0xf0] sm:$0xff]   ;;  %v1904_v38 = vld [vmem:[%s1985_s23 + $0x78] sm:$0xff]  }
  0x1c   : > { %v1905_v39 = vld [vmem:[%s1985_s23 + $0xf8] sm:$0xff]  }
  0x1d   : > { %1753 = vmatpush3.bf16.msra.mxu0 %v1869_v3  ;;  %1837 = vmatpush3.bf16.msra.mxu1 %v1869_v3 }
  0x1e   : > { %1754 = vmatprep.subr.bf16.mxu0 %v1870_v6  ;;  %1830 = vmatprep.subr.bf16.mxu1 %v1870_v6 }
  0x21   : > { %1755 = vmatpush3.bf16.msra.mxu0 %v1870_v6  ;;  %1838 = vmatpush3.bf16.msra.mxu1 %v1870_v6 }
  0x22   : > { %1756 = vmatprep.subr.bf16.mxu0 %v1871_v7  ;;  %1831 = vmatprep.subr.bf16.mxu1 %v1871_v7 }
  0x25   : > { %1757 = vmatpush3.bf16.msra.mxu0 %v1871_v7  ;;  %1839 = vmatpush3.bf16.msra.mxu1 %v1871_v7 }
  0x26   : > { %1758 = vmatprep.subr.bf16.mxu0 %v1872_v8  ;;  %1832 = vmatprep.subr.bf16.mxu1 %v1872_v8 }
  0x29   : > { %1759 = vmatpush3.bf16.msra.mxu0 %v1872_v8  ;;  %1840 = vmatpush3.bf16.msra.mxu1 %v1872_v8 }
  0x2a   : > { %1760 = vmatprep.subr.bf16.mxu0 %v1873_v9  ;;  %1833 = vmatprep.subr.bf16.mxu1 %v1873_v9 }
  0x2d   : > { %1761 = vmatpush3.bf16.msra.mxu0 %v1873_v9  ;;  %1841 = vmatpush3.bf16.msra.mxu1 %v1873_v9 }
  0x30   : > { %1763 = vmatmul.mubr.bf16.vlgmr.msra.gmra.mxu0 %v1876_v10  ;;  %1795 = vmatmul.mubr.bf16.vlgmr.msra.gmra.mxu1 %v1877_v11 }
  0x31   : > { %1766 = vmatprep.mubr.bf16.mxu0 %v1878_v12  ;;  %1798 = vmatprep.mubr.bf16.mxu1 %v1879_v13 }
  0x38   : > { %1767 = vmatmul.mubr.bf16.gmra.mxu0 %v1880_v14  ;;  %1799 = vmatmul.mubr.bf16.gmra.mxu1 %v1881_v15 }
  0x39   : > { %1770 = vmatprep.mubr.bf16.mxu0 %v1882_v16  ;;  %1802 = vmatprep.mubr.bf16.mxu1 %v1883_v17 }
  0x40   : > { %1771 = vmatmul.mubr.bf16.gmra.mxu0 %v1884_v18  ;;  %1803 = vmatmul.mubr.bf16.gmra.mxu1 %v1885_v19 }
  0x41   : > { %1774 = vmatprep.mubr.bf16.mxu0 %v1886_v20  ;;  %1806 = vmatprep.mubr.bf16.mxu1 %v1887_v21 }
  0x48   : > { %1775 = vmatmul.mubr.bf16.gmra.mxu0 %v1888_v22  ;;  %1807 = vmatmul.mubr.bf16.gmra.mxu1 %v1889_v23 }
  0x49   : > { %1778 = vmatprep.mubr.bf16.mxu0 %v1890_v24  ;;  %1810 = vmatprep.mubr.bf16.mxu1 %v1891_v25 }
  0x50   : > { %1779 = vmatmul.mubr.bf16.gmra.mxu0 %v1892_v26  ;;  %1811 = vmatmul.mubr.bf16.gmra.mxu1 %v1893_v27 }
  0x51   : > { %1782 = vmatprep.mubr.bf16.mxu0 %v1894_v28  ;;  %1814 = vmatprep.mubr.bf16.mxu1 %v1895_v29 }
  0x58   : > { %1783 = vmatmul.mubr.bf16.gmra.mxu0 %v1896_v30  ;;  %1815 = vmatmul.mubr.bf16.gmra.mxu1 %v1897_v31 }
  0x59   : > { %1786 = vmatprep.mubr.bf16.mxu0 %v1898_v32  ;;  %1818 = vmatprep.mubr.bf16.mxu1 %v1899_v33 }
  0x60   : > { %1787 = vmatmul.mubr.bf16.gmra.mxu0 %v1900_v34  ;;  %1819 = vmatmul.mubr.bf16.gmra.mxu1 %v1901_v35 }
  0x61   : > { %1790 = vmatprep.mubr.bf16.mxu0 %v1902_v36  ;;  %1822 = vmatprep.mubr.bf16.mxu1 %v1903_v37 }
  0x68   : > { %1791 = vmatmul.mubr.bf16.gmra.mxu0 %v1904_v38  ;;  %1823 = vmatmul.mubr.bf16.gmra.mxu1 %v1905_v39 }
  0xf0   : > { %v1764_v41 = vpop.f32.mrf.mxu0  ;;  %v1796_v42 = vpop.f32.mrf.mxu1 }
  0xf1   : > { %v601_v43 = vadd.f32 %v1764_v41, %v2027_v40  ;;  %v729_v44 = vadd.f32 %v1796_v42, %v2027_v40 }
  0xf2   : > { %v592_v45 = vpop.f32.mrf.mxu0  ;;  %v720_v46 = vpop.f32.mrf.mxu1 }
  0xf3   : > { %v593_v47 = vadd.f32 %v2027_v40, %v592_v45  ;;  %v721_v48 = vadd.f32 %v2027_v40, %v720_v46  ;;  %v849_v53 = vmax.f32 %v601_v43, 0.0  ;;  %v881_v54 = vmax.f32 %v729_v44, 0.0 }
  0xf4   : > { %v1765_v49 = vpop.f32.mrf.mxu0  ;;  %v1797_v50 = vpop.f32.mrf.mxu1 }
  0xf5   : > { %v604_v51 = vadd.f32 %v1765_v49, %v2027_v40  ;;  %v732_v52 = vadd.f32 %v1797_v50, %v2027_v40  ;;  %v847_v61 = vmax.f32 %v593_v47, 0.0  ;;  %v879_v62 = vmax.f32 %v721_v48, 0.0 }
  0xf6   : > { %v595_v55 = vpop.f32.mrf.mxu0  ;;  %v723_v56 = vpop.f32.mrf.mxu1 }
  0xf7   : > { %v850_v57 = vmax.f32 %v604_v51, 0.0  ;;  %v882_v58 = vmax.f32 %v732_v52, 0.0  ;;  %v596_v59 = vadd.f32 %v2027_v40, %v595_v55  ;;  %v724_v60 = vadd.f32 %v2027_v40, %v723_v56 }
  0xf8   : > { %v1768_v63 = vpop.f32.mrf.mxu0  ;;  %v1800_v0 = vpop.f32.mrf.mxu1 }
  0xf9   : > { %v1523_v1 = vpack.c.bf16 %v850_v57, %v849_v53  ;;  %v1603_v2 = vpack.c.bf16 %v882_v58, %v881_v54  ;;  %v848_v3 = vmax.f32 %v596_v59, 0.0  ;;  %v880_v4 = vmax.f32 %v724_v60, 0.0 }
  0xfa   : > { %v617_v5 = vadd.f32 %v1768_v63, %v2027_v40  ;;  %v745_v6 = vadd.f32 %v1800_v0, %v2027_v40  ;;  %v608_v7 = vpop.f32.mrf.mxu0  ;;  %v736_v8 = vpop.f32.mrf.mxu1 }
  0xfb   : > { %1675 = vst [vmem:[%s2042_s28 + $0x8] sm:$0xff] %v1523_v1   ;;  %1691 = vst [vmem:[%s2042_s28 + $0x88] sm:$0xff] %v1603_v2   ;;  %v1518_v9 = vpack.c.bf16 %v848_v3, %v847_v61  ;;  %v1598_v10 = vpack.c.bf16 %v880_v4, %v879_v62  ;;  %v609_v11 = vadd.f32 %v2027_v40, %v608_v7 }
  0xfc   : > { %v737_v12 = vadd.f32 %v2027_v40, %v736_v8  ;;  %v1769_v13 = vpop.f32.mrf.mxu0  ;;  %v1801_v14 = vpop.f32.mrf.mxu1  ;;  %v853_v17 = vmax.f32 %v617_v5, 0.0  ;;  %v885_v18 = vmax.f32 %v745_v6, 0.0 }
  0xfd   : > { %1519 = vst [vmem:[%s2042_s28] sm:$0xff] %v1518_v9   ;;  %1690 = vst [vmem:[%s2042_s28 + $0x80] sm:$0xff] %v1598_v10   ;;  %v620_v15 = vadd.f32 %v1769_v13, %v2027_v40  ;;  %v748_v16 = vadd.f32 %v1801_v14, %v2027_v40  ;;  %v851_v25 = vmax.f32 %v609_v11, 0.0 }
  0xfe   : > { %v611_v19 = vpop.f32.mrf.mxu0  ;;  %v739_v20 = vpop.f32.mrf.mxu1  ;;  %v883_v26 = vmax.f32 %v737_v12, 0.0 }
  0xff   : > { %v854_v21 = vmax.f32 %v620_v15, 0.0  ;;  %v886_v22 = vmax.f32 %v748_v16, 0.0  ;;  %v612_v23 = vadd.f32 %v2027_v40, %v611_v19  ;;  %v740_v24 = vadd.f32 %v2027_v40, %v739_v20 }
 0x100   : > { %v1772_v27 = vpop.f32.mrf.mxu0  ;;  %v1804_v28 = vpop.f32.mrf.mxu1 }
 0x101   : > { %v1533_v29 = vpack.c.bf16 %v854_v21, %v853_v17  ;;  %v1613_v30 = vpack.c.bf16 %v886_v22, %v885_v18  ;;  %v852_v31 = vmax.f32 %v612_v23, 0.0  ;;  %v884_v32 = vmax.f32 %v740_v24, 0.0 }
 0x102   : > { %v633_v33 = vadd.f32 %v1772_v27, %v2027_v40  ;;  %v761_v34 = vadd.f32 %v1804_v28, %v2027_v40  ;;  %v624_v35 = vpop.f32.mrf.mxu0  ;;  %v752_v36 = vpop.f32.mrf.mxu1 }
 0x103   : > { %1677 = vst [vmem:[%s2042_s28 + $0x18] sm:$0xff] %v1533_v29   ;;  %1693 = vst [vmem:[%s2042_s28 + $0x98] sm:$0xff] %v1613_v30   ;;  %v1528_v37 = vpack.c.bf16 %v852_v31, %v851_v25  ;;  %v1608_v38 = vpack.c.bf16 %v884_v32, %v883_v26  ;;  %v625_v39 = vadd.f32 %v2027_v40, %v624_v35 }
 0x104   : > { %v753_v41 = vadd.f32 %v2027_v40, %v752_v36  ;;  %v1773_v42 = vpop.f32.mrf.mxu0  ;;  %v1805_v43 = vpop.f32.mrf.mxu1  ;;  %v857_v46 = vmax.f32 %v633_v33, 0.0  ;;  %v889_v47 = vmax.f32 %v761_v34, 0.0 }
 0x105   : > { %1676 = vst [vmem:[%s2042_s28 + $0x10] sm:$0xff] %v1528_v37   ;;  %1692 = vst [vmem:[%s2042_s28 + $0x90] sm:$0xff] %v1608_v38   ;;  %v636_v44 = vadd.f32 %v1773_v42, %v2027_v40  ;;  %v764_v45 = vadd.f32 %v1805_v43, %v2027_v40  ;;  %v855_v54 = vmax.f32 %v625_v39, 0.0 }
 0x106   : > { %v627_v48 = vpop.f32.mrf.mxu0  ;;  %v755_v49 = vpop.f32.mrf.mxu1  ;;  %v887_v55 = vmax.f32 %v753_v41, 0.0 }
 0x107   : > { %v858_v50 = vmax.f32 %v636_v44, 0.0  ;;  %v890_v51 = vmax.f32 %v764_v45, 0.0  ;;  %v628_v52 = vadd.f32 %v2027_v40, %v627_v48  ;;  %v756_v53 = vadd.f32 %v2027_v40, %v755_v49 }
 0x108   : > { %v1776_v56 = vpop.f32.mrf.mxu0  ;;  %v1808_v57 = vpop.f32.mrf.mxu1 }
 0x109   : > { %v1543_v58 = vpack.c.bf16 %v858_v50, %v857_v46  ;;  %v1623_v59 = vpack.c.bf16 %v890_v51, %v889_v47  ;;  %v856_v60 = vmax.f32 %v628_v52, 0.0  ;;  %v888_v61 = vmax.f32 %v756_v53, 0.0 }
 0x10a   : > { %v649_v62 = vadd.f32 %v1776_v56, %v2027_v40  ;;  %v777_v63 = vadd.f32 %v1808_v57, %v2027_v40  ;;  %v640_v0 = vpop.f32.mrf.mxu0  ;;  %v768_v1 = vpop.f32.mrf.mxu1 }
 0x10b   : > { %1679 = vst [vmem:[%s2042_s28 + $0x28] sm:$0xff] %v1543_v58   ;;  %1695 = vst [vmem:[%s2042_s28 + $0xa8] sm:$0xff] %v1623_v59   ;;  %v1538_v2 = vpack.c.bf16 %v856_v60, %v855_v54  ;;  %v1618_v3 = vpack.c.bf16 %v888_v61, %v887_v55  ;;  %v641_v4 = vadd.f32 %v2027_v40, %v640_v0 }
 0x10c   : > { %v769_v5 = vadd.f32 %v2027_v40, %v768_v1  ;;  %v1777_v6 = vpop.f32.mrf.mxu0  ;;  %v1809_v7 = vpop.f32.mrf.mxu1  ;;  %v861_v10 = vmax.f32 %v649_v62, 0.0  ;;  %v893_v11 = vmax.f32 %v777_v63, 0.0 }
 0x10d   : > { %1678 = vst [vmem:[%s2042_s28 + $0x20] sm:$0xff] %v1538_v2   ;;  %1694 = vst [vmem:[%s2042_s28 + $0xa0] sm:$0xff] %v1618_v3   ;;  %v652_v8 = vadd.f32 %v1777_v6, %v2027_v40  ;;  %v780_v9 = vadd.f32 %v1809_v7, %v2027_v40  ;;  %v859_v18 = vmax.f32 %v641_v4, 0.0 }
 0x10e   : > { %v643_v12 = vpop.f32.mrf.mxu0  ;;  %v771_v13 = vpop.f32.mrf.mxu1  ;;  %v891_v19 = vmax.f32 %v769_v5, 0.0 }
 0x10f   : > { %v862_v14 = vmax.f32 %v652_v8, 0.0  ;;  %v894_v15 = vmax.f32 %v780_v9, 0.0  ;;  %v644_v16 = vadd.f32 %v2027_v40, %v643_v12  ;;  %v772_v17 = vadd.f32 %v2027_v40, %v771_v13 }
 0x110   : > { %v1780_v20 = vpop.f32.mrf.mxu0  ;;  %v1812_v21 = vpop.f32.mrf.mxu1 }
 0x111   : > { %v1553_v22 = vpack.c.bf16 %v862_v14, %v861_v10  ;;  %v1633_v23 = vpack.c.bf16 %v894_v15, %v893_v11  ;;  %v860_v24 = vmax.f32 %v644_v16, 0.0  ;;  %v892_v25 = vmax.f32 %v772_v17, 0.0 }
 0x112   : > { %v665_v26 = vadd.f32 %v1780_v20, %v2027_v40  ;;  %v793_v27 = vadd.f32 %v1812_v21, %v2027_v40  ;;  %v656_v28 = vpop.f32.mrf.mxu0  ;;  %v784_v29 = vpop.f32.mrf.mxu1 }
 0x113   : > { %1681 = vst [vmem:[%s2042_s28 + $0x38] sm:$0xff] %v1553_v22   ;;  %1697 = vst [vmem:[%s2042_s28 + $0xb8] sm:$0xff] %v1633_v23   ;;  %v1548_v30 = vpack.c.bf16 %v860_v24, %v859_v18  ;;  %v1628_v31 = vpack.c.bf16 %v892_v25, %v891_v19  ;;  %v657_v32 = vadd.f32 %v2027_v40, %v656_v28 }
 0x114   : > { %v785_v33 = vadd.f32 %v2027_v40, %v784_v29  ;;  %v1781_v34 = vpop.f32.mrf.mxu0  ;;  %v1813_v35 = vpop.f32.mrf.mxu1  ;;  %v865_v38 = vmax.f32 %v665_v26, 0.0  ;;  %v897_v39 = vmax.f32 %v793_v27, 0.0 }
 0x115   : > { %1680 = vst [vmem:[%s2042_s28 + $0x30] sm:$0xff] %v1548_v30   ;;  %1696 = vst [vmem:[%s2042_s28 + $0xb0] sm:$0xff] %v1628_v31   ;;  %v668_v36 = vadd.f32 %v1781_v34, %v2027_v40  ;;  %v796_v37 = vadd.f32 %v1813_v35, %v2027_v40  ;;  %v863_v47 = vmax.f32 %v657_v32, 0.0 }
 0x116   : > { %v659_v41 = vpop.f32.mrf.mxu0  ;;  %v787_v42 = vpop.f32.mrf.mxu1  ;;  %v895_v48 = vmax.f32 %v785_v33, 0.0 }
 0x117   : > { %v866_v43 = vmax.f32 %v668_v36, 0.0  ;;  %v898_v44 = vmax.f32 %v796_v37, 0.0  ;;  %v660_v45 = vadd.f32 %v2027_v40, %v659_v41  ;;  %v788_v46 = vadd.f32 %v2027_v40, %v787_v42 }
 0x118   : > { %v1784_v49 = vpop.f32.mrf.mxu0  ;;  %v1816_v50 = vpop.f32.mrf.mxu1 }
 0x119   : > { %v1563_v51 = vpack.c.bf16 %v866_v43, %v865_v38  ;;  %v1643_v52 = vpack.c.bf16 %v898_v44, %v897_v39  ;;  %v864_v53 = vmax.f32 %v660_v45, 0.0  ;;  %v896_v54 = vmax.f32 %v788_v46, 0.0 }
 0x11a   : > { %v681_v55 = vadd.f32 %v1784_v49, %v2027_v40  ;;  %v809_v56 = vadd.f32 %v1816_v50, %v2027_v40  ;;  %v672_v57 = vpop.f32.mrf.mxu0  ;;  %v800_v58 = vpop.f32.mrf.mxu1 }
 0x11b   : > { %1683 = vst [vmem:[%s2042_s28 + $0x48] sm:$0xff] %v1563_v51   ;;  %1699 = vst [vmem:[%s2042_s28 + $0xc8] sm:$0xff] %v1643_v52   ;;  %v1558_v59 = vpack.c.bf16 %v864_v53, %v863_v47  ;;  %v1638_v60 = vpack.c.bf16 %v896_v54, %v895_v48  ;;  %v673_v61 = vadd.f32 %v2027_v40, %v672_v57 }
 0x11c   : > { %v801_v62 = vadd.f32 %v2027_v40, %v800_v58  ;;  %v1785_v63 = vpop.f32.mrf.mxu0  ;;  %v1817_v0 = vpop.f32.mrf.mxu1  ;;  %v869_v3 = vmax.f32 %v681_v55, 0.0  ;;  %v901_v4 = vmax.f32 %v809_v56, 0.0 }
 0x11d   : > { %1682 = vst [vmem:[%s2042_s28 + $0x40] sm:$0xff] %v1558_v59   ;;  %1698 = vst [vmem:[%s2042_s28 + $0xc0] sm:$0xff] %v1638_v60   ;;  %v684_v1 = vadd.f32 %v1785_v63, %v2027_v40  ;;  %v812_v2 = vadd.f32 %v1817_v0, %v2027_v40  ;;  %v867_v11 = vmax.f32 %v673_v61, 0.0 }
 0x11e   : > { %v675_v5 = vpop.f32.mrf.mxu0  ;;  %v803_v6 = vpop.f32.mrf.mxu1  ;;  %v899_v12 = vmax.f32 %v801_v62, 0.0 }
 0x11f   : > { %v870_v7 = vmax.f32 %v684_v1, 0.0  ;;  %v902_v8 = vmax.f32 %v812_v2, 0.0  ;;  %v676_v9 = vadd.f32 %v2027_v40, %v675_v5  ;;  %v804_v10 = vadd.f32 %v2027_v40, %v803_v6 }
 0x120   : > { %v1788_v13 = vpop.f32.mrf.mxu0  ;;  %v1820_v14 = vpop.f32.mrf.mxu1 }
 0x121   : > { %v1573_v15 = vpack.c.bf16 %v870_v7, %v869_v3  ;;  %v1653_v16 = vpack.c.bf16 %v902_v8, %v901_v4  ;;  %v868_v17 = vmax.f32 %v676_v9, 0.0  ;;  %v900_v18 = vmax.f32 %v804_v10, 0.0 }
 0x122   : > { %v697_v19 = vadd.f32 %v1788_v13, %v2027_v40  ;;  %v825_v20 = vadd.f32 %v1820_v14, %v2027_v40  ;;  %v688_v21 = vpop.f32.mrf.mxu0  ;;  %v816_v22 = vpop.f32.mrf.mxu1 }
 0x123   : > { %1685 = vst [vmem:[%s2042_s28 + $0x58] sm:$0xff] %v1573_v15   ;;  %1701 = vst [vmem:[%s2042_s28 + $0xd8] sm:$0xff] %v1653_v16   ;;  %v1568_v23 = vpack.c.bf16 %v868_v17, %v867_v11  ;;  %v1648_v24 = vpack.c.bf16 %v900_v18, %v899_v12  ;;  %v689_v25 = vadd.f32 %v2027_v40, %v688_v21 }
 0x124   : > { %v817_v26 = vadd.f32 %v2027_v40, %v816_v22  ;;  %v1789_v27 = vpop.f32.mrf.mxu0  ;;  %v1821_v28 = vpop.f32.mrf.mxu1  ;;  %v873_v31 = vmax.f32 %v697_v19, 0.0  ;;  %v905_v32 = vmax.f32 %v825_v20, 0.0 }
 0x125   : > { %1684 = vst [vmem:[%s2042_s28 + $0x50] sm:$0xff] %v1568_v23   ;;  %1700 = vst [vmem:[%s2042_s28 + $0xd0] sm:$0xff] %v1648_v24   ;;  %v700_v29 = vadd.f32 %v1789_v27, %v2027_v40  ;;  %v828_v30 = vadd.f32 %v1821_v28, %v2027_v40  ;;  %v871_v39 = vmax.f32 %v689_v25, 0.0 }
 0x126   : > { %v691_v33 = vpop.f32.mrf.mxu0  ;;  %v819_v34 = vpop.f32.mrf.mxu1  ;;  %v903_v41 = vmax.f32 %v817_v26, 0.0 }
 0x127   : > { %v874_v35 = vmax.f32 %v700_v29, 0.0  ;;  %v906_v36 = vmax.f32 %v828_v30, 0.0  ;;  %v692_v37 = vadd.f32 %v2027_v40, %v691_v33  ;;  %v820_v38 = vadd.f32 %v2027_v40, %v819_v34 }
 0x128   : > { %v1792_v42 = vpop.f32.mrf.mxu0  ;;  %v1824_v43 = vpop.f32.mrf.mxu1 }
 0x129   : > { %v1583_v44 = vpack.c.bf16 %v874_v35, %v873_v31  ;;  %v1663_v45 = vpack.c.bf16 %v906_v36, %v905_v32  ;;  %v872_v46 = vmax.f32 %v692_v37, 0.0  ;;  %v904_v47 = vmax.f32 %v820_v38, 0.0 }
 0x12a   : > { %v713_v48 = vadd.f32 %v1792_v42, %v2027_v40  ;;  %v841_v49 = vadd.f32 %v1824_v43, %v2027_v40  ;;  %v704_v50 = vpop.f32.mrf.mxu0  ;;  %v832_v51 = vpop.f32.mrf.mxu1 }
 0x12b   : > { %1687 = vst [vmem:[%s2042_s28 + $0x68] sm:$0xff] %v1583_v44   ;;  %1703 = vst [vmem:[%s2042_s28 + $0xe8] sm:$0xff] %v1663_v45   ;;  %v1578_v52 = vpack.c.bf16 %v872_v46, %v871_v39  ;;  %v1658_v53 = vpack.c.bf16 %v904_v47, %v903_v41  ;;  %v705_v54 = vadd.f32 %v2027_v40, %v704_v50 }
 0x12c   : > { %v833_v55 = vadd.f32 %v2027_v40, %v832_v51  ;;  %v1793_v56 = vpop.f32.mrf.mxu0  ;;  %v1825_v57 = vpop.f32.mrf.mxu1  ;;  %v877_v60 = vmax.f32 %v713_v48, 0.0  ;;  %v909_v61 = vmax.f32 %v841_v49, 0.0 }
 0x12d   : > { %1686 = vst [vmem:[%s2042_s28 + $0x60] sm:$0xff] %v1578_v52   ;;  %1702 = vst [vmem:[%s2042_s28 + $0xe0] sm:$0xff] %v1658_v53   ;;  %v716_v58 = vadd.f32 %v1793_v56, %v2027_v40  ;;  %v844_v59 = vadd.f32 %v1825_v57, %v2027_v40  ;;  %v875_v4 = vmax.f32 %v705_v54, 0.0 }
 0x12e   : > { %v707_v62 = vpop.f32.mrf.mxu0  ;;  %v835_v63 = vpop.f32.mrf.mxu1  ;;  %v907_v5 = vmax.f32 %v833_v55, 0.0 }
 0x12f   : > { %v878_v0 = vmax.f32 %v716_v58, 0.0  ;;  %v910_v1 = vmax.f32 %v844_v59, 0.0  ;;  %v708_v2 = vadd.f32 %v2027_v40, %v707_v62  ;;  %v836_v3 = vadd.f32 %v2027_v40, %v835_v63 }
 0x131   : > { %v1593_v6 = vpack.c.bf16 %v878_v0, %v877_v60  ;;  %v1673_v7 = vpack.c.bf16 %v910_v1, %v909_v61  ;;  %v876_v8 = vmax.f32 %v708_v2, 0.0  ;;  %v908_v9 = vmax.f32 %v836_v3, 0.0 }
 0x133   : > { %1689 = vst [vmem:[%s2042_s28 + $0x78] sm:$0xff] %v1593_v6   ;;  %1705 = vst [vmem:[%s2042_s28 + $0xf8] sm:$0xff] %v1673_v7   ;;  %v1588_v10 = vpack.c.bf16 %v876_v8, %v875_v4  ;;  %v1668_v11 = vpack.c.bf16 %v908_v9, %v907_v5 }
 0x135   : > { %1688 = vst [vmem:[%s2042_s28 + $0x70] sm:$0xff] %v1588_v10   ;;  %1704 = vst [vmem:[%s2042_s28 + $0xf0] sm:$0xff] %v1668_v11  }
 0x136 PF: > { %s13_s14 = sadd.s32 1, %s1928_s14   ;;  %s2145_s12 = smov %s1924_s13 }
 0x137   : > { %p10_p5 = scmp.ge.s32.totalorder %s13_s14, 6   ;;  %s2146_s13 = smov %s2148_s15 }
 0x139   :  { %12 = sbr.rel (!%p10_p5) target bundleno = 2 (0x2), region = 65 }

// kernel: bottleneck_forward.4
= control target key start
LH: loop header
LB: loop body
LE: loop exit
PB: predicated region body
PF: predicated region fallthrough
CT: control target
= control target key end

     0   :  { %s4668_s12 = smov 0   ;;  %s5233_s0 = inlined_call_operand.vmem [shape: bf16[4,2,4,9,9,128], index: 0, kind: input, shape index: {}]   ;;  %s5234_s1 = inlined_call_operand.vmem [shape: bf16[4,3,3,128,128], index: 1, kind: input, shape index: {}]   ;;  %s5235_s2 = inlined_call_operand.vmem [shape: f32[1,128], index: 2, kind: input, shape index: {}]   ;;  %s5236_s3 = inlined_call_operand.vmem [shape: bf16[4,128,128], index: 3, kind: output, shape index: {}]  }
   0x1 LB: > { %s3555_s13 = sadd.s32 4294967295, %s4646_s12   ;;  %p3559_p0 = scmp.ge.s32.totalorder %s4646_s12, 1  ;;  %s4646_s12 = sphi %s4668_s12, %s13_s12  }
   0x2   : > { %p147_p1 = scmp.lt.s32.totalorder %s4646_s12, 5 }
   0x4   : > { %p148_p2 = pnand %p3559_p0, %p147_p1 }
   0x6   : > { %151 = sbr.rel (%p148_p2) target bundleno = 412 (0x19c), region = 32 }
   0xb   : > { %p176_p3 = scmp.lt.s32.totalorder %s3555_s13, 3  ;;  %vm788_vm0 = vsmask.f32 3328  ;;  %vm789_vm1 = vsmask.f32 7440 }
   0xc   : > { %vm4746_vm2 = vmor %vm788_vm0, %vm789_vm1 }
   0xd   : > { %s5264_s13 = smov (!%p176_p3, %s3555_s13), 3 }
   0xe   : > { %s4511_s14 = smul.u32 576, %s5264_s13  ;;  %s3999_s23 = sshll.u32 %s5264_s13, 6 }
   0xf   : > { %s5177_s26 = scalar_lea.vmem %s5236_s3, %s3999_s23 }
  0x10   : > { %s4682_s17 = scalar_lea.vmem %s5234_s1, %s4511_s14  ;;  %s4696_s20 = scalar_lea.vmem %s5233_s0, %s4511_s14 }
  0x11   : > { %v4520_v0 = vld [vmem:[%s4682_s17 + $0x38] sm:$0xff]   ;;  %v4522_v2 = vld [vmem:[%s4682_s17 + $0x30] sm:$0xff]   ;;  %v4524_v4 = vld [vmem:[%s4682_s17 + $0x28] sm:$0xff]  }
  0x12   : > { %v4521_v1 = vld [vmem:[%s4682_s17 + $0x78] sm:$0xff]   ;;  %4207 = vmatprep.subr.bf16.mxu0 %v4520_v0  ;;  %v4523_v3 = vld [vmem:[%s4682_s17 + $0x70] sm:$0xff]   ;;  %v4525_v5 = vld [vmem:[%s4682_s17 + $0x68] sm:$0xff]  }
  0x13   : > { %4239 = vmatprep.subr.bf16.mxu1 %v4521_v1  ;;  %4208 = vmatpush3.bf16.msra.mxu0 %v4520_v0  ;;  %v4526_v6 = vld [vmem:[%s4682_s17 + $0x20] sm:$0xff]   ;;  %v4528_v8 = vld [vmem:[%s4682_s17 + $0x18] sm:$0xff]   ;;  %v4530_v10 = vld [vmem:[%s4682_s17 + $0x10] sm:$0xff]  }
  0x14   : > { %4240 = vmatpush3.bf16.msra.mxu1 %v4521_v1  ;;  %4209 = vmatprep.subr.bf16.mxu0 %v4522_v2  ;;  %v4527_v7 = vld [vmem:[%s4682_s17 + $0x60] sm:$0xff]   ;;  %v4529_v9 = vld [vmem:[%s4682_s17 + $0x58] sm:$0xff]   ;;  %v4531_v11 = vld [vmem:[%s4682_s17 + $0x50] sm:$0xff]  }
  0x15   : > { %4241 = vmatprep.subr.bf16.mxu1 %v4523_v3  ;;  %v4536_v12 = vld [vmem:[%s4696_s20] ss:$8 sps:$4 sm:$0xff]   ;;  %v4538_v18 = vld [vmem:[%s4696_s20 + $0x10] ss:$8 sps:$4 sm:$0xff]   ;;  %v757_v43 = vld [vmem:[%s4696_s20 + $0x4] sm:$0x1] }
  0x16   : > { %v4537_v13 = vld [vmem:[%s4696_s20 + $0x48] ss:$8 sps:$4 sm:$0xff]   ;;  %4223 = vmatprep.mubr.bf16.mxu0 %v4536_v12  ;;  %v4534_v16 = vld [vmem:[%s4682_s17] sm:$0xff]   ;;  %v4540_v19 = vld [vmem:[%s4682_s17 + $0xb8] sm:$0xff]   ;;  %v801_v48 = vshll.u32 %v757_v43, 16 }
  0x17   : > { %4210 = vmatpush3.bf16.msra.mxu0 %v4522_v2  ;;  %4255 = vmatprep.mubr.bf16.mxu1 %v4537_v13  ;;  %v4532_v14 = vld [vmem:[%s4682_s17 + $0x8] sm:$0xff]   ;;  %v4535_v17 = vld [vmem:[%s4682_s17 + $0x40] sm:$0xff]   ;;  %v4541_v20 = vld [vmem:[%s4682_s17 + $0xf8] sm:$0xff]  }
  0x18   : > { %4242 = vmatpush3.bf16.msra.mxu1 %v4523_v3  ;;  %4211 = vmatprep.subr.bf16.mxu0 %v4524_v4  ;;  %v4533_v15 = vld [vmem:[%s4682_s17 + $0x48] sm:$0xff]   ;;  %v4539_v21 = vld [vmem:[%s4696_s20 + $0x58] ss:$8 sps:$4 sm:$0xff]   ;;  %v4542_v22 = vld [vmem:[%s4682_s17 + $0xb0] sm:$0xff]   ;;  %v803_v56 = vrot.slane %v801_v48, 5 }
  0x19   : > { %4243 = vmatprep.subr.bf16.mxu1 %v4525_v5  ;;  %v4543_v23 = vld [vmem:[%s4682_s17 + $0xf0] sm:$0xff]   ;;  %v4544_v24 = vld [vmem:[%s4696_s20 + $0x20] ss:$8 sps:$4 sm:$0xff]   ;;  %v4556_v35 = vld [vmem:[%s4682_s17 + $0x98] sm:$0xff]  }
  0x1a   : > { %v4545_v25 = vld [vmem:[%s4696_s20 + $0x68] ss:$8 sps:$4 sm:$0xff]   ;;  %v4547_v29 = vld [vmem:[%s4696_s20 + $0x78] ss:$8 sps:$4 sm:$0xff]   ;;  %v759_v45 = vld [vmem:[%s4696_s20 + $0xc] sm:$0x1] }
  0x1b   : > { %4212 = vmatpush3.bf16.msra.mxu0 %v4524_v4  ;;  %v4546_v26 = vld [vmem:[%s4696_s20 + $0x30] ss:$8 sps:$4 sm:$0xff]   ;;  %v4548_v27 = vld [vmem:[%s4682_s17 + $0xa8] sm:$0xff]   ;;  %v4550_v30 = vld [vmem:[%s4682_s17 + $0xa0] sm:$0xff]   ;;  %v815_v51 = vshll.u32 %v759_v45, 16 }
  0x1c   : > { %4244 = vmatpush3.bf16.msra.mxu1 %v4525_v5  ;;  %4213 = vmatprep.subr.bf16.mxu0 %v4526_v6  ;;  %v4549_v28 = vld [vmem:[%s4682_s17 + $0xe8] sm:$0xff]   ;;  %v4551_v31 = vld [vmem:[%s4682_s17 + $0xe0] sm:$0xff]   ;;  %v4554_v34 = vld [vmem:[%s4696_s20 + $0x130] ss:$8 sps:$4 sm:$0xff]  }
  0x1d   : > { %4245 = vmatprep.subr.bf16.mxu1 %v4527_v7  ;;  %v4552_v32 = vld [vmem:[%s4696_s20 + $0x120] ss:$8 sps:$4 sm:$0xff]   ;;  %v4557_v37 = vld [vmem:[%s4682_s17 + $0xd8] sm:$0xff]   ;;  %v4558_v38 = vld [vmem:[%s4682_s17 + $0x90] sm:$0xff]   ;;  %v817_v60 = vrot.slane %v815_v51, 5 }
  0x1e   : > { %v4553_v33 = vld [vmem:[%s4696_s20 + $0x168] ss:$8 sps:$4 sm:$0xff]   ;;  %v4555_v36 = vld [vmem:[%s4696_s20 + $0x178] ss:$8 sps:$4 sm:$0xff]   ;;  %v761_v62 = vld [vmem:[%s4696_s20 + $0x14] sm:$0x1] }
  0x1f   : > { %4214 = vmatpush3.bf16.msra.mxu0 %v4526_v6  ;;  %v4559_v39 = vld [vmem:[%s4682_s17 + $0xd0] sm:$0xff]   ;;  %v4560_v40 = vld [vmem:[%s4696_s20 + $0x140] ss:$8 sps:$4 sm:$0xff]   ;;  %v762_v1 = vld [vmem:[%s4696_s20 + $0x18] sm:$0xf] }
  0x20   : > { %4246 = vmatpush3.bf16.msra.mxu1 %v4527_v7  ;;  %4215 = vmatprep.subr.bf16.mxu0 %v4528_v8  ;;  %v4561_v41 = vld [vmem:[%s4696_s20 + $0x188] ss:$8 sps:$4 sm:$0xff]   ;;  %v756_v42 = vld [vmem:[%s4696_s20] sm:$0xf]  ;;  %v763_v2 = vld [vmem:[%s4696_s20 + $0x1c] sm:$0x1] }
  0x21   : > { %4247 = vmatprep.subr.bf16.mxu1 %v4529_v9  ;;  %v758_v44 = vld [vmem:[%s4696_s20 + $0x8] sm:$0xf]  ;;  %v792_v46 = vshrl.u32 %v756_v42, 16  ;;  %v795_v47 = vshll.u32 %v756_v42, 16  ;;  %v4562_v58 = vld [vmem:[%s4696_s20 + $0x150] ss:$8 sps:$4 sm:$0xff]  }
  0x22   : > { %v806_v49 = vshrl.u32 %v758_v44, 16  ;;  %v809_v50 = vshll.u32 %v758_v44, 16  ;;  %v4564_v52 = vld [vmem:[%s4682_s17 + $0x88] sm:$0xff]   ;;  %v760_v61 = vld [vmem:[%s4696_s20 + $0x10] sm:$0xf]  ;;  %v4566_v5 = vld [vmem:[%s4682_s17 + $0x80] sm:$0xff]  }
  0x23   : > { %4216 = vmatpush3.bf16.msra.mxu0 %v4528_v8  ;;  %v4565_v53 = vld [vmem:[%s4682_s17 + $0xc8] sm:$0xff]   ;;  %v794_v54 = vrot.slane %v792_v46, 4  ;;  %v797_v55 = vrot.slane %v795_v47, 5  ;;  %v4563_v63 = vld [vmem:[%s4696_s20 + $0x198] ss:$8 sps:$4 sm:$0xff]   ;;  %v820_v3 = vshrl.u32 %v760_v61, 16 }
  0x24   : > { %4248 = vmatpush3.bf16.msra.mxu1 %v4529_v9  ;;  %4217 = vmatprep.subr.bf16.mxu0 %v4530_v10  ;;  %v808_v57 = vrot.slane %v806_v49, 4  ;;  %v811_v59 = vrot.slane %v809_v50, 5  ;;  %v823_v4 = vshll.u32 %v760_v61, 16  ;;  %v829_v8 = vshll.u32 %v761_v62, 16  ;;  %v4572_v45 = vld [vmem:[%s4682_s17 + $0x130] sm:$0xff]  }
  0x25   : > { %4249 = vmatprep.subr.bf16.mxu1 %v4531_v11  ;;  %v798_v0 = vor.u32 %v797_v55, %v794_v54  ;;  %v834_v9 = vshrl.u32 %v762_v1, 16  ;;  %v822_v12 = vrot.slane %v820_v3, 4  ;;  %v4573_v46 = vld [vmem:[%s4682_s17 + $0x170] sm:$0xff]  }
  0x26   : > { %v812_v7 = vor.u32 %v811_v59, %v808_v57  ;;  %v825_v13 = vrot.slane %v823_v4, 5  ;;  %v4574_v49 = vld [vmem:[%s4696_s20 + $0xb0] ss:$8 sps:$4 sm:$0xff]   ;;  %v4576_v59 = vld [vmem:[%s4682_s17 + $0x128] sm:$0xff]  }
  0x27   : > { %4218 = vmatpush3.bf16.msra.mxu0 %v4530_v10  ;;  %v837_v10 = vshll.u32 %v762_v1, 16  ;;  %v768_v54 = vld [vmem:[%s4696_s20 + $0x30] sm:$0xf]  ;;  %v770_v57 = vld [vmem:[%s4696_s20 + $0x38] sm:$0xf] }
  0x28   : > { %4250 = vmatpush3.bf16.msra.mxu1 %v4531_v11  ;;  %4219 = vmatprep.subr.bf16.mxu0 %v4532_v14  ;;  %v799_v11 = vrot.slane %v798_v0, 4  ;;  %v876_v61 = vshrl.u32 %v768_v54, 16  ;;  %v879_v62 = vshll.u32 %v768_v54, 16  ;;  %v4577_v0 = vld [vmem:[%s4682_s17 + $0x168] sm:$0xff]   ;;  %v893_v3 = vshll.u32 %v770_v57, 16 }
  0x29   : > { %4251 = vmatprep.subr.bf16.mxu1 %v4533_v15 }
  0x2b   : > { %4220 = vmatpush3.bf16.msra.mxu0 %v4532_v14  ;;  %v843_v14 = vshll.u32 %v763_v2, 16  ;;  %v890_v2 = vshrl.u32 %v770_v57, 16 }
  0x2c   : > { %4252 = vmatpush3.bf16.msra.mxu1 %v4533_v15  ;;  %4221 = vmatprep.subr.bf16.mxu0 %v4534_v16  ;;  %v4567_v15 = vld [vmem:[%s4682_s17 + $0xc0] sm:$0xff]  }
  0x2d   : > { %4253 = vmatprep.subr.bf16.mxu1 %v4535_v17 }
  0x2f   : > { %4222 = vmatpush3.bf16.msra.mxu0 %v4534_v16  ;;  %v813_v16 = vrot.slane %v812_v7, 4  ;;  %v878_v7 = vrot.slane %v876_v61, 4 }
  0x30   : > { %4254 = vmatpush3.bf16.msra.mxu1 %v4535_v17  ;;  %4271 = vmatprep.subr.bf16.mxu0 %v4540_v19  ;;  %v4568_v17 = vld [vmem:[%s4696_s20 + $0x90] ss:$8 sps:$4 sm:$0xff]  }
  0x31   : > { %4303 = vmatprep.subr.bf16.mxu1 %v4541_v20 }
  0x32   : > { %4224 = vmatmul.mubr.bf16.vlgmr.msra.gmra.mxu0 %v4538_v18  ;;  %v836_v18 = vrot.slane %v834_v9, 4 }
  0x33   : > { %4256 = vmatmul.mubr.bf16.vlgmr.msra.gmra.mxu1 %v4539_v21  ;;  %4272 = vmatpush3.bf16.msra.mxu0 %v4540_v19  ;;  %v839_v19 = vrot.slane %v837_v10, 5  ;;  %v826_v21 = vor.u32 %v825_v13, %v822_v12  ;;  %v4575_v10 = vld [vmem:[%s4696_s20 + $0xc0] ss:$8 sps:$4 sm:$0xff]   ;;  %v892_v12 = vrot.slane %v890_v2, 4  ;;  %v895_v13 = vrot.slane %v893_v3, 5 }
  0x34   : > { %4304 = vmatpush3.bf16.msra.mxu1 %v4541_v20  ;;  %4273 = vmatprep.subr.bf16.mxu0 %v4542_v22  ;;  %v804_v20 = vsel %vm4746_vm2, %v799_v11, %v803_v56  ;;  %v769_v56 = vld [vmem:[%s4696_s20 + $0x34] sm:$0x1] }
  0x35   : > { %4305 = vmatprep.subr.bf16.mxu1 %v4543_v23  ;;  %4227 = vmatprep.mubr.bf16.mxu0 %v4544_v24  ;;  %v818_v24 = vsel %vm4746_vm2, %v813_v16, %v817_v60 }
  0x36   : > { %4259 = vmatprep.mubr.bf16.mxu1 %v4545_v25  ;;  %v840_v25 = vor.u32 %v839_v19, %v836_v18  ;;  %v896_v19 = vor.u32 %v895_v13, %v892_v12  ;;  %v780_v12 = vld [vmem:[%s4696_s20 + $0x140] sm:$0xf]  ;;  %v4589_v13 = vld [vmem:[%s4682_s17 + $0x148] sm:$0xff]  }
  0x37   : > { %4274 = vmatpush3.bf16.msra.mxu0 %v4542_v22  ;;  %v831_v22 = vrot.slane %v829_v8, 5  ;;  %v881_v8 = vrot.slane %v879_v62, 5 }
  0x38   : > { %4306 = vmatpush3.bf16.msra.mxu1 %v4543_v23  ;;  %4275 = vmatprep.subr.bf16.mxu0 %v4548_v27  ;;  %v845_v23 = vrot.slane %v843_v14, 5 }
  0x39   : > { %4307 = vmatprep.subr.bf16.mxu1 %v4549_v28 }
  0x3a   : > { %4228 = vmatmul.mubr.bf16.gmra.mxu0 %v4546_v26  ;;  %v3644_v26 = vcombine.low %v804_v20, %v818_v24  ;;  %v773_v24 = vld [vmem:[%s4696_s20 + $0x124] sm:$0x1] }
  0x3b   : > { %4260 = vmatmul.mubr.bf16.gmra.mxu1 %v4547_v29  ;;  %4276 = vmatpush3.bf16.msra.mxu0 %v4548_v27  ;;  %v827_v27 = vrot.slane %v826_v21, 4  ;;  %v841_v29 = vrot.slane %v840_v25, 4  ;;  %v4579_v21 = vld [vmem:[%s4682_s17 + $0x160] sm:$0xff]   ;;  %v774_v25 = vld [vmem:[%s4696_s20 + $0x128] sm:$0xf] }
  0x3c   : > { %4308 = vmatpush3.bf16.msra.mxu1 %v4549_v28  ;;  %4277 = vmatprep.subr.bf16.mxu0 %v4550_v30  ;;  %v4570_v28 = vld [vmem:[%s4682_s17 + $0x138] sm:$0xff]  }
  0x3d   : > { %4309 = vmatprep.subr.bf16.mxu1 %v4551_v31  ;;  %4231 = vmatprep.mubr.bf16.mxu0 %v4552_v32  ;;  %v832_v32 = vsel %vm4746_vm2, %v827_v27, %v831_v22  ;;  %v772_v22 = vld [vmem:[%s4696_s20 + $0x120] sm:$0xf] }
  0x3e   : > { %4263 = vmatprep.mubr.bf16.mxu1 %v4553_v33  ;;  %v4569_v33 = vld [vmem:[%s4696_s20 + $0xa0] ss:$8 sps:$4 sm:$0xff]  }
  0x3f   : > { %4278 = vmatpush3.bf16.msra.mxu0 %v4550_v30  ;;  %v4571_v30 = vld [vmem:[%s4682_s17 + $0x178] sm:$0xff]  }
  0x40   : > { %4310 = vmatpush3.bf16.msra.mxu1 %v4551_v31  ;;  %4279 = vmatprep.subr.bf16.mxu0 %v4556_v35  ;;  %v764_v31 = vld [vmem:[%s4696_s20 + $0x20] sm:$0xf] }
  0x41   : > { %4311 = vmatprep.subr.bf16.mxu1 %v4557_v37 }
  0x42   : > { %4232 = vmatmul.mubr.bf16.gmra.mxu0 %v4554_v34  ;;  %v765_v34 = vld [vmem:[%s4696_s20 + $0x24] sm:$0x1] }
  0x43   : > { %4264 = vmatmul.mubr.bf16.gmra.mxu1 %v4555_v36  ;;  %4280 = vmatpush3.bf16.msra.mxu0 %v4556_v35  ;;  %v766_v35 = vld [vmem:[%s4696_s20 + $0x28] sm:$0xf]  ;;  %v767_v36 = vld [vmem:[%s4696_s20 + $0x2c] sm:$0x1] }
  0x44   : > { %4312 = vmatpush3.bf16.msra.mxu1 %v4557_v37  ;;  %4281 = vmatprep.subr.bf16.mxu0 %v4558_v38  ;;  %v846_v37 = vsel %vm4746_vm2, %v841_v29, %v845_v23  ;;  %v862_v42 = vshrl.u32 %v766_v35, 16  ;;  %v865_v43 = vshll.u32 %v766_v35, 16  ;;  %v871_v44 = vshll.u32 %v767_v36, 16  ;;  %v4582_v36 = vld [vmem:[%s4682_s17 + $0x118] sm:$0xff]  }
  0x45   : > { %4313 = vmatprep.subr.bf16.mxu1 %v4559_v39  ;;  %4235 = vmatprep.mubr.bf16.mxu0 %v4560_v40  ;;  %v857_v40 = vshll.u32 %v765_v34, 16  ;;  %v897_v23 = vrot.slane %v896_v19, 4  ;;  %v907_v29 = vshll.u32 %v772_v22, 16  ;;  %v921_v34 = vshll.u32 %v774_v25, 16  ;;  %v783_v19 = vld [vmem:[%s4696_s20 + $0x14c] sm:$0x1] }
  0x46   : > { %4267 = vmatprep.mubr.bf16.mxu1 %v4561_v41  ;;  %v3645_v41 = vcombine.low %v832_v32, %v846_v37  ;;  %v864_v51 = vrot.slane %v862_v42, 4 }
  0x47   : > { %4282 = vmatpush3.bf16.msra.mxu0 %v4558_v38  ;;  %v848_v38 = vshrl.u32 %v764_v31, 16  ;;  %v859_v50 = vrot.slane %v857_v40, 5  ;;  %v923_v42 = vrot.slane %v921_v34, 5 }
  0x48   : > { %4314 = vmatpush3.bf16.msra.mxu1 %v4559_v39  ;;  %4283 = vmatprep.subr.bf16.mxu0 %v4564_v52  ;;  %v851_v39 = vshll.u32 %v764_v31, 16  ;;  %v918_v31 = vshrl.u32 %v774_v25, 16 }
  0x49   : > { %4315 = vmatprep.subr.bf16.mxu1 %v4565_v53  ;;  %v850_v47 = vrot.slane %v848_v38, 4  ;;  %v909_v38 = vrot.slane %v907_v29, 5 }
  0x4a   : > { %4236 = vmatmul.mubr.bf16.gmra.mxu0 %v4562_v58  ;;  %v853_v48 = vrot.slane %v851_v39, 5  ;;  %v771_v58 = vld [vmem:[%s4696_s20 + $0x3c] sm:$0x1]  ;;  %v920_v40 = vrot.slane %v918_v31, 4 }
  0x4b   : > { %4268 = vmatmul.mubr.bf16.gmra.mxu1 %v4563_v63  ;;  %4284 = vmatpush3.bf16.msra.mxu0 %v4564_v52  ;;  %v867_v52 = vrot.slane %v865_v43, 5  ;;  %v885_v63 = vshll.u32 %v769_v56, 16  ;;  %v899_v4 = vshll.u32 %v771_v58, 16 }
  0x4c   : > { %4316 = vmatpush3.bf16.msra.mxu1 %v4565_v53  ;;  %4285 = vmatprep.subr.bf16.mxu0 %v4566_v5  ;;  %v873_v53 = vrot.slane %v871_v44, 5  ;;  %v854_v55 = vor.u32 %v853_v48, %v850_v47  ;;  %v4580_v44 = vld [vmem:[%s4696_s20 + $0x1b0] ss:$8 sps:$4 sm:$0xff]   ;;  %v777_v47 = vld [vmem:[%s4696_s20 + $0x134] sm:$0x1] }
  0x4d   : > { %4317 = vmatprep.subr.bf16.mxu1 %v4567_v15  ;;  %4287 = vmatprep.mubr.bf16.mxu0 %v3644_v26  ;;  %v868_v60 = vor.u32 %v867_v52, %v864_v51  ;;  %v887_v9 = vrot.slane %v885_v63, 5  ;;  %v901_v14 = vrot.slane %v899_v4, 5  ;;  %v904_v26 = vshrl.u32 %v772_v22, 16  ;;  %v778_v48 = vld [vmem:[%s4696_s20 + $0x138] sm:$0xf] }
  0x4e   : > { %4319 = vmatprep.mubr.bf16.mxu1 %v4568_v17  ;;  %v855_v1 = vrot.slane %v854_v55, 4  ;;  %v882_v17 = vor.u32 %v881_v8, %v878_v7  ;;  %v924_v51 = vor.u32 %v923_v42, %v920_v40  ;;  %v941_v54 = vshll.u32 %v777_v47, 16  ;;  %v4585_v55 = vld [vmem:[%s4682_s17 + $0x150] sm:$0xff]   ;;  %v787_v40 = vld [vmem:[%s4696_s20 + $0x15c] sm:$0x1] }
  0x4f   : > { %4286 = vmatpush3.bf16.msra.mxu0 %v4566_v5  ;;  %v869_v5 = vrot.slane %v868_v60, 4  ;;  %v902_v32 = vsel %vm4746_vm2, %v897_v23, %v901_v14  ;;  %v946_v57 = vshrl.u32 %v778_v48, 16  ;;  %v949_v58 = vshll.u32 %v778_v48, 16 }
  0x50   : > { %4318 = vmatpush3.bf16.msra.mxu1 %v4567_v15  ;;  %4335 = vmatprep.subr.bf16.mxu0 %v4570_v28  ;;  %v860_v11 = vsel %vm4746_vm2, %v855_v1, %v859_v50  ;;  %v4578_v15 = vld [vmem:[%s4682_s17 + $0x120] sm:$0xff]   ;;  %v883_v20 = vrot.slane %v882_v17, 4  ;;  %v4584_v50 = vld [vmem:[%s4682_s17 + $0x110] sm:$0xff]   ;;  %v925_v60 = vrot.slane %v924_v51, 4  ;;  %v943_v63 = vrot.slane %v941_v54, 5 }
  0x51   : > { %4367 = vmatprep.subr.bf16.mxu1 %v4571_v30  ;;  %v874_v16 = vsel %vm4746_vm2, %v869_v5, %v873_v53  ;;  %v948_v2 = vrot.slane %v946_v57, 4  ;;  %v951_v3 = vrot.slane %v949_v58, 5  ;;  %v4588_v5 = vld [vmem:[%s4682_s17 + $0x108] sm:$0xff]   ;;  %v960_v17 = vshrl.u32 %v780_v12, 16 }
  0x52   : > { %4288 = vmatmul.mubr.bf16.vlgmr.msra.gmra.mxu0 %v3645_v41  ;;  %v3646_v18 = vcombine.low %v860_v11, %v874_v16  ;;  %v888_v27 = vsel %vm4746_vm2, %v883_v20, %v887_v9  ;;  %v4583_v41 = vld [vmem:[%s4682_s17 + $0x158] sm:$0xff]   ;;  %v782_v16 = vld [vmem:[%s4696_s20 + $0x148] sm:$0xf]  ;;  %v963_v20 = vshll.u32 %v780_v12, 16 }
  0x53   : > { %4320 = vmatmul.mubr.bf16.vlgmr.msra.gmra.mxu1 %v4569_v33  ;;  %4336 = vmatpush3.bf16.msra.mxu0 %v4570_v28  ;;  %v775_v28 = vld [vmem:[%s4696_s20 + $0x12c] sm:$0x1]  ;;  %v906_v33 = vrot.slane %v904_v26, 4  ;;  %v3647_v37 = vcombine.low %v888_v27, %v902_v32  ;;  %v974_v22 = vshrl.u32 %v782_v16, 16  ;;  %v977_v25 = vshll.u32 %v782_v16, 16  ;;  %v4590_v27 = vld [vmem:[%s4682_s17 + $0x100] sm:$0xff]  }
  0x54   : > { %4368 = vmatpush3.bf16.msra.mxu1 %v4571_v30  ;;  %4337 = vmatprep.subr.bf16.mxu0 %v4572_v45  ;;  %v913_v30 = vshll.u32 %v773_v24, 16  ;;  %v927_v35 = vshll.u32 %v775_v28, 16  ;;  %v962_v24 = vrot.slane %v960_v17, 4  ;;  %v983_v26 = vshll.u32 %v783_v19, 16  ;;  %v4591_v32 = vld [vmem:[%s4682_s17 + $0x140] sm:$0xff]  }
  0x55   : > { %4369 = vmatprep.subr.bf16.mxu1 %v4573_v46  ;;  %4323 = vmatprep.mubr.bf16.mxu1 %v4574_v49  ;;  %v779_v49 = vld [vmem:[%s4696_s20 + $0x13c] sm:$0x1]  ;;  %v965_v29 = vrot.slane %v963_v20, 5  ;;  %v976_v31 = vrot.slane %v974_v22, 4 }
  0x56   : > { %4291 = vmatprep.mubr.bf16.mxu0 %v3646_v18  ;;  %v915_v39 = vrot.slane %v913_v30, 5  ;;  %v929_v43 = vrot.slane %v927_v35, 5  ;;  %v985_v34 = vrot.slane %v983_v26, 5  ;;  %v4586_v35 = vld [vmem:[%s4696_s20 + $0x1d0] ss:$8 sps:$4 sm:$0xff]  }
  0x57   : > { %4338 = vmatpush3.bf16.msra.mxu0 %v4572_v45  ;;  %v776_v45 = vld [vmem:[%s4696_s20 + $0x130] sm:$0xf]  ;;  %v3762_v26 = vld [vmem:[%s4696_s20 + $0xa8] sm:$0xf] }
  0x58   : > { %4370 = vmatpush3.bf16.msra.mxu1 %v4573_v46  ;;  %4339 = vmatprep.subr.bf16.mxu0 %v4576_v59  ;;  %v910_v46 = vor.u32 %v909_v38, %v906_v33  ;;  %v932_v52 = vshrl.u32 %v776_v45, 16  ;;  %v935_v53 = vshll.u32 %v776_v45, 16  ;;  %v930_v7 = vsel %vm4746_vm2, %v925_v60, %v929_v43  ;;  %v785_v38 = vld [vmem:[%s4696_s20 + $0x154] sm:$0x1] }
  0x59   : > { %4371 = vmatprep.subr.bf16.mxu1 %v4577_v0  ;;  %v979_v33 = vrot.slane %v977_v25, 5  ;;  %v997_v45 = vshll.u32 %v785_v38, 16  ;;  %v3761_v25 = vld [vmem:[%s4696_s20 + $0xa4] sm:$0x1] }
  0x5a   : > { %4292 = vmatmul.mubr.bf16.gmra.mxu0 %v3647_v37  ;;  %v911_v56 = vrot.slane %v910_v46, 4  ;;  %v934_v61 = vrot.slane %v932_v52, 4  ;;  %v937_v62 = vrot.slane %v935_v53, 5  ;;  %v966_v37 = vor.u32 %v965_v29, %v962_v24  ;;  %v4826_v46 = vld [vmem:[%s4682_s17 + $0x1f8] sm:$0xff]   ;;  %v3760_v24 = vld [vmem:[%s4696_s20 + $0xa0] sm:$0xf] }
  0x5b   : > { %4324 = vmatmul.mubr.bf16.gmra.mxu1 %v4575_v10  ;;  %4340 = vmatpush3.bf16.msra.mxu0 %v4576_v59  ;;  %v955_v59 = vshll.u32 %v779_v49, 16  ;;  %v952_v10 = vor.u32 %v951_v3, %v948_v2  ;;  %v980_v42 = vor.u32 %v979_v33, %v976_v31  ;;  %v999_v54 = vrot.slane %v997_v45, 5  ;;  %v4592_v2 = vld [vmem:[%s4696_s20 + $0xd8] ss:$8 sps:$4 sm:$0xff]   ;;  %v3763_v29 = vld [vmem:[%s4696_s20 + $0xac] sm:$0x1] }
  0x5c   : > { %4372 = vmatpush3.bf16.msra.mxu1 %v4577_v0  ;;  %4341 = vmatprep.subr.bf16.mxu0 %v4578_v15  ;;  %v4581_v0 = vld [vmem:[%s4696_s20 + $0x1c0] ss:$8 sps:$4 sm:$0xff]   ;;  %v916_v1 = vsel %vm4746_vm2, %v911_v56, %v915_v39  ;;  %v938_v8 = vor.u32 %v937_v62, %v934_v61  ;;  %v786_v39 = vld [vmem:[%s4696_s20 + $0x158] sm:$0xf]  ;;  %v967_v47 = vrot.slane %v966_v37, 4  ;;  %v1871_v31 = vshll.u32 %v3760_v24, 16 }
  0x5d   : > { %4373 = vmatprep.subr.bf16.mxu1 %v4579_v21  ;;  %4327 = vmatprep.mubr.bf16.mxu1 %v4580_v44  ;;  %v957_v4 = vrot.slane %v955_v59, 5  ;;  %v3648_v9 = vcombine.low %v916_v1, %v930_v7  ;;  %v953_v14 = vrot.slane %v952_v10, 4  ;;  %v1002_v48 = vshrl.u32 %v786_v39, 16  ;;  %v3758_v7 = vld [vmem:[%s4696_s20 + $0x98] sm:$0xf] }
  0x5e   : > { %v939_v11 = vrot.slane %v938_v8, 4  ;;  %v1005_v49 = vshll.u32 %v786_v39, 16  ;;  %v981_v51 = vrot.slane %v980_v42, 4  ;;  %v1873_v39 = vrot.slane %v1871_v31, 5 }
  0x5f   : > { %4342 = vmatpush3.bf16.msra.mxu0 %v4578_v15  ;;  %4295 = vmatprep.mubr.bf16.mxu0 %v3648_v9  ;;  %v781_v15 = vld [vmem:[%s4696_s20 + $0x144] sm:$0x1]  ;;  %v958_v23 = vsel %vm4746_vm2, %v953_v14, %v957_v4  ;;  %v1004_v57 = vrot.slane %v1002_v48, 4  ;;  %v3756_v4 = vld [vmem:[%s4696_s20 + $0x90] sm:$0xf]  ;;  %v1854_v14 = vshrl.u32 %v3758_v7, 16 }
  0x60   : > { %4374 = vmatpush3.bf16.msra.mxu1 %v4579_v21  ;;  %4343 = vmatprep.subr.bf16.mxu0 %v4582_v36  ;;  %v944_v18 = vsel %vm4746_vm2, %v939_v11, %v943_v63  ;;  %v969_v21 = vshll.u32 %v781_v15, 16  ;;  %v1007_v58 = vrot.slane %v1005_v49, 5  ;;  %v986_v60 = vsel %vm4746_vm2, %v981_v51, %v985_v34  ;;  %v3759_v9 = vld [vmem:[%s4696_s20 + $0x9c] sm:$0x1] }
  0x61   : > { %4375 = vmatprep.subr.bf16.mxu1 %v4583_v41  ;;  %v3649_v28 = vcombine.low %v944_v18, %v958_v23  ;;  %v1840_v10 = vshrl.u32 %v3756_v4, 16  ;;  %v1843_v11 = vshll.u32 %v3756_v4, 16  ;;  %v1857_v15 = vshll.u32 %v3758_v7, 16 }
  0x62   : > { %v971_v30 = vrot.slane %v969_v21, 5  ;;  %v1008_v63 = vor.u32 %v1007_v58, %v1004_v57  ;;  %v1863_v16 = vshll.u32 %v3759_v9, 16  ;;  %v1856_v20 = vrot.slane %v1854_v14, 4  ;;  %v4600_v57 = vld [vmem:[%s4682_s17 + $0x1a8] sm:$0xff]  }
  0x63   : > { %4328 = vmatmul.mubr.bf16.gmra.mxu1 %v4581_v0  ;;  %4344 = vmatpush3.bf16.msra.mxu0 %v4582_v36  ;;  %v784_v36 = vld [vmem:[%s4696_s20 + $0x150] sm:$0xf]  ;;  %v1842_v17 = vrot.slane %v1840_v10, 4  ;;  %v1845_v18 = vrot.slane %v1843_v11, 5  ;;  %v1859_v21 = vrot.slane %v1857_v15, 5  ;;  %v1882_v34 = vshrl.u32 %v3762_v26, 16 }
  0x64   : > { %4376 = vmatpush3.bf16.msra.mxu1 %v4583_v41  ;;  %4345 = vmatprep.subr.bf16.mxu0 %v4584_v50  ;;  %v4823_v41 = vld [vmem:[%s4682_s17 + $0x1b8] sm:$0xff]   ;;  %v988_v43 = vshrl.u32 %v784_v36, 16  ;;  %v991_v44 = vshll.u32 %v784_v36, 16  ;;  %v972_v56 = vsel %vm4746_vm2, %v967_v47, %v971_v30  ;;  %v1009_v1 = vrot.slane %v1008_v63, 4  ;;  %v4596_v47 = vld [vmem:[%s4682_s17 + $0x1b0] sm:$0xff]   ;;  %v4602_v11 = vld [vmem:[%s4682_s17 + $0x1a0] sm:$0xff]  }
  0x65   : > { %4377 = vmatprep.subr.bf16.mxu1 %v4585_v55  ;;  %4296 = vmatmul.mubr.bf16.gmra.mxu0 %v3649_v28  ;;  %v3650_v62 = vcombine.low %v972_v56, %v986_v60  ;;  %v1865_v22 = vrot.slane %v1863_v16, 5  ;;  %v1846_v23 = vor.u32 %v1845_v18, %v1842_v17  ;;  %v4593_v28 = vld [vmem:[%s4696_s20 + $0xe8] ss:$8 sps:$4 sm:$0xff]   ;;  %v1868_v30 = vshrl.u32 %v3760_v24, 16  ;;  %v3765_v56 = vld [vmem:[%s4696_s20 + $0xb4] sm:$0x1] }
  0x66   : > { %4331 = vmatprep.mubr.bf16.mxu1 %v4586_v35  ;;  %v990_v52 = vrot.slane %v988_v43, 4  ;;  %v993_v53 = vrot.slane %v991_v44, 5  ;;  %v1885_v35 = vshll.u32 %v3762_v26, 16  ;;  %v1891_v36 = vshll.u32 %v3763_v29, 16  ;;  %v3767_v60 = vld [vmem:[%s4696_s20 + $0xbc] sm:$0x1] }
  0x67   : > { %4346 = vmatpush3.bf16.msra.mxu0 %v4584_v50  ;;  %v1011_v50 = vshll.u32 %v787_v40, 16  ;;  %4299 = vmatprep.mubr.bf16.mxu0 %v3650_v62  ;;  %v1847_v33 = vrot.slane %v1846_v23, 4  ;;  %v1870_v38 = vrot.slane %v1868_v30, 4  ;;  %v1884_v43 = vrot.slane %v1882_v34, 4  ;;  %v4599_v10 = vld [vmem:[%s4696_s20 + $0x108] ss:$8 sps:$4 sm:$0xff]  }
  0x68   : > { %4378 = vmatpush3.bf16.msra.mxu1 %v4585_v55  ;;  %4347 = vmatprep.subr.bf16.mxu0 %v4588_v5  ;;  %v4587_v55 = vld [vmem:[%s4696_s20 + $0x1e0] ss:$8 sps:$4 sm:$0xff]   ;;  %v994_v61 = vor.u32 %v993_v53, %v990_v52  ;;  %v1887_v44 = vrot.slane %v1885_v35, 5  ;;  %v1893_v45 = vrot.slane %v1891_v36, 5  ;;  %v1919_v7 = vshll.u32 %v3767_v60, 16  ;;  %v4606_v34 = vld [vmem:[%s4682_s17 + $0x198] sm:$0xff]  }
  0x69   : > { %4379 = vmatprep.subr.bf16.mxu1 %v4589_v13  ;;  %v1013_v59 = vrot.slane %v1011_v50, 5  ;;  %v1874_v49 = vor.u32 %v1873_v39, %v1870_v38  ;;  %v4598_v53 = vld [vmem:[%s4696_s20 + $0xf8] ss:$8 sps:$4 sm:$0xff]   ;;  %v3769_v16 = vld [vmem:[%s4696_s20 + $0xc4] sm:$0x1]  ;;  %v4601_v17 = vld [vmem:[%s4682_s17 + $0x1e8] sm:$0xff]  }
  0x6a   : > { %v995_v0 = vrot.slane %v994_v61, 4  ;;  %v1888_v51 = vor.u32 %v1887_v44, %v1884_v43  ;;  %v1921_v14 = vrot.slane %v1919_v7, 5  ;;  %v3768_v15 = vld [vmem:[%s4696_s20 + $0xc0] sm:$0xf]  ;;  %v1933_v24 = vshll.u32 %v3769_v16, 16  ;;  %v4607_v60 = vld [vmem:[%s4682_s17 + $0x1d8] sm:$0xff]  }
  0x6b   : > { %4348 = vmatpush3.bf16.msra.mxu0 %v4588_v5  ;;  %4332 = vmatmul.mubr.bf16.gmra.mxu1 %v4587_v55  ;;  %v3757_v5 = vld [vmem:[%s4696_s20 + $0x94] sm:$0x1]  ;;  %v1014_v8 = vsel %vm4746_vm2, %v1009_v1, %v1013_v59  ;;  %v1875_v52 = vrot.slane %v1874_v49, 4  ;;  %v3764_v55 = vld [vmem:[%s4696_s20 + $0xb0] sm:$0xf] }
  0x6c   : > { %4380 = vmatpush3.bf16.msra.mxu1 %v4589_v13  ;;  %4349 = vmatprep.subr.bf16.mxu0 %v4590_v27  ;;  %v1000_v3 = vsel %vm4746_vm2, %v995_v0, %v999_v54  ;;  %v1849_v12 = vshll.u32 %v3757_v5, 16  ;;  %v1889_v54 = vrot.slane %v1888_v51, 4  ;;  %v3766_v59 = vld [vmem:[%s4696_s20 + $0xb8] sm:$0xf]  ;;  %v1896_v61 = vshrl.u32 %v3764_v55, 16 }
  0x6d   : > { %4381 = vmatprep.subr.bf16.mxu1 %v4591_v32  ;;  %v3651_v13 = vcombine.low %v1000_v3, %v1014_v8  ;;  %v1899_v62 = vshll.u32 %v3764_v55, 16  ;;  %v1905_v0 = vshll.u32 %v3765_v56, 16  ;;  %v1913_v1 = vshll.u32 %v3766_v59, 16  ;;  %v4597_v3 = vld [vmem:[%s4682_s17 + $0x1f0] sm:$0xff]   ;;  %v4604_v44 = vld [vmem:[%s4696_s20 + $0x1f8] ss:$8 sps:$4 sm:$0xff]  }
  0x6e   : > { %v1851_v19 = vrot.slane %v1849_v12, 5  ;;  %v1894_v63 = vsel %vm4746_vm2, %v1889_v54, %v1893_v45  ;;  %v1898_v4 = vrot.slane %v1896_v61, 4  ;;  %v3772_v45 = vld [vmem:[%s4696_s20 + $0x1b0] sm:$0xf]  ;;  %v3773_v49 = vld [vmem:[%s4696_s20 + $0x1b4] sm:$0x1] }
  0x6f   : > { %4350 = vmatpush3.bf16.msra.mxu0 %v4590_v27  ;;  %v1860_v27 = vor.u32 %v1859_v21, %v1856_v20  ;;  %v1901_v5 = vrot.slane %v1899_v62, 5  ;;  %v1915_v9 = vrot.slane %v1913_v1, 5  ;;  %v3771_v20 = vld [vmem:[%s4696_s20 + $0xcc] sm:$0x1]  ;;  %v1924_v21 = vshrl.u32 %v3768_v15, 16 }
  0x70   : > { %4382 = vmatpush3.bf16.msra.mxu1 %v4591_v32  ;;  %4399 = vmatprep.subr.bf16.mxu0 %v4823_v41  ;;  %v1877_v32 = vshll.u32 %v3761_v25, 16  ;;  %v1852_v42 = vsel %vm4746_vm2, %v1847_v33, %v1851_v19  ;;  %v3770_v19 = vld [vmem:[%s4696_s20 + $0xc8] sm:$0xf]  ;;  %v1947_v30 = vshll.u32 %v3771_v20, 16  ;;  %v4603_v33 = vld [vmem:[%s4682_s17 + $0x1e0] sm:$0xff]   ;;  %v1955_v54 = vshll.u32 %v3772_v45, 16 }
  0x71   : > { %4431 = vmatprep.subr.bf16.mxu1 %v4826_v46  ;;  %4300 = vmatmul.mubr.bf16.gmra.mxu0 %v3651_v13  ;;  %v1861_v37 = vrot.slane %v1860_v27, 4  ;;  %v1902_v12 = vor.u32 %v1901_v5, %v1898_v4  ;;  %v1907_v13 = vrot.slane %v1905_v0, 5  ;;  %v1938_v25 = vshrl.u32 %v3770_v19, 16  ;;  %v3775_v51 = vld [vmem:[%s4696_s20 + $0x1bc] sm:$0x1]  ;;  %v4612_v0 = vld [vmem:[%s4682_s17 + $0x188] sm:$0xff]  }
  0x72   : > { %4351 = vmatprep.mubr.bf16.mxu0 %v4592_v2  ;;  %v1879_v40 = vrot.slane %v1877_v32, 5  ;;  %v1941_v26 = vshll.u32 %v3770_v19, 16  ;;  %v1949_v38 = vrot.slane %v1947_v30, 5  ;;  %v1961_v55 = vshll.u32 %v3773_v49, 16  ;;  %v3776_v4 = vld [vmem:[%s4696_s20 + $0x1c0] sm:$0xf] }
  0x73   : > { %v1866_v48 = vsel %vm4746_vm2, %v1861_v37, %v1865_v22  ;;  %v1927_v22 = vshll.u32 %v3768_v15, 16  ;;  %v1903_v23 = vrot.slane %v1902_v12, 4  ;;  %v1940_v31 = vrot.slane %v1938_v25, 4  ;;  %v4609_v5 = vld [vmem:[%s4682_s17 + $0x1d0] sm:$0xff]   ;;  %v4614_v15 = vld [vmem:[%s4682_s17 + $0x180] sm:$0xff]  }
  0x74   : > { %v3804_v50 = vcombine.low %v1852_v42, %v1866_v48  ;;  %v1880_v58 = vsel %vm4746_vm2, %v1875_v52, %v1879_v40  ;;  %v1943_v32 = vrot.slane %v1941_v26, 5  ;;  %v1935_v37 = vrot.slane %v1933_v24, 5 }
  0x75   : > { %v3805_v2 = vcombine.low %v1880_v58, %v1894_v63  ;;  %v1929_v29 = vrot.slane %v1927_v22, 5  ;;  %v1957_v62 = vrot.slane %v1955_v54, 5  ;;  %v4605_v63 = vld [vmem:[%s4696_s20 + $0x208] ss:$8 sps:$4 sm:$0xff]   ;;  %v1980_v12 = vshrl.u32 %v3776_v4, 16 }
  0x76   : > { %4383 = vmatprep.mubr.bf16.mxu1 %v3804_v50  ;;  %v1944_v40 = vor.u32 %v1943_v32, %v1940_v31  ;;  %v3774_v50 = vld [vmem:[%s4696_s20 + $0x1b8] sm:$0xf] }
  0x77   : > { %4384 = vmatmul.mubr.bf16.vlgmr.msra.gmra.mxu1 %v3805_v2  ;;  %v1969_v58 = vshll.u32 %v3774_v50, 16 }
  0x78   : > { %4432 = vmatpush3.bf16.msra.mxu1 %v4826_v46  ;;  %v1908_v46 = vsel %vm4746_vm2, %v1903_v23, %v1907_v13  ;;  %v1945_v43 = vrot.slane %v1944_v40, 4  ;;  %v1983_v13 = vshll.u32 %v3776_v4, 16 }
  0x79   : > { %4352 = vmatmul.mubr.bf16.vlgmr.msra.gmra.mxu0 %v4593_v28  ;;  %4433 = vmatprep.subr.bf16.mxu1 %v4597_v3  ;;  %v1926_v28 = vrot.slane %v1924_v21, 4  ;;  %v1971_v2 = vrot.slane %v1969_v58, 5  ;;  %v1982_v21 = vrot.slane %v1980_v12, 4  ;;  %v4611_v58 = vld [vmem:[%s4696_s20 + $0x228] ss:$8 sps:$4 sm:$0xff]  }
  0x7a   : > { %4400 = vmatpush3.bf16.msra.mxu0 %v4823_v41  ;;  %4355 = vmatprep.mubr.bf16.mxu0 %v4598_v53  ;;  %v1910_v41 = vshrl.u32 %v3766_v59, 16  ;;  %v1950_v52 = vsel %vm4746_vm2, %v1945_v43, %v1949_v38  ;;  %v1952_v53 = vshrl.u32 %v3772_v45, 16  ;;  %v1975_v59 = vshll.u32 %v3775_v51, 16  ;;  %v3782_v38 = vld [vmem:[%s4696_s20 + $0x1d8] sm:$0xf] }
  0x7b   : > { %4401 = vmatprep.subr.bf16.mxu0 %v4596_v47  ;;  %v1930_v36 = vor.u32 %v1929_v29, %v1926_v28  ;;  %v1985_v22 = vrot.slane %v1983_v13, 5  ;;  %v4613_v28 = vld [vmem:[%s4682_s17 + $0x1c8] sm:$0xff]   ;;  %v2022_v45 = vshrl.u32 %v3782_v38, 16 }
  0x7c   : > { %v1912_v8 = vrot.slane %v1910_v41, 4  ;;  %4434 = vmatpush3.bf16.msra.mxu1 %v4597_v3  ;;  %v1954_v61 = vrot.slane %v1952_v53, 4  ;;  %v1963_v41 = vrot.slane %v1961_v55, 5  ;;  %v1977_v3 = vrot.slane %v1975_v59, 5  ;;  %v3784_v59 = vld [vmem:[%s4696_s20 + $0x1e0] sm:$0xf] }
  0x7d   : > { %4435 = vmatprep.subr.bf16.mxu1 %v4601_v17  ;;  %v1931_v42 = vrot.slane %v1930_v36, 4  ;;  %v1986_v30 = vor.u32 %v1985_v22, %v1982_v21  ;;  %v2024_v55 = vrot.slane %v2022_v45, 4  ;;  %v4616_v21 = vld [vmem:[%s4696_s20 + $0x8] ss:$8 sps:$4 sm:$0xff]   ;;  %v4636_v45 = vld [vmem:[%s4696_s20 + $0x158] ss:$8 sps:$4 sm:$0xff]  }
  0x7e   : > { %4402 = vmatpush3.bf16.msra.mxu0 %v4596_v47  ;;  %v1916_v18 = vor.u32 %v1915_v9, %v1912_v8  ;;  %v4608_v47 = vld [vmem:[%s4682_s17 + $0x190] sm:$0xff]   ;;  %v1958_v7 = vor.u32 %v1957_v62, %v1954_v61  ;;  %v3777_v8 = vld [vmem:[%s4696_s20 + $0x1c4] sm:$0x1]  ;;  %v3778_v9 = vld [vmem:[%s4696_s20 + $0x1c8] sm:$0xf] }
  0x7f   : > { %4403 = vmatprep.subr.bf16.mxu0 %v4600_v57  ;;  %v1936_v48 = vsel %vm4746_vm2, %v1931_v42, %v1935_v37  ;;  %v1987_v32 = vrot.slane %v1986_v30, 4  ;;  %v3781_v37 = vld [vmem:[%s4696_s20 + $0x1d4] sm:$0x1]  ;;  %v3783_v42 = vld [vmem:[%s4696_s20 + $0x1dc] sm:$0x1] }
  0x80   : > { %v1917_v27 = vrot.slane %v1916_v18, 4  ;;  %4436 = vmatpush3.bf16.msra.mxu1 %v4601_v17  ;;  %v3807_v56 = vcombine.low %v1936_v48, %v1950_v52  ;;  %v1959_v16 = vrot.slane %v1958_v7, 4  ;;  %v1994_v17 = vshrl.u32 %v3778_v9, 16  ;;  %v3785_v61 = vld [vmem:[%s4696_s20 + $0x1e4] sm:$0x1] }
  0x81   : > { %4356 = vmatmul.mubr.bf16.gmra.mxu0 %v4599_v10  ;;  %4437 = vmatprep.subr.bf16.mxu1 %v4603_v33  ;;  %v3779_v10 = vld [vmem:[%s4696_s20 + $0x1cc] sm:$0x1]  ;;  %v1997_v18 = vshll.u32 %v3778_v9, 16  ;;  %v2031_v51 = vshll.u32 %v3783_v42, 16  ;;  %v3786_v62 = vld [vmem:[%s4696_s20 + $0x1e8] sm:$0xf] }
  0x82   : > { %4404 = vmatpush3.bf16.msra.mxu0 %v4600_v57  ;;  %v1922_v35 = vsel %vm4746_vm2, %v1917_v27, %v1921_v14  ;;  %4359 = vmatprep.mubr.bf16.mxu0 %v4604_v44  ;;  %v1966_v57 = vshrl.u32 %v3774_v50, 16  ;;  %v1989_v14 = vshll.u32 %v3777_v8, 16  ;;  %v2003_v19 = vshll.u32 %v3779_v10, 16  ;;  %v4622_v30 = vld [vmem:[%s4696_s20 + $0x28] ss:$8 sps:$4 sm:$0xff]  }
  0x83   : > { %4405 = vmatprep.subr.bf16.mxu0 %v4602_v11  ;;  %v3806_v39 = vcombine.low %v1908_v46, %v1922_v35  ;;  %v1964_v24 = vsel %vm4746_vm2, %v1959_v16, %v1963_v41  ;;  %v1996_v25 = vrot.slane %v1994_v17, 4  ;;  %v1999_v26 = vrot.slane %v1997_v18, 5  ;;  %v4907_v35 = vld [vmem:[%s4682_s17 + $0x238] sm:$0xff]  }
  0x84   : > { %v1968_v1 = vrot.slane %v1966_v57, 4  ;;  %4438 = vmatpush3.bf16.msra.mxu1 %v4603_v33  ;;  %v1991_v23 = vrot.slane %v1989_v14, 5  ;;  %v2005_v27 = vrot.slane %v2003_v19, 5  ;;  %v4610_v33 = vld [vmem:[%s4696_s20 + $0x218] ss:$8 sps:$4 sm:$0xff]   ;;  %v2017_v44 = vshll.u32 %v3781_v37, 16 }
  0x85   : > { %4387 = vmatprep.mubr.bf16.mxu1 %v3806_v39  ;;  %4439 = vmatprep.subr.bf16.mxu1 %v4607_v60  ;;  %v2000_v31 = vor.u32 %v1999_v26, %v1996_v25  ;;  %v2025_v50 = vshll.u32 %v3782_v38, 16  ;;  %v2033_v57 = vrot.slane %v2031_v51, 5  ;;  %v2036_v41 = vshrl.u32 %v3784_v59, 16  ;;  %v4618_v25 = vld [vmem:[%s4696_s20 + $0x18] ss:$8 sps:$4 sm:$0xff]   ;;  %v4950_v38 = vld [vmem:[%s4682_s17 + $0x210] sm:$0xff]  }
  0x86   : > { %4406 = vmatpush3.bf16.msra.mxu0 %v4602_v11  ;;  %4388 = vmatmul.mubr.bf16.gmra.mxu1 %v3807_v56  ;;  %v1972_v11 = vor.u32 %v1971_v2, %v1968_v1  ;;  %v1992_v40 = vsel %vm4746_vm2, %v1987_v32, %v1991_v23  ;;  %v2019_v54 = vrot.slane %v2017_v44, 5  ;;  %v2039_v1 = vshll.u32 %v3784_v59, 16  ;;  %v4621_v23 = vld [vmem:[%s4682_s17 + $0x230] sm:$0xff]   ;;  %v4627_v32 = vld [vmem:[%s4682_s17 + $0x220] sm:$0xff]   ;;  %v3917_v44 = vld [vmem:[%s4696_s20 + $0xc] sm:$0x1] }
  0x87   : > { %4407 = vmatprep.subr.bf16.mxu0 %v4606_v34  ;;  %v2001_v36 = vrot.slane %v2000_v31, 4  ;;  %v2027_v56 = vrot.slane %v2025_v50, 5  ;;  %v2045_v2 = vshll.u32 %v3785_v61, 16  ;;  %v2050_v4 = vshrl.u32 %v3786_v62, 16  ;;  %v4624_v31 = vld [vmem:[%s4696_s20 + $0x38] ss:$8 sps:$4 sm:$0xff]  }
  0x88   : > { %v1973_v20 = vrot.slane %v1972_v11, 4  ;;  %4440 = vmatpush3.bf16.msra.mxu1 %v4607_v60  ;;  %v2038_v9 = vrot.slane %v2036_v41, 4  ;;  %v2041_v10 = vrot.slane %v2039_v1, 5  ;;  %v4630_v37 = vld [vmem:[%s4696_s20 + $0x138] ss:$8 sps:$4 sm:$0xff]   ;;  %v2897_v51 = vshll.u32 %v3917_v44, 16 }
  0x89   : > { %4360 = vmatmul.mubr.bf16.gmra.mxu0 %v4605_v63  ;;  %4441 = vmatprep.subr.bf16.mxu1 %v4609_v5  ;;  %v2006_v48 = vsel %vm4746_vm2, %v2001_v36, %v2005_v27  ;;  %v3787_v63 = vld [vmem:[%s4696_s20 + $0x1ec] sm:$0x1]  ;;  %v2047_v11 = vrot.slane %v2045_v2, 5  ;;  %v2052_v13 = vrot.slane %v2050_v4, 4  ;;  %v4617_v27 = vld [vmem:[%s4696_s20 + $0x50] ss:$8 sps:$4 sm:$0xff]  }
  0x8a   : > { %4408 = vmatpush3.bf16.msra.mxu0 %v4606_v34  ;;  %v1978_v29 = vsel %vm4746_vm2, %v1973_v20, %v1977_v3  ;;  %v3780_v34 = vld [vmem:[%s4696_s20 + $0x1d0] sm:$0xf]  ;;  %4363 = vmatprep.mubr.bf16.mxu0 %v4610_v33  ;;  %v3809_v52 = vcombine.low %v1992_v40, %v2006_v48  ;;  %v2059_v7 = vshll.u32 %v3787_v63, 16  ;;  %v2042_v17 = vor.u32 %v2041_v10, %v2038_v9  ;;  %v4945_v36 = vld [vmem:[%s4682_s17 + $0x218] sm:$0xff]   ;;  %v4625_v40 = vld [vmem:[%s4696_s20 + $0x80] ss:$8 sps:$4 sm:$0xff]  }
  0x8b   : > { %4409 = vmatprep.subr.bf16.mxu0 %v4608_v47  ;;  %v3808_v46 = vcombine.low %v1964_v24, %v1978_v29  ;;  %v2008_v39 = vshrl.u32 %v3780_v34, 16  ;;  %v2011_v43 = vshll.u32 %v3780_v34, 16  ;;  %v4626_v29 = vld [vmem:[%s4682_s17 + $0x228] sm:$0xff]   ;;  %v4623_v33 = vld [vmem:[%s4696_s20 + $0x70] ss:$8 sps:$4 sm:$0xff]   ;;  %v4975_v2 = vld [vmem:[%s4682_s17 + $0x200] sm:$0xff]  }
  0x8c   : > { %4442 = vmatpush3.bf16.msra.mxu1 %v4609_v5  ;;  %v2053_v5 = vshll.u32 %v3786_v62, 16  ;;  %v2043_v20 = vrot.slane %v2042_v17, 4  ;;  %v4628_v34 = vld [vmem:[%s4696_s20 + $0x128] ss:$8 sps:$4 sm:$0xff]   ;;  %v3919_v48 = vld [vmem:[%s4696_s20 + $0x14] sm:$0x1] }
  0x8d   : > { %4391 = vmatprep.mubr.bf16.mxu1 %v3808_v46  ;;  %4443 = vmatprep.subr.bf16.mxu1 %v4613_v28  ;;  %v2010_v49 = vrot.slane %v2008_v39, 4  ;;  %v2013_v53 = vrot.slane %v2011_v43, 5  ;;  %v4619_v46 = vld [vmem:[%s4696_s20 + $0x60] ss:$8 sps:$4 sm:$0xff]   ;;  %v4629_v42 = vld [vmem:[%s4696_s20 + $0x170] ss:$8 sps:$4 sm:$0xff]  }
  0x8e   : > { %4410 = vmatpush3.bf16.msra.mxu0 %v4608_v47  ;;  %v4615_v47 = vld [vmem:[%s4682_s17 + $0x1c0] sm:$0xff]   ;;  %4392 = vmatmul.mubr.bf16.gmra.mxu1 %v3809_v52  ;;  %v2055_v14 = vrot.slane %v2053_v5, 5  ;;  %v2048_v24 = vsel %vm4746_vm2, %v2043_v20, %v2047_v11  ;;  %v4634_v39 = vld [vmem:[%s4696_s20 + $0x148] ss:$8 sps:$4 sm:$0xff]   ;;  %v3933_v59 = vld [vmem:[%s4696_s20 + $0x12c] sm:$0x1] }
  0x8f   : > { %4411 = vmatprep.subr.bf16.mxu0 %v4612_v0  ;;  %v2014_v60 = vor.u32 %v2013_v53, %v2010_v49  ;;  %v3916_v43 = vld [vmem:[%s4696_s20 + $0x8] sm:$0xf]  ;;  %v4635_v61 = vld [vmem:[%s4696_s20 + $0x190] ss:$8 sps:$4 sm:$0xff]   ;;  %v2899_v62 = vrot.slane %v2897_v51, 5 }
  0x90   : > { %4444 = vmatpush3.bf16.msra.mxu1 %v4613_v28  ;;  %v2056_v19 = vor.u32 %v2055_v14, %v2052_v13  ;;  %v2888_v49 = vshrl.u32 %v3916_v43, 16  ;;  %v2891_v50 = vshll.u32 %v3916_v43, 16  ;;  %v3935_v1 = vld [vmem:[%s4696_s20 + $0x134] sm:$0x1]  ;;  %v3921_v13 = vld [vmem:[%s4696_s20 + $0x1c] sm:$0x1] }
  0x91   : > { %4445 = vmatprep.subr.bf16.mxu1 %v4615_v47  ;;  %4364 = vmatmul.mubr.bf16.gmra.mxu0 %v4611_v58  ;;  %v2015_v3 = vrot.slane %v2014_v60, 4  ;;  %v3934_v60 = vld [vmem:[%s4696_s20 + $0x130] sm:$0xf] }
  0x92   : > { %4412 = vmatpush3.bf16.msra.mxu0 %v4612_v0  ;;  %v2028_v0 = vor.u32 %v2027_v56, %v2024_v55  ;;  %v2057_v22 = vrot.slane %v2056_v19, 4  ;;  %4415 = vmatprep.mubr.bf16.mxu0 %v4616_v21  ;;  %v3932_v55 = vld [vmem:[%s4696_s20 + $0x128] sm:$0xf]  ;;  %v2893_v58 = vrot.slane %v2891_v50, 5  ;;  %v3014_v10 = vshrl.u32 %v3934_v60, 16 }
  0x93   : > { %4413 = vmatprep.subr.bf16.mxu0 %v4614_v15  ;;  %v2020_v12 = vsel %vm4746_vm2, %v2015_v3, %v2019_v54  ;;  %v2911_v54 = vshll.u32 %v3919_v48, 16  ;;  %v4631_v56 = vld [vmem:[%s4696_s20 + $0x180] ss:$8 sps:$4 sm:$0xff]   ;;  %v3000_v4 = vshrl.u32 %v3932_v55, 16  ;;  %v3003_v5 = vshll.u32 %v3932_v55, 16 }
  0x94   : > { %v2029_v8 = vrot.slane %v2028_v0, 4  ;;  %4446 = vmatpush3.bf16.msra.mxu1 %v4615_v47  ;;  %v3918_v47 = vld [vmem:[%s4696_s20 + $0x10] sm:$0xf]  ;;  %v3017_v11 = vshll.u32 %v3934_v60, 16  ;;  %v3016_v20 = vrot.slane %v3014_v10, 4 }
  0x95   : > { %4495 = vmatprep.subr.bf16.mxu1 %v4907_v35  ;;  %v2902_v52 = vshrl.u32 %v3918_v47, 16  ;;  %v2905_v53 = vshll.u32 %v3918_v47, 16  ;;  %v2913_v41 = vrot.slane %v2911_v54, 5  ;;  %v3939_v50 = vld [vmem:[%s4696_s20 + $0x144] sm:$0x1] }
  0x96   : > { %4414 = vmatpush3.bf16.msra.mxu0 %v4614_v15  ;;  %v2061_v15 = vrot.slane %v2059_v7, 5  ;;  %v2034_v16 = vsel %vm4746_vm2, %v2029_v8, %v2033_v57  ;;  %v2890_v57 = vrot.slane %v2888_v49, 4  ;;  %v3009_v7 = vshll.u32 %v3933_v59, 16  ;;  %v3920_v8 = vld [vmem:[%s4696_s20 + $0x18] sm:$0xf] }
  0x97   : > { %4463 = vmatprep.subr.bf16.mxu0 %v4907_v35  ;;  %v3810_v18 = vcombine.low %v2020_v12, %v2034_v16  ;;  %v2904_v63 = vrot.slane %v2902_v52, 4  ;;  %v2907_v0 = vrot.slane %v2905_v53, 5  ;;  %v3023_v12 = vshll.u32 %v3935_v1, 16  ;;  %v3938_v49 = vld [vmem:[%s4696_s20 + $0x140] sm:$0xf] }
  0x98   : > { %v2062_v26 = vsel %vm4746_vm2, %v2057_v22, %v2061_v15  ;;  %v2894_v3 = vor.u32 %v2893_v58, %v2890_v57  ;;  %v3002_v15 = vrot.slane %v3000_v4, 4  ;;  %v3005_v16 = vrot.slane %v3003_v5, 5  ;;  %v3926_v4 = vld [vmem:[%s4696_s20 + $0x30] sm:$0xf] }
  0x99   : > { %4395 = vmatprep.mubr.bf16.mxu1 %v3810_v18  ;;  %v3811_v28 = vcombine.low %v2048_v24, %v2062_v26  ;;  %4416 = vmatmul.mubr.bf16.vlgmr.msra.gmra.mxu0 %v4618_v25  ;;  %v2908_v9 = vor.u32 %v2907_v0, %v2904_v63  ;;  %v3011_v17 = vrot.slane %v3009_v7, 5  ;;  %v3922_v18 = vld [vmem:[%s4696_s20 + $0x20] sm:$0xf]  ;;  %v3019_v21 = vrot.slane %v3017_v11, 5 }
  0x9a   : > { %4464 = vmatpush3.bf16.msra.mxu0 %v4907_v35  ;;  %4419 = vmatprep.mubr.bf16.mxu0 %v4622_v30  ;;  %v2895_v14 = vrot.slane %v2894_v3, 4  ;;  %v3025_v22 = vrot.slane %v3023_v12, 5  ;;  %v3006_v24 = vor.u32 %v3005_v16, %v3002_v15  ;;  %v2916_v25 = vshrl.u32 %v3920_v8, 16 }
  0x9b   : > { %4396 = vmatmul.mubr.bf16.gmra.mxu1 %v3811_v28  ;;  %4465 = vmatprep.subr.bf16.mxu0 %v4621_v23  ;;  %v2909_v19 = vrot.slane %v2908_v9, 4  ;;  %v2919_v26 = vshll.u32 %v3920_v8, 16  ;;  %v3020_v28 = vor.u32 %v3019_v21, %v3016_v20  ;;  %v2925_v30 = vshll.u32 %v3921_v13, 16  ;;  %v3927_v13 = vld [vmem:[%s4696_s20 + $0x34] sm:$0x1] }
  0x9c   : > { %4447 = vmatprep.mubr.bf16.mxu1 %v4617_v27  ;;  %v2933_v44 = vshll.u32 %v3922_v18, 16  ;;  %v3042_v0 = vshrl.u32 %v3938_v49, 16  ;;  %v3045_v1 = vshll.u32 %v3938_v49, 16  ;;  %v3051_v3 = vshll.u32 %v3939_v50, 16 }
  0x9d   : > { %v2914_v27 = vsel %vm4746_vm2, %v2909_v19, %v2913_v41  ;;  %v3925_v41 = vld [vmem:[%s4696_s20 + $0x2c] sm:$0x1]  ;;  %v3940_v19 = vld [vmem:[%s4696_s20 + $0x148] sm:$0xf] }
  0x9e   : > { %4466 = vmatpush3.bf16.msra.mxu0 %v4621_v23  ;;  %v2935_v53 = vrot.slane %v2933_v44, 5  ;;  %v3044_v9 = vrot.slane %v3042_v0, 4  ;;  %v3047_v11 = vrot.slane %v3045_v1, 5  ;;  %v3053_v12 = vrot.slane %v3051_v3, 5  ;;  %v3944_v0 = vld [vmem:[%s4696_s20 + $0x158] sm:$0xf] }
  0x9f   : > { %4467 = vmatprep.subr.bf16.mxu0 %v4626_v29  ;;  %v2953_v15 = vshll.u32 %v3925_v41, 16 }
  0xa0   : > { %v3048_v21 = vor.u32 %v3047_v11, %v3044_v9 }
  0xa1   : > { %4420 = vmatmul.mubr.bf16.gmra.mxu0 %v4624_v31  ;;  %v3936_v31 = vld [vmem:[%s4696_s20 + $0x138] sm:$0xf] }
  0xa2   : > { %4468 = vmatpush3.bf16.msra.mxu0 %v4626_v29  ;;  %4423 = vmatprep.mubr.bf16.mxu0 %v4628_v34  ;;  %v2918_v34 = vrot.slane %v2916_v25, 4  ;;  %v3028_v51 = vshrl.u32 %v3936_v31, 16  ;;  %v3031_v54 = vshll.u32 %v3936_v31, 16  ;;  %v3942_v25 = vld [vmem:[%s4696_s20 + $0x150] sm:$0xf] }
  0xa3   : > { %4448 = vmatmul.mubr.bf16.vlgmr.msra.gmra.mxu1 %v4619_v46  ;;  %4469 = vmatprep.subr.bf16.mxu0 %v4627_v32  ;;  %v2930_v46 = vshrl.u32 %v3922_v18, 16  ;;  %v2958_v18 = vshrl.u32 %v3926_v4, 16  ;;  %v3943_v31 = vld [vmem:[%s4696_s20 + $0x154] sm:$0x1] }
  0xa4   : > { %4503 = vmatpush3.bf16.msra.mxu1 %v4907_v35  ;;  %4451 = vmatprep.mubr.bf16.mxu1 %v4623_v33  ;;  %v4957_v35 = vld [vmem:[%s4682_s17 + $0x208] sm:$0xff]   ;;  %v3007_v33 = vrot.slane %v3006_v24, 4  ;;  %v3030_v60 = vrot.slane %v3028_v51, 4 }
  0xa5   : > { %4496 = vmatprep.subr.bf16.mxu1 %v4621_v23  ;;  %v2932_v43 = vrot.slane %v2930_v46, 4  ;;  %v3941_v24 = vld [vmem:[%s4696_s20 + $0x14c] sm:$0x1] }
  0xa6   : > { %4470 = vmatpush3.bf16.msra.mxu0 %v4627_v32 }
  0xa7   : > { %4471 = vmatprep.subr.bf16.mxu0 %v4945_v36 }
  0xa8   : > { %4504 = vmatpush3.bf16.msra.mxu1 %v4621_v23  ;;  %v2900_v23 = vsel %vm4746_vm2, %v2895_v14, %v2899_v62  ;;  %v3033_v62 = vrot.slane %v3031_v54, 5  ;;  %v3079_v54 = vshll.u32 %v3943_v31, 16 }
  0xa9   : > { %4497 = vmatprep.subr.bf16.mxu1 %v4626_v29  ;;  %4424 = vmatmul.mubr.bf16.gmra.mxu0 %v4630_v37  ;;  %v2921_v37 = vrot.slane %v2919_v26, 5 }
  0xaa   : > { %4472 = vmatpush3.bf16.msra.mxu0 %v4945_v36  ;;  %4427 = vmatprep.mubr.bf16.mxu0 %v4634_v39  ;;  %v3937_v39 = vld [vmem:[%s4696_s20 + $0x13c] sm:$0x1]  ;;  %v3034_v8 = vor.u32 %v3033_v62, %v3030_v60 }
  0xab   : > { %4452 = vmatmul.mubr.bf16.gmra.mxu1 %v4625_v40  ;;  %4473 = vmatprep.subr.bf16.mxu0 %v4950_v38  ;;  %v4637_v40 = vld [vmem:[%s4696_s20 + $0x1a0] ss:$8 sps:$4 sm:$0xff]   ;;  %v2922_v47 = vor.u32 %v2921_v37, %v2918_v34  ;;  %v3037_v55 = vshll.u32 %v3937_v39, 16  ;;  %v3065_v39 = vshll.u32 %v3941_v24, 16 }
  0xac   : > { %4505 = vmatpush3.bf16.msra.mxu1 %v4626_v29  ;;  %4455 = vmatprep.mubr.bf16.mxu1 %v4629_v42  ;;  %v3923_v29 = vld [vmem:[%s4696_s20 + $0x24] sm:$0x1]  ;;  %v2927_v42 = vrot.slane %v2925_v30, 5  ;;  %v3049_v30 = vrot.slane %v3048_v21, 4 }
  0xad   : > { %4498 = vmatprep.subr.bf16.mxu1 %v4627_v32  ;;  %v2939_v48 = vshll.u32 %v3923_v29, 16  ;;  %v2923_v58 = vrot.slane %v2922_v47, 4  ;;  %v3039_v63 = vrot.slane %v3037_v55, 5  ;;  %v2967_v29 = vshll.u32 %v3927_v13, 16  ;;  %v3930_v47 = vld [vmem:[%s4696_s20 + $0x40] sm:$0xf] }
  0xae   : > { %4474 = vmatpush3.bf16.msra.mxu0 %v4950_v38  ;;  %v3931_v55 = vld [vmem:[%s4696_s20 + $0x44] sm:$0x1]  ;;  %v3067_v62 = vrot.slane %v3065_v39, 5  ;;  %v2989_v9 = vshll.u32 %v3930_v47, 16  ;;  %v3084_v13 = vshrl.u32 %v3944_v0, 16 }
  0xaf   : > { %4475 = vmatprep.subr.bf16.mxu0 %v4957_v35  ;;  %v2941_v59 = vrot.slane %v2939_v48, 5  ;;  %v2969_v37 = vrot.slane %v2967_v29, 5 }
  0xb0   : > { %4506 = vmatpush3.bf16.msra.mxu1 %v4627_v32  ;;  %v3964_v32 = vcombine.low %v2900_v23, %v2914_v27  ;;  %v2961_v23 = vshll.u32 %v3926_v4, 16  ;;  %v3946_v4 = vld [vmem:[%s4696_s20 + $0x160] sm:$0xf] }
  0xb1   : > { %4499 = vmatprep.subr.bf16.mxu1 %v4945_v36  ;;  %4428 = vmatmul.mubr.bf16.gmra.mxu0 %v4636_v45  ;;  %v3012_v45 = vsel %vm4746_vm2, %v3007_v33, %v3011_v17  ;;  %v3035_v17 = vrot.slane %v3034_v8, 4  ;;  %v3059_v33 = vshll.u32 %v3940_v19, 16  ;;  %v3101_v29 = vshll.u32 %v3946_v4, 16 }
  0xb2   : > { %4476 = vmatpush3.bf16.msra.mxu0 %v4957_v35  ;;  %4479 = vmatprep.mubr.bf16.mxu0 %v3964_v32  ;;  %v2963_v46 = vrot.slane %v2961_v23, 5  ;;  %v3056_v32 = vshrl.u32 %v3940_v19, 16  ;;  %v3947_v19 = vld [vmem:[%s4696_s20 + $0x164] sm:$0x1] }
  0xb3   : > { %4456 = vmatmul.mubr.bf16.gmra.mxu1 %v4631_v56  ;;  %4477 = vmatprep.subr.bf16.mxu0 %v4975_v2  ;;  %v3924_v56 = vld [vmem:[%s4696_s20 + $0x28] sm:$0xf]  ;;  %v3040_v26 = vsel %vm4746_vm2, %v3035_v17, %v3039_v63  ;;  %v3061_v44 = vrot.slane %v3059_v33, 5  ;;  %v2991_v17 = vrot.slane %v2989_v9, 5  ;;  %v3107_v31 = vshll.u32 %v3947_v19, 16 }
  0xb4   : > { %4507 = vmatpush3.bf16.msra.mxu1 %v4945_v36  ;;  %4459 = vmatprep.mubr.bf16.mxu1 %v4635_v61  ;;  %v3021_v36 = vrot.slane %v3020_v28, 4  ;;  %v2936_v61 = vor.u32 %v2935_v53, %v2932_v43  ;;  %v2944_v5 = vshrl.u32 %v3924_v56, 16  ;;  %v2947_v10 = vshll.u32 %v3924_v56, 16 }
  0xb5   : > { %4500 = vmatprep.subr.bf16.mxu1 %v4950_v38  ;;  %v2960_v28 = vrot.slane %v2958_v18, 4  ;;  %v3058_v43 = vrot.slane %v3056_v32, 4  ;;  %v3073_v53 = vshll.u32 %v3942_v25, 16 }
  0xb6   : > { %4478 = vmatpush3.bf16.msra.mxu0 %v4975_v2  ;;  %v3026_v52 = vsel %vm4746_vm2, %v3021_v36, %v3025_v22  ;;  %v2937_v7 = vrot.slane %v2936_v61, 4  ;;  %v2946_v14 = vrot.slane %v2944_v5, 4  ;;  %v2955_v22 = vrot.slane %v2953_v15, 5 }
  0xb7   : > { %v3968_v57 = vcombine.low %v3012_v45, %v3026_v52  ;;  %v3054_v36 = vsel %vm4746_vm2, %v3049_v30, %v3053_v12  ;;  %v3929_v45 = vld [vmem:[%s4696_s20 + $0x3c] sm:$0x1]  ;;  %v3062_v52 = vor.u32 %v3061_v44, %v3058_v43  ;;  %v3075_v63 = vrot.slane %v3073_v53, 5 }
  0xb8   : > { %4508 = vmatpush3.bf16.msra.mxu1 %v4950_v38  ;;  %v2928_v38 = vsel %vm4746_vm2, %v2923_v58, %v2927_v42  ;;  %v2942_v16 = vsel %vm4746_vm2, %v2937_v7, %v2941_v59  ;;  %v2964_v42 = vor.u32 %v2963_v46, %v2960_v28  ;;  %v3969_v48 = vcombine.low %v3040_v26, %v3054_v36 }
  0xb9   : > { %4501 = vmatprep.subr.bf16.mxu1 %v4957_v35  ;;  %v3965_v20 = vcombine.low %v2928_v38, %v2942_v16  ;;  %v2981_v58 = vshll.u32 %v3929_v45, 16  ;;  %v2986_v59 = vshrl.u32 %v3930_v47, 16  ;;  %v3063_v61 = vrot.slane %v3062_v52, 4 }
  0xba   : > { %v2965_v51 = vrot.slane %v2964_v42, 4  ;;  %v3081_v38 = vrot.slane %v3079_v54, 5  ;;  %v2995_v12 = vshll.u32 %v3931_v55, 16 }
  0xbb   : > { %4460 = vmatmul.mubr.bf16.gmra.mxu1 %v4637_v40  ;;  %4480 = vmatmul.mubr.bf16.vlgmr.msra.gmra.mxu0 %v3965_v20  ;;  %v3070_v40 = vshrl.u32 %v3942_v25, 16  ;;  %v2983_v7 = vrot.slane %v2981_v58, 5  ;;  %v2988_v8 = vrot.slane %v2986_v59, 4  ;;  %v3068_v15 = vsel %vm4746_vm2, %v3063_v61, %v3067_v62 }
  0xbc   : > { %4509 = vmatpush3.bf16.msra.mxu1 %v4957_v35  ;;  %4487 = vmatprep.mubr.bf16.mxu1 %v3968_v57  ;;  %v2949_v35 = vrot.slane %v2947_v10, 5  ;;  %v2970_v60 = vsel %vm4746_vm2, %v2965_v51, %v2969_v37  ;;  %v3945_v10 = vld [vmem:[%s4696_s20 + $0x15c] sm:$0x1]  ;;  %v3086_v20 = vrot.slane %v3084_v13, 4  ;;  %v2997_v25 = vrot.slane %v2995_v12, 5 }
  0xbd   : > { %4502 = vmatprep.subr.bf16.mxu1 %v4975_v2  ;;  %v3072_v50 = vrot.slane %v3070_v40, 4  ;;  %v2992_v24 = vor.u32 %v2991_v17, %v2988_v8 }
  0xbe   : > { %v2950_v27 = vor.u32 %v2949_v35, %v2946_v14  ;;  %v3087_v14 = vshll.u32 %v3944_v0, 16  ;;  %v3098_v35 = vshrl.u32 %v3946_v4, 16 }
  0xbf   : > { %v3076_v5 = vor.u32 %v3075_v63, %v3072_v50  ;;  %v2993_v46 = vrot.slane %v2992_v24, 4 }
  0xc0   : > { %4510 = vmatpush3.bf16.msra.mxu1 %v4975_v2  ;;  %v2951_v34 = vrot.slane %v2950_v27, 4  ;;  %v3928_v2 = vld [vmem:[%s4696_s20 + $0x38] sm:$0xf]  ;;  %v3089_v21 = vrot.slane %v3087_v14, 5  ;;  %v3100_v28 = vrot.slane %v3098_v35, 4 }
  0xc1   : > { %v2972_v56 = vshrl.u32 %v3928_v2, 16  ;;  %v2975_v57 = vshll.u32 %v3928_v2, 16  ;;  %v3077_v16 = vrot.slane %v3076_v5, 4  ;;  %v2998_v37 = vsel %vm4746_vm2, %v2993_v46, %v2997_v25 }
  0xc2   : > { %v2956_v49 = vsel %vm4746_vm2, %v2951_v34, %v2955_v22  ;;  %v3093_v22 = vshll.u32 %v3945_v10, 16  ;;  %v3090_v27 = vor.u32 %v3089_v21, %v3086_v20  ;;  %v3103_v34 = vrot.slane %v3101_v29, 5 }
  0xc3   : > { %4488 = vmatmul.mubr.bf16.vlgmr.msra.gmra.mxu1 %v3969_v48  ;;  %v3966_v41 = vcombine.low %v2956_v49, %v2970_v60  ;;  %v2974_v1 = vrot.slane %v2972_v56, 4  ;;  %v2977_v3 = vrot.slane %v2975_v57, 5  ;;  %v3082_v23 = vsel %vm4746_vm2, %v3077_v16, %v3081_v38 }
  0xc4   : > { %v3970_v26 = vcombine.low %v3068_v15, %v3082_v23  ;;  %v3091_v32 = vrot.slane %v3090_v27, 4  ;;  %v3095_v33 = vrot.slane %v3093_v22, 5  ;;  %v3104_v40 = vor.u32 %v3103_v34, %v3100_v28 }
  0xc5   : > { %4483 = vmatprep.mubr.bf16.mxu0 %v3966_v41  ;;  %v2978_v11 = vor.u32 %v2977_v3, %v2974_v1  ;;  %v3109_v2 = vrot.slane %v3107_v31, 5 }
  0xc6   : > { %4491 = vmatprep.mubr.bf16.mxu1 %v3970_v26  ;;  %v3096_v36 = vsel %vm4746_vm2, %v3091_v32, %v3095_v33  ;;  %v3105_v42 = vrot.slane %v3104_v40, 4 }
  0xc7   : > { %v2979_v18 = vrot.slane %v2978_v11, 4 }
  0xc8   : > { %v3110_v43 = vsel %vm4746_vm2, %v3105_v42, %v3109_v2 }
  0xc9   : > { %v2984_v30 = vsel %vm4746_vm2, %v2979_v18, %v2983_v7  ;;  %v3971_v44 = vcombine.low %v3096_v36, %v3110_v43 }
  0xca   : > { %v3967_v39 = vcombine.low %v2984_v30, %v2998_v37 }
  0xcb   : > { %4492 = vmatmul.mubr.bf16.gmra.mxu1 %v3971_v44 }
  0xcc   : > { %4484 = vmatmul.mubr.bf16.gmra.mxu0 %v3967_v39 }
  0xf2   : > { %v4225_v45 = vpop.f32.mrf.mxu0 }
  0xf3   : > { %v4257_v47 = vpop.f32.mrf.mxu1 }
  0xf4   : > { %v726_v48 = vadd.f32 %v4257_v47, %v4225_v45  ;;  %v386_v49 = vpop.f32.mrf.mxu0 }
  0xf5   : > { %v661_v50 = vpop.f32.mrf.mxu1 }
  0xf6   : > { %v724_v51 = vadd.f32 %v661_v50, %v386_v49  ;;  %v4226_v52 = vpop.f32.mrf.mxu0 }
  0xf7   : > { %v4258_v53 = vpop.f32.mrf.mxu1 }
  0xf8   : > { %v727_v54 = vadd.f32 %v4258_v53, %v4226_v52  ;;  %v389_v55 = vpop.f32.mrf.mxu0 }
  0xf9   : > { %v664_v56 = vpop.f32.mrf.mxu1 }
  0xfa   : > { %v725_v57 = vadd.f32 %v664_v56, %v389_v55  ;;  %v4229_v58 = vpop.f32.mrf.mxu0 }
  0xfb   : > { %v4261_v59 = vpop.f32.mrf.mxu1 }
  0xfc   : > { %v730_v60 = vadd.f32 %v4261_v59, %v4229_v58  ;;  %v402_v61 = vpop.f32.mrf.mxu0 }
  0xfd   : > { %v677_v6 = vpop.f32.mrf.mxu1 }
  0xfe   : > { %v728_v62 = vadd.f32 %v677_v6, %v402_v61  ;;  %v4230_v63 = vpop.f32.mrf.mxu0 }
  0xff   : > { %v4262_v0 = vpop.f32.mrf.mxu1 }
 0x100   : > { %v731_v41 = vadd.f32 %v4262_v0, %v4230_v63  ;;  %v405_v38 = vpop.f32.mrf.mxu0 }
 0x101   : > { %v680_v1 = vpop.f32.mrf.mxu1 }
 0x102   : > { %v729_v3 = vadd.f32 %v680_v1, %v405_v38  ;;  %v4233_v4 = vpop.f32.mrf.mxu0 }
 0x103   : > { %v4265_v5 = vpop.f32.mrf.mxu1 }
 0x104   : > { %v734_v7 = vadd.f32 %v4265_v5, %v4233_v4  ;;  %v418_v8 = vpop.f32.mrf.mxu0 }
 0x105   : > { %v693_v9 = vpop.f32.mrf.mxu1 }
 0x106   : > { %v732_v10 = vadd.f32 %v693_v9, %v418_v8  ;;  %v4234_v11 = vpop.f32.mrf.mxu0 }
 0x107   : > { %v4266_v12 = vpop.f32.mrf.mxu1 }
 0x108   : > { %v735_v13 = vadd.f32 %v4266_v12, %v4234_v11  ;;  %v421_v14 = vpop.f32.mrf.mxu0 }
 0x109   : > { %v696_v15 = vpop.f32.mrf.mxu1 }
 0x10a   : > { %v733_v16 = vadd.f32 %v696_v15, %v421_v14  ;;  %v4237_v17 = vpop.f32.mrf.mxu0 }
 0x10b   : > { %v4269_v35 = vpop.f32.mrf.mxu1 }
 0x10c   : > { %v738_v18 = vadd.f32 %v4269_v35, %v4237_v17  ;;  %v434_v19 = vpop.f32.mrf.mxu0 }
 0x10d   : > { %v709_v20 = vpop.f32.mrf.mxu1 }
 0x10e   : > { %v736_v21 = vadd.f32 %v709_v20, %v434_v19  ;;  %v4238_v22 = vpop.f32.mrf.mxu0 }
 0x10f   : > { %v4270_v23 = vpop.f32.mrf.mxu1 }
 0x110   : > { %v739_v24 = vadd.f32 %v4270_v23, %v4238_v22  ;;  %v437_v25 = vpop.f32.mrf.mxu0 }
 0x111   : > { %v712_v26 = vpop.f32.mrf.mxu1 }
 0x112   : > { %v737_v27 = vadd.f32 %v712_v26, %v437_v25  ;;  %v4289_v28 = vpop.f32.mrf.mxu0 }
 0x113   : > { %v1227_v29 = vadd.f32 %v4289_v28, %v726_v48  ;;  %v4321_v30 = vpop.f32.mrf.mxu1 }
 0x114   : > { %v1162_v46 = vpop.f32.mrf.mxu0 }
 0x115   : > { %v5045_v31 = vadd.f32 %v4321_v30, %v1227_v29  ;;  %v1225_v32 = vadd.f32 %v1162_v46, %v724_v51  ;;  %v1437_v33 = vpop.f32.mrf.mxu1 }
 0x116   : > { %v4290_v34 = vpop.f32.mrf.mxu0 }
 0x117   : > { %v5047_v37 = vadd.f32 %v1437_v33, %v1225_v32  ;;  %v1228_v39 = vadd.f32 %v4290_v34, %v727_v54  ;;  %v4322_v40 = vpop.f32.mrf.mxu1 }
 0x118   : > { %v1165_v2 = vpop.f32.mrf.mxu0 }
 0x119   : > { %v5049_v36 = vadd.f32 %v4322_v40, %v1228_v39  ;;  %v1226_v42 = vadd.f32 %v1165_v2, %v725_v57  ;;  %v1440_v43 = vpop.f32.mrf.mxu1 }
 0x11a   : > { %v4293_v48 = vpop.f32.mrf.mxu0 }
 0x11b   : > { %v5051_v44 = vadd.f32 %v1440_v43, %v1226_v42  ;;  %v4325_v45 = vpop.f32.mrf.mxu1  ;;  %v1231_v50 = vadd.f32 %v4293_v48, %v730_v60 }
 0x11c   : > { %v1178_v52 = vpop.f32.mrf.mxu0 }
 0x11d   : > { %v1453_v47 = vpop.f32.mrf.mxu1  ;;  %v1506_v53 = vadd.f32 %v4325_v45, %v1231_v50  ;;  %v1229_v55 = vadd.f32 %v1178_v52, %v728_v62 }
 0x11e   : > { %v4294_v56 = vpop.f32.mrf.mxu0 }
 0x11f   : > { %v4326_v49 = vpop.f32.mrf.mxu1  ;;  %v1504_v58 = vadd.f32 %v1453_v47, %v1229_v55  ;;  %v1232_v54 = vadd.f32 %v4294_v56, %v731_v41 }
 0x120   : > { %v1181_v59 = vpop.f32.mrf.mxu0 }
 0x121   : > { %v1456_v51 = vpop.f32.mrf.mxu1  ;;  %v1507_v6 = vadd.f32 %v4326_v49, %v1232_v54  ;;  %v1230_v63 = vadd.f32 %v1181_v59, %v729_v3 }
 0x123   : > { %v4329_v61 = vpop.f32.mrf.mxu1  ;;  %v1505_v57 = vadd.f32 %v1456_v51, %v1230_v63 }
 0x125   : > { %v1469_v0 = vpop.f32.mrf.mxu1  ;;  %v4297_v38 = vpop.f32.mrf.mxu0 }
 0x126   : > { %v1235_v1 = vadd.f32 %v4297_v38, %v734_v7 }
 0x127   : > { %v4330_v4 = vpop.f32.mrf.mxu1  ;;  %v1194_v5 = vpop.f32.mrf.mxu0 }
 0x128   : > { %v5053_v8 = vadd.f32 %v4329_v61, %v1235_v1  ;;  %v1233_v60 = vadd.f32 %v1194_v5, %v732_v10 }
 0x129   : > { %v4298_v9 = vpop.f32.mrf.mxu0  ;;  %v1472_v12 = vpop.f32.mrf.mxu1 }
 0x12a   : > { %v5055_v11 = vadd.f32 %v1469_v0, %v1233_v60  ;;  %v1236_v62 = vadd.f32 %v4298_v9, %v735_v13 }
 0x12b   : > { %v1197_v14 = vpop.f32.mrf.mxu0  ;;  %v4333_v3 = vpop.f32.mrf.mxu1 }
 0x12c   : > { %v5057_v41 = vadd.f32 %v4330_v4, %v1236_v62  ;;  %v1234_v15 = vadd.f32 %v1197_v14, %v733_v16 }
 0x12d   : > { %v1485_v19 = vpop.f32.mrf.mxu1 }
 0x12e   : > { %v5059_v17 = vadd.f32 %v1472_v12, %v1234_v15 }
 0x12f   : > { %v4334_v25 = vpop.f32.mrf.mxu1 }
 0x131   : > { %v4301_v35 = vpop.f32.mrf.mxu0  ;;  %v1488_v16 = vpop.f32.mrf.mxu1 }
 0x132   : > { %v1239_v7 = vadd.f32 %v4301_v35, %v738_v18 }
 0x133   : > { %v1210_v20 = vpop.f32.mrf.mxu0 }
 0x134   : > { %v5061_v22 = vadd.f32 %v4333_v3, %v1239_v7  ;;  %v1237_v23 = vadd.f32 %v1210_v20, %v736_v21 }
 0x135   : > { %v4302_v10 = vpop.f32.mrf.mxu0 }
 0x136   : > { %v5063_v26 = vadd.f32 %v1485_v19, %v1237_v23  ;;  %v1240_v13 = vadd.f32 %v4302_v10, %v739_v24 }
 0x137   : > { %v1213_v28 = vpop.f32.mrf.mxu0  ;;  %v5075_v34 = vpop.f32.mrf.mxu1 }
 0x138   : > { %v5065_v29 = vadd.f32 %v4334_v25, %v1240_v13  ;;  %v1238_v30 = vadd.f32 %v1213_v28, %v737_v27 }
 0x139   : > { %v5067_v46 = vpop.f32.mrf.mxu0  ;;  %v5079_v39 = vpop.f32.mrf.mxu1 }
 0x13a   : > { %v5069_v32 = vadd.f32 %v1488_v16, %v1238_v30 }
 0x13b   : > { %v5071_v33 = vpop.f32.mrf.mxu0  ;;  %v5081_v42 = vpop.f32.mrf.mxu1 }
 0x13d   : > { %v5073_v18 = vpop.f32.mrf.mxu0  ;;  %v5083_v48 = vpop.f32.mrf.mxu1 }
 0x13f   : > { %v5077_v21 = vpop.f32.mrf.mxu0 }
 0x141   : > { %v4357_v24 = vpop.f32.mrf.mxu0 }
 0x142   : > { %v1781_v40 = vadd.f32 %v4357_v24, %v1506_v53 }
 0x143   : > { %v1728_v2 = vpop.f32.mrf.mxu0 }
 0x144   : > { %v1779_v27 = vadd.f32 %v1728_v2, %v1504_v58 }
 0x145   : > { %v4358_v43 = vpop.f32.mrf.mxu0 }
 0x146   : > { %v1782_v45 = vadd.f32 %v4358_v43, %v1507_v6  ;;  %v4389_v50 = vpop.f32.mrf.mxu1 }
 0x147   : > { %v1731_v47 = vpop.f32.mrf.mxu0  ;;  %v5085_v52 = vadd.f32 %v4389_v50, %v1781_v40 }
 0x148   : > { %v1780_v49 = vadd.f32 %v1731_v47, %v1505_v57  ;;  %v2226_v55 = vpop.f32.mrf.mxu1 }
 0x149   : > { %v4361_v51 = vpop.f32.mrf.mxu0  ;;  %v5087_v56 = vadd.f32 %v2226_v55, %v1779_v27 }
 0x14a   : > { %v4390_v59 = vpop.f32.mrf.mxu1 }
 0x14b   : > { %v1744_v54 = vpop.f32.mrf.mxu0  ;;  %v5089_v53 = vadd.f32 %v4390_v59, %v1782_v45 }
 0x14c   : > { %v2229_v61 = vpop.f32.mrf.mxu1 }
 0x14d   : > { %v5091_v63 = vadd.f32 %v2229_v61, %v1780_v49  ;;  %v4362_v58 = vpop.f32.mrf.mxu0 }
 0x14e   : > { %v4393_v0 = vpop.f32.mrf.mxu1 }
 0x14f   : > { %5239 = vst [vmem:[#allocation3_spill] sm:$0xff] %v5091_v63  ;;  %v1747_v6 = vpop.f32.mrf.mxu0 }
 0x150   : > { %v2242_v57 = vpop.f32.mrf.mxu1 }
 0x151   : > { %v5093_v38 = vpop.f32.mrf.mxu0 }
 0x152   : > { %v5097_v4 = vpop.f32.mrf.mxu1 }
 0x153   : > { %v5095_v1 = vpop.f32.mrf.mxu0 }
 0x154   : > { %v5103_v9 = vpop.f32.mrf.mxu1 }
 0x155   : > { %v5099_v5 = vpop.f32.mrf.mxu0 }
 0x157   : > { %v5101_v60 = vpop.f32.mrf.mxu0 }
 0x158   : > { %5240 = vst [vmem:[#allocation4_spill] sm:$0xff] %v5101_v60 }
 0x159   : > { %v4417_v62 = vpop.f32.mrf.mxu0 }
 0x15b   : > { %v5105_v12 = vpop.f32.mrf.mxu1  ;;  %v2485_v14 = vpop.f32.mrf.mxu0 }
 0x15d   : > { %v5107_v15 = vpop.f32.mrf.mxu1  ;;  %v4418_v3 = vpop.f32.mrf.mxu0 }
 0x15f   : > { %v5109_v35 = vpop.f32.mrf.mxu1  ;;  %v2488_v19 = vpop.f32.mrf.mxu0 }
 0x160   : > { %5241 = vst [vmem:[#allocation5_spill] sm:$0xff] %v5109_v35 }
 0x161   : > { %v5111_v7 = vpop.f32.mrf.mxu1  ;;  %v5113_v20 = vpop.f32.mrf.mxu0 }
 0x162   : > { %5242 = vst [vmem:[#allocation6_spill] sm:$0xff] %v5111_v7  ;;  %v1777_v7 = vadd.f32 %v5067_v46, %v5045_v31  ;;  %v1776_v31 = vadd.f32 %v5077_v21, %v5051_v44  ;;  %v1784_v21 = vadd.f32 %v1747_v6, %v5059_v17 }
 0x163   : > { %v4449_v23 = vpop.f32.mrf.mxu1  ;;  %v5115_v10 = vpop.f32.mrf.mxu0 }
 0x164   : > { %v2282_v17 = vadd.f32 %v5103_v9, %v1784_v21 }
 0x165   : > { %v2760_v25 = vpop.f32.mrf.mxu1  ;;  %v5117_v13 = vpop.f32.mrf.mxu0 }
 0x167   : > { %v4450_v28 = vpop.f32.mrf.mxu1  ;;  %v5119_v30 = vpop.f32.mrf.mxu0 }
 0x168   : > { %5243 = vst [vmem:[#allocation7_spill] sm:$0xff] %v5119_v30  ;;  %v1775_v30 = vadd.f32 %v5071_v33, %v5047_v37  ;;  %v1783_v37 = vadd.f32 %v1744_v54, %v5055_v11 }
 0x169   : > { %v2763_v16 = vpop.f32.mrf.mxu1  ;;  %v4425_v24 = vpop.f32.mrf.mxu0 }
 0x16a   : > { %v2281_v44 = vadd.f32 %v2242_v57, %v1783_v37 }
 0x16b   : > { %v5121_v40 = vpop.f32.mrf.mxu1  ;;  %v2517_v2 = vpop.f32.mrf.mxu0 }
 0x16d   : > { %v5123_v27 = vpop.f32.mrf.mxu1  ;;  %v4426_v43 = vpop.f32.mrf.mxu0 }
 0x16e   : > { %5244 = vst [vmem:[#allocation8_spill] sm:$0xff] %v5123_v27 }
 0x16f   : > { %v5125_v45 = vpop.f32.mrf.mxu1  ;;  %v2520_v47 = vpop.f32.mrf.mxu0 }
 0x170   : > { %5245 = vst [vmem:[#allocation9_spill] sm:$0xff] %v5125_v45  ;;  %v2275_v45 = vadd.f32 %v5075_v34, %v1777_v7 }
 0x171   : > { %v5127_v49 = vpop.f32.mrf.mxu1  ;;  %v5129_v50 = vpop.f32.mrf.mxu0 }
 0x172   : > { %5246 = vst [vmem:[#allocation10_spill] sm:$0xff] %v5127_v49  ;;  %5247 = vst [vmem:[#allocation11_spill] sm:$0xff] %v5129_v50  ;;  %v1778_v49 = vadd.f32 %v5073_v18, %v5049_v36  ;;  %v1785_v50 = vadd.f32 %v4361_v51, %v5053_v8  ;;  %v2550_v46 = vadd.f32 %v4417_v62, %v2275_v45 }
 0x173   : > { %v4457_v55 = vpop.f32.mrf.mxu1  ;;  %v5131_v61 = vpop.f32.mrf.mxu0  ;;  %v1786_v8 = vadd.f32 %v4362_v58, %v5057_v41  ;;  %v5165_v41 = vld [vmem:[%s5235_s2] ss:$0 sm:$0xff] }
 0x174   : > { %5248 = vst [vmem:[#allocation12_spill] sm:$0xff] %v5131_v61  ;;  %v2273_v61 = vadd.f32 %v5079_v39, %v1775_v30  ;;  %v2276_v34 = vadd.f32 %v5081_v42, %v1778_v49  ;;  %v2283_v36 = vadd.f32 %v4393_v0, %v1785_v50  ;;  %v2274_v39 = vadd.f32 %v5083_v48, %v1776_v31 }
 0x175   : > { %v2792_v59 = vpop.f32.mrf.mxu1  ;;  %v5137_v27 = vpop.f32.mrf.mxu0  ;;  %v2825_v51 = vadd.f32 %v4449_v23, %v2550_v46  ;;  %v2284_v0 = vadd.f32 %v5097_v4, %v1786_v8  ;;  %v2557_v49 = vadd.f32 %v2520_v47, %v2282_v17 }
 0x176   : > { %5249 = vst [vmem:[#allocation13_spill] sm:$0xff] %v5137_v27  ;;  %v2548_v7 = vadd.f32 %v2485_v14, %v2273_v61  ;;  %v2551_v30 = vadd.f32 %v4418_v3, %v2276_v34  ;;  %v2558_v11 = vadd.f32 %v4425_v24, %v2283_v36  ;;  %v2549_v45 = vadd.f32 %v2488_v19, %v2274_v39 }
 0x177   : > { %v4458_v35 = vpop.f32.mrf.mxu1  ;;  %v5151_v27 = vpop.f32.mrf.mxu0  ;;  %v2556_v14 = vadd.f32 %v2517_v2, %v2281_v44  ;;  %v2559_v3 = vadd.f32 %v4426_v43, %v2284_v0  ;;  %v1787_v0 = vadd.f32 %v5095_v1, %v5063_v26 }
 0x178   : > { %5250 = vst [vmem:[#allocation14_spill] sm:$0xff] %v5151_v27  ;;  %v2823_v62 = vadd.f32 %v2760_v25, %v2548_v7  ;;  %v2826_v58 = vadd.f32 %v4450_v28, %v2551_v30  ;;  %v2833_v6 = vadd.f32 %v4457_v55, %v2558_v11  ;;  %v2824_v23 = vadd.f32 %v2763_v16, %v2549_v45 }
 0x179   : > { %v2795_v63 = vpop.f32.mrf.mxu1  ;;  %v2831_v2 = vadd.f32 %v2792_v59, %v2556_v14  ;;  %v2834_v9 = vadd.f32 %v4458_v35, %v2559_v3  ;;  %v2552_v14 = vadd.f32 %v5115_v10, %v5087_v56  ;;  %v2285_v1 = vadd.f32 %v5107_v15, %v1787_v0  ;;  %v5251_v56 = vld [vmem:[#allocation4_spill] sm:$0xff]  ;;  %v5252_v17 = vld [vmem:[#allocation11_spill] sm:$0xff] }
 0x17a   : > { %v2832_v36 = vadd.f32 %v2795_v63, %v2557_v49  ;;  %v1789_v63 = vadd.f32 %v5093_v38, %v5061_v22  ;;  %v1788_v10 = vadd.f32 %v5251_v56, %v5069_v32 }
 0x17b   : > { %v5143_v60 = vpop.f32.mrf.mxu1  ;;  %v4481_v54 = vpop.f32.mrf.mxu0 }
 0x17c   : > { %v3323_v42 = vadd.f32 %v4481_v54, %v2825_v51  ;;  %v2554_v54 = vadd.f32 %v5113_v20, %v5085_v52  ;;  %v1790_v52 = vadd.f32 %v5099_v5, %v5065_v29 }
 0x17d   : > { %v5149_v33 = vpop.f32.mrf.mxu1  ;;  %v3258_v48 = vpop.f32.mrf.mxu0 }
 0x17e   : > { %v3321_v57 = vadd.f32 %v3258_v48, %v2823_v62  ;;  %v3378_v25 = vadd.f32 %v5165_v41, %v3323_v42  ;;  %v2829_v20 = vadd.f32 %v5121_v40, %v2554_v54  ;;  %v5256_v40 = vld [vmem:[#allocation5_spill] sm:$0xff] }
 0x17f   : > { %v5155_v18 = vpop.f32.mrf.mxu1  ;;  %v4482_v19 = vpop.f32.mrf.mxu0 }
 0x180   : > { %v3324_v4 = vadd.f32 %v4482_v19, %v2826_v58  ;;  %v3376_v31 = vadd.f32 %v5165_v41, %v3321_v57  ;;  %v3394_v43 = vmax.f32 %v3378_v25, 0.0  ;;  %v2287_v58 = vadd.f32 %v5105_v12, %v1789_v63  ;;  %v5253_v19 = vld [vmem:[#allocation8_spill] sm:$0xff]  ;;  %v5255_v25 = vld [vmem:[#allocation7_spill] sm:$0xff] }
 0x181   : > { %v5159_v27 = vpop.f32.mrf.mxu1  ;;  %v3261_v61 = vpop.f32.mrf.mxu0  ;;  %v2555_v57 = vadd.f32 %v5117_v13, %v5089_v53  ;;  %v2827_v12 = vadd.f32 %v5253_v19, %v2552_v14  ;;  %v5257_v53 = vld [vmem:[#allocation12_spill] sm:$0xff] }
 0x182   : > { %v3379_v28 = vadd.f32 %v5165_v41, %v3324_v4  ;;  %v3322_v37 = vadd.f32 %v3261_v61, %v2824_v23  ;;  %v3392_v8 = vmax.f32 %v3376_v31, 0.0  ;;  %v5254_v23 = vld [vmem:[#allocation3_spill] sm:$0xff]  ;;  %v2560_v13 = vadd.f32 %v5257_v53, %v2285_v1  ;;  %v5260_v31 = vld [vmem:[#allocation13_spill] sm:$0xff] }
 0x183   : > { %v4489_v24 = vpop.f32.mrf.mxu1  ;;  %v2553_v29 = vadd.f32 %v5255_v25, %v5254_v23 }
 0x184   : > { %v3331_v50 = vadd.f32 %v4489_v24, %v2833_v6  ;;  %v3395_v34 = vmax.f32 %v3379_v28, 0.0  ;;  %v3377_v7 = vadd.f32 %v5165_v41, %v3322_v37  ;;  %v2562_v6 = vadd.f32 %v5252_v17, %v2287_v58  ;;  %v5261_v37 = vld [vmem:[#allocation10_spill] sm:$0xff] }
 0x185   : > { %v3290_v46 = vpop.f32.mrf.mxu1  ;;  %v2288_v24 = vadd.f32 %v5256_v40, %v1790_v52 }
 0x186   : > { %v3329_v55 = vadd.f32 %v3290_v46, %v2831_v2  ;;  %v3386_v59 = vadd.f32 %v5165_v41, %v3331_v50  ;;  %v4024_v39 = vpack.c.bf16 %v3395_v34, %v3394_v43  ;;  %v3393_v35 = vmax.f32 %v3377_v7, 0.0  ;;  %v5258_v2 = vld [vmem:[#allocation9_spill] sm:$0xff]  ;;  %v5259_v50 = vld [vmem:[#allocation6_spill] sm:$0xff] }
 0x187   : > { %v4490_v16 = vpop.f32.mrf.mxu1  ;;  %v2830_v15 = vadd.f32 %v5258_v2, %v2555_v57  ;;  %v2286_v32 = vadd.f32 %v5259_v50, %v1788_v10  ;;  %v2837_v61 = vadd.f32 %v5143_v60, %v2562_v6  ;;  %v2563_v46 = vadd.f32 %v5260_v31, %v2288_v24  ;;  %v5262_v7 = vld [vmem:[#allocation14_spill] sm:$0xff] }
 0x188   : > { %v3332_v47 = vadd.f32 %v4490_v16, %v2834_v9  ;;  %v3384_v30 = vadd.f32 %v5165_v41, %v3329_v55  ;;  %4056 = vst [vmem:[%s5177_s26 + $0x8] sm:$0xff] %v4024_v39   ;;  %v4019_v11 = vpack.c.bf16 %v3393_v35, %v3392_v8  ;;  %v3402_v62 = vmax.f32 %v3386_v59, 0.0 }
 0x189   : > { %v3293_v51 = vpop.f32.mrf.mxu1  ;;  %v2828_v9 = vadd.f32 %v5261_v37, %v2553_v29  ;;  %v2835_v16 = vadd.f32 %v5149_v33, %v2560_v13 }
 0x18a   : > { %v3387_v44 = vadd.f32 %v5165_v41, %v3332_v47  ;;  %v3330_v21 = vadd.f32 %v3293_v51, %v2832_v36  ;;  %4020 = vst [vmem:[%s5177_s26] sm:$0xff] %v4019_v11   ;;  %v3400_v48 = vmax.f32 %v3384_v30, 0.0  ;;  %v2561_v36 = vadd.f32 %v5262_v7, %v2286_v32 }
 0x18b   : > { %v4493_v43 = vpop.f32.mrf.mxu1  ;;  %v2838_v51 = vadd.f32 %v5155_v18, %v2563_v46 }
 0x18c   : > { %v3403_v45 = vmax.f32 %v3387_v44, 0.0  ;;  %v3385_v42 = vadd.f32 %v5165_v41, %v3330_v21  ;;  %v4485_v3 = vpop.f32.mrf.mxu0  ;;  %v3335_v59 = vadd.f32 %v4493_v43, %v2837_v61  ;;  %v2836_v33 = vadd.f32 %v5159_v27, %v2561_v36 }
 0x18d   : > { %v3327_v5 = vadd.f32 %v4485_v3, %v2829_v20  ;;  %v3306_v39 = vpop.f32.mrf.mxu1 }
 0x18e   : > { %v4044_v22 = vpack.c.bf16 %v3403_v45, %v3402_v62  ;;  %v3401_v38 = vmax.f32 %v3385_v42, 0.0  ;;  %v3274_v4 = vpop.f32.mrf.mxu0  ;;  %v3333_v30 = vadd.f32 %v3306_v39, %v2835_v16  ;;  %v3390_v54 = vadd.f32 %v5165_v41, %v3335_v59 }
 0x18f   : > { %v3325_v49 = vadd.f32 %v3274_v4, %v2827_v12  ;;  %v3382_v55 = vadd.f32 %v5165_v41, %v3327_v5  ;;  %v4494_v63 = vpop.f32.mrf.mxu1 }
 0x190   : > { %4060 = vst [vmem:[%s5177_s26 + $0x28] sm:$0xff] %v4044_v22   ;;  %v4039_v26 = vpack.c.bf16 %v3401_v38, %v3400_v48  ;;  %v4486_v28 = vpop.f32.mrf.mxu0  ;;  %v3336_v62 = vadd.f32 %v4494_v63, %v2838_v51  ;;  %v3388_v18 = vadd.f32 %v5165_v41, %v3333_v30  ;;  %v3406_v58 = vmax.f32 %v3390_v54, 0.0 }
 0x191   : > { %v3328_v34 = vadd.f32 %v4486_v28, %v2830_v15  ;;  %v3380_v8 = vadd.f32 %v5165_v41, %v3325_v49  ;;  %v3398_v44 = vmax.f32 %v3382_v55, 0.0  ;;  %v3309_v14 = vpop.f32.mrf.mxu1 }
 0x192   : > { %4059 = vst [vmem:[%s5177_s26 + $0x20] sm:$0xff] %v4039_v26   ;;  %v3277_v47 = vpop.f32.mrf.mxu0  ;;  %v3391_v48 = vadd.f32 %v5165_v41, %v3336_v62  ;;  %v3334_v22 = vadd.f32 %v3309_v14, %v2836_v33  ;;  %v3404_v20 = vmax.f32 %v3388_v18, 0.0 }
 0x193   : > { %v3383_v60 = vadd.f32 %v5165_v41, %v3328_v34  ;;  %v3326_v35 = vadd.f32 %v3277_v47, %v2828_v9  ;;  %v3396_v45 = vmax.f32 %v3380_v8, 0.0 }
 0x194   : > { %v3407_v52 = vmax.f32 %v3391_v48, 0.0  ;;  %v3389_v27 = vadd.f32 %v5165_v41, %v3334_v22 }
 0x195   : > { %v3399_v21 = vmax.f32 %v3383_v60, 0.0  ;;  %v3381_v11 = vadd.f32 %v5165_v41, %v3326_v35 }
 0x196   : > { %v4054_v57 = vpack.c.bf16 %v3407_v52, %v3406_v58  ;;  %v3405_v26 = vmax.f32 %v3389_v27, 0.0 }
 0x197   : > { %v4034_v42 = vpack.c.bf16 %v3399_v21, %v3398_v44  ;;  %v3397_v0 = vmax.f32 %v3381_v11, 0.0 }
 0x198   : > { %4062 = vst [vmem:[%s5177_s26 + $0x38] sm:$0xff] %v4054_v57   ;;  %v4049_v1 = vpack.c.bf16 %v3405_v26, %v3404_v20 }
 0x199   : > { %4058 = vst [vmem:[%s5177_s26 + $0x18] sm:$0xff] %v4034_v42   ;;  %v4029_v38 = vpack.c.bf16 %v3397_v0, %v3396_v45 }
 0x19a   : > { %4061 = vst [vmem:[%s5177_s26 + $0x30] sm:$0xff] %v4049_v1  }
 0x19b   : > { %4057 = vst [vmem:[%s5177_s26 + $0x10] sm:$0xff] %v4029_v38  }
 0x19c PF: > { %s13_s12 = sadd.s32 1, %s4646_s12  }
 0x19d   : > { %p10_p4 = scmp.ge.s32.totalorder %s13_s12, 6  }
 0x19f   :  { %12 = sbr.rel (!%p10_p4) target bundleno = 1 (0x1), region = 78 }

// kernel: bottleneck_forward.5
= control target key start
LH: loop header
LB: loop body
LE: loop exit
PB: predicated region body
PF: predicated region fallthrough
CT: control target
= control target key end

     0   :  { %10 = vsyncpa [#allocation3], 0  ;;  %s1539_s0 = inlined_call_operand.vmem [shape: bf16[4,128,128], index: 0, kind: input, shape index: {}]   ;;  %s1540_s1 = inlined_call_operand.vmem [shape: bf16[4,128,128], index: 1, kind: input, shape index: {}]   ;;  %s1541_s2 = inlined_call_operand.vmem [shape: bf16[4,128,128], index: 2, kind: input, shape index: {}]   ;;  %s1542_s3 = inlined_call_operand.vmem [shape: bf16[4,128,128], index: 3, kind: input, shape index: {}]   ;;  %s1543_s4 = inlined_call_operand.vmem [shape: f32[1,128], index: 4, kind: input, shape index: {}]   ;;  %s1544_s5 = inlined_call_operand.hbm [shape: f32[4,128,128], index: 5, kind: output, shape index: {}]  }
   0x1   :  { %12 = vsyncpa [#allocation3 + $0x1], 0  ;;  %s1326_s18 = smov 0   ;;  %s1328_s19 = smov 0  }
   0x2   :  { %s1330_s20 = smov 0   ;;  %s1332_s21 = smov 0  }
   0x3   :  { %s1334_s22 = smov 0   ;;  %s1336_s23 = smov 0  }
   0x4 LB: > { %s973_s24 = sadd.s32 4294967295, %s1291_s23   ;;  %s974_s25 = sadd.s32 4294967294, %s1291_s23   ;;  %s1291_s23 = sphi %s1336_s23, %s18_s23   ;;  %s1287_s22 = sphi %s1334_s22, %s1551_s22   ;;  %s1283_s21 = sphi %s1332_s21, %s1550_s21   ;;  %s1279_s20 = sphi %s1330_s20, %s1549_s20   ;;  %s1275_s19 = sphi %s1328_s19, %s1548_s19   ;;  %s1271_s18 = sphi %s1326_s18, %s1547_s18  }
   0x5   : > { %s30_s26 = sadd.s32 1, %s1287_s22  ;;  %s168_s27 = sadd.s32 1, %s1279_s20 }
   0x6   : > { %p32_p0 = scmp.ge.s32.totalorder %s30_s26, 4  ;;  %p178_p1 = scmp.ne.s32.totalorder %s1279_s20, %s1275_s19 }
   0x7   : > { %p179_p2 = scmp.eq.s32.totalorder %s973_s24, 3  ;;  %p184_p3 = scmp.ne.s32.totalorder %s1275_s19, %s1271_s18 }
   0x8   : > { %s1553_s26 = smov (%p32_p0, %s30_s26), 0  ;;  %p185_p5 = scmp.eq.s32.totalorder %s974_s25, 3 }
   0x9   : > { %p1366_p4 = por %p179_p2, %p178_p1  ;;  %s163_s29 = ssub.s32 %s1287_s22, %s1553_s26 }
   0xa   : > { %p977_p6 = scmp.ge.s32.totalorder %s1291_s23, 1  ;;  %p166_p7 = scmp.eq.s32.totalorder %s163_s29, 0 }
   0xb   : > { %p1373_p8 = por %p185_p5, %p184_p3  ;;  %p248_p9 = scmp.lt.s32.totalorder %s1291_s23, 5 }
   0xc   : > { %s1379_s6 = scalar_select %p166_p7, %s1279_s20, %s168_s27  }
   0xd   : > { %p249_p10 = pnand %p977_p6, %p248_p9 }
   0xe   : > { %p300_p11 = scmp.lt.s32.totalorder (!%p249_p10), %s1283_s21, 3  ;;  %s296_s29 = sand.u32 (!%p249_p10), 1, %s1275_s19  }
   0xf   : > { %252 = sbr.rel (%p249_p10) target bundleno = 301 (0x12d), region = 40  ;;  %s978_s9 = sshll.u32 (!%p249_p10), %s296_s29, 7 }
  0x10   : > { %s1451_s10 = scalar_lea.vmem (!%p249_p10), [#allocation2], %s978_s9 }
  0x11   : > { %s852_s12 = sshll.u32 (!%p249_p10), %s1451_s10, 4  ;;  %s1488_s12 = int_to_ptr.vmem [resolvable:$true] %s852_s12 }
  0x12   : > { %s1215_s16 = scalar_lea.vmem (!%p249_p10), %s1488_s12, 2048 }
  0x13   : > { %p1216_p12 = scmp.ne.s32.totalorder (!%p249_p10), %s1488_s12, %s1215_s16 }
  0x14   : > { %s301_s7 = scalar_select %p300_p11, %s1283_s21, 3  ;;  %v1445_v34 = vld [vmem:[%s1543_s4] ss:$0 sm:$0xff] }
  0x15   : > { %p1217_p13 = pnand %p1216_p12, %p1366_p4 }
  0x16   : > { %s1383_s8 = sshll.u32 %s301_s7, 6 }
  0x17   : > { %s1389_s11 = scalar_lea.vmem %s1542_s3, %s1383_s8  ;;  %s1395_s14 = scalar_lea.vmem %s1541_s2, %s1383_s8 }
  0x18   : > { %v1183_v0 = vld [vmem:[%s1389_s11 + $0x38] sm:$0xff]   ;;  %v1185_v2 = vld [vmem:[%s1389_s11 + $0x30] sm:$0xff]   ;;  %v1187_v4 = vld [vmem:[%s1389_s11 + $0x28] sm:$0xff]   ;;  %s1411_s17 = scalar_lea.vmem %s1540_s1, %s1383_s8  ;;  %s1418_s27 = scalar_lea.vmem %s1539_s0, %s1383_s8 }
  0x19   : > { %v1184_v1 = vld [vmem:[%s1395_s14 + $0x38] sm:$0xff]   ;;  %1062 = vmatprep.subr.bf16.mxu0 %v1183_v0  ;;  %v1186_v3 = vld [vmem:[%s1395_s14 + $0x30] sm:$0xff]   ;;  %v1188_v5 = vld [vmem:[%s1395_s14 + $0x28] sm:$0xff]   ;;  %p1218_p0 = pneg %p1217_p13 }
  0x1a   : > { %1094 = vmatprep.subr.bf16.mxu1 %v1184_v1  ;;  %1063 = vmatpush3.bf16.msra.mxu0 %v1183_v0  ;;  %v1189_v6 = vld [vmem:[%s1389_s11 + $0x20] sm:$0xff]   ;;  %v1191_v8 = vld [vmem:[%s1389_s11 + $0x18] sm:$0xff]   ;;  %v1193_v10 = vld [vmem:[%s1389_s11 + $0x10] sm:$0xff]  }
  0x1b   : > { %1095 = vmatpush3.bf16.msra.mxu1 %v1184_v1  ;;  %1064 = vmatprep.subr.bf16.mxu0 %v1185_v2  ;;  %v1190_v7 = vld [vmem:[%s1395_s14 + $0x20] sm:$0xff]   ;;  %v1192_v9 = vld [vmem:[%s1395_s14 + $0x18] sm:$0xff]   ;;  %v1194_v11 = vld [vmem:[%s1395_s14 + $0x10] sm:$0xff]  }
  0x1c   : > { %1096 = vmatprep.subr.bf16.mxu1 %v1186_v3  ;;  %v1199_v12 = vld [vmem:[%s1411_s17] sm:$0xff]   ;;  %v1195_v14 = vld [vmem:[%s1389_s11 + $0x8] sm:$0xff]   ;;  %v1203_v20 = vld [vmem:[%s1411_s17 + $0x10] sm:$0xff]  }
  0x1d   : > { %v1200_v13 = vld [vmem:[%s1418_s27] sm:$0xff]   ;;  %1078 = vmatprep.mubr.bf16.mxu0 %v1199_v12  ;;  %v1196_v15 = vld [vmem:[%s1395_s14 + $0x8] sm:$0xff]   ;;  %v1204_v21 = vld [vmem:[%s1418_s27 + $0x10] sm:$0xff]  }
  0x1e   : > { %1065 = vmatpush3.bf16.msra.mxu0 %v1185_v2  ;;  %1110 = vmatprep.mubr.bf16.mxu1 %v1200_v13  ;;  %v1197_v16 = vld [vmem:[%s1389_s11] sm:$0xff]   ;;  %v1201_v18 = vld [vmem:[%s1411_s17 + $0x8] sm:$0xff]   ;;  %v1205_v22 = vld [vmem:[%s1411_s17 + $0x18] sm:$0xff]   ;;  %s1029_s11 = sshll.u32 %s1283_s21, 11  ;;  %s1494_s21 = scalar_lea.sflag [#allocation3], %s296_s29 }
  0x1f   : > { %1097 = vmatpush3.bf16.msra.mxu1 %v1186_v3  ;;  %1066 = vmatprep.subr.bf16.mxu0 %v1187_v4  ;;  %v1198_v17 = vld [vmem:[%s1395_s14] sm:$0xff]   ;;  %v1202_v19 = vld [vmem:[%s1418_s27 + $0x8] sm:$0xff]   ;;  %v1206_v23 = vld [vmem:[%s1418_s27 + $0x18] sm:$0xff]   ;;  %s1486_s15 = scalar_lea.hbm %s1544_s5, %s1029_s11 }
  0x20   : > { %1098 = vmatprep.subr.bf16.mxu1 %v1188_v5  ;;  %v1207_v24 = vld [vmem:[%s1411_s17 + $0x20] sm:$0xff]   ;;  %v1209_v26 = vld [vmem:[%s1411_s17 + $0x28] sm:$0xff]   ;;  %v1211_v28 = vld [vmem:[%s1411_s17 + $0x30] sm:$0xff]  }
  0x21   : > { %v1208_v25 = vld [vmem:[%s1418_s27 + $0x20] sm:$0xff]   ;;  %v1210_v27 = vld [vmem:[%s1418_s27 + $0x28] sm:$0xff]   ;;  %v1212_v29 = vld [vmem:[%s1418_s27 + $0x30] sm:$0xff]  }
  0x22   : > { %1067 = vmatpush3.bf16.msra.mxu0 %v1187_v4  ;;  %v1213_v30 = vld [vmem:[%s1411_s17 + $0x38] sm:$0xff]   ;;  %s1293_s17 = smov [#allocation2]  }
  0x23   : > { %1099 = vmatpush3.bf16.msra.mxu1 %v1188_v5  ;;  %1068 = vmatprep.subr.bf16.mxu0 %v1189_v6  ;;  %v1214_v31 = vld [vmem:[%s1418_s27 + $0x38] sm:$0xff]   ;;  %s1219_s24 = sshll.u32 %s1293_s17, 4  ;;  %s1220_s24 = int_to_ptr.vmem [resolvable:$false] %s1219_s24 }
  0x24   : > { %1100 = vmatprep.subr.bf16.mxu1 %v1190_v7  ;;  %s1221_s25 = scalar_lea.vmem %s1220_s24, 4096  ;;  %p1222_p1 = scmp.lt.s32.totalorder %s1488_s12, %s1220_s24 }
  0x25   : > { %p1223_p2 = scmp.lt.s32.totalorder %s1221_s25, %s1215_s16 }
  0x26   : > { %1069 = vmatpush3.bf16.msra.mxu0 %v1189_v6 }
  0x27   : > { %1101 = vmatpush3.bf16.msra.mxu1 %v1190_v7  ;;  %1070 = vmatprep.subr.bf16.mxu0 %v1191_v8  ;;  %p1224_p3 = por %p1223_p2, %p1222_p1 }
  0x28   : > { %1102 = vmatprep.subr.bf16.mxu1 %v1192_v9 }
  0x29   : > { %p1225_p5 = pnand %p1224_p3, %p1218_p0 }
  0x2a   : > { %1071 = vmatpush3.bf16.msra.mxu0 %v1191_v8 }
  0x2b   : > { %1103 = vmatpush3.bf16.msra.mxu1 %v1192_v9  ;;  %1072 = vmatprep.subr.bf16.mxu0 %v1193_v10 }
  0x2c   : > { %1104 = vmatprep.subr.bf16.mxu1 %v1194_v11 }
  0x2e   : > { %1073 = vmatpush3.bf16.msra.mxu0 %v1193_v10 }
  0x2f   : > { %1105 = vmatpush3.bf16.msra.mxu1 %v1194_v11  ;;  %1074 = vmatprep.subr.bf16.mxu0 %v1195_v14 }
  0x30   : > { %1106 = vmatprep.subr.bf16.mxu1 %v1196_v15 }
  0x32   : > { %1075 = vmatpush3.bf16.msra.mxu0 %v1195_v14 }
  0x33   : > { %1107 = vmatpush3.bf16.msra.mxu1 %v1196_v15  ;;  %1076 = vmatprep.subr.bf16.mxu0 %v1197_v16 }
  0x34   : > { %1108 = vmatprep.subr.bf16.mxu1 %v1198_v17 }
  0x36   : > { %1077 = vmatpush3.bf16.msra.mxu0 %v1197_v16 }
  0x37   : > { %1109 = vmatpush3.bf16.msra.mxu1 %v1198_v17 }
  0x39   : > { %1079 = vmatmul.mubr.bf16.vlgmr.msra.gmra.mxu0 %v1201_v18 }
  0x3a   : > { %1111 = vmatmul.mubr.bf16.vlgmr.msra.gmra.mxu1 %v1202_v19  ;;  %1082 = vmatprep.mubr.bf16.mxu0 %v1203_v20 }
  0x3b   : > { %1114 = vmatprep.mubr.bf16.mxu1 %v1204_v21 }
  0x41   : > { %1083 = vmatmul.mubr.bf16.gmra.mxu0 %v1205_v22 }
  0x42   : > { %1115 = vmatmul.mubr.bf16.gmra.mxu1 %v1206_v23  ;;  %1086 = vmatprep.mubr.bf16.mxu0 %v1207_v24 }
  0x43   : > { %1118 = vmatprep.mubr.bf16.mxu1 %v1208_v25 }
  0x49   : > { %1087 = vmatmul.mubr.bf16.gmra.mxu0 %v1209_v26 }
  0x4a   : > { %1119 = vmatmul.mubr.bf16.gmra.mxu1 %v1210_v27  ;;  %1090 = vmatprep.mubr.bf16.mxu0 %v1211_v28 }
  0x4b   : > { %1122 = vmatprep.mubr.bf16.mxu1 %v1212_v29 }
  0x51   : > { %1091 = vmatmul.mubr.bf16.gmra.mxu0 %v1213_v30 }
  0x52   : > { %1123 = vmatmul.mubr.bf16.gmra.mxu1 %v1214_v31 }
  0xf9   : > { %v1080_v32 = vpop.f32.mrf.mxu0 }
  0xfa   : > { %v1112_v33 = vpop.f32.mrf.mxu1 }
  0xfb   : > { %v727_v35 = vadd.f32 %v1112_v33, %v1080_v32  ;;  %v525_v36 = vpop.f32.mrf.mxu0 }
  0xfc   : > { %v718_v37 = vpop.f32.mrf.mxu1 }
  0xfd   : > { %v790_v38 = vadd.f32 %v1445_v34, %v727_v35  ;;  %v719_v39 = vadd.f32 %v718_v37, %v525_v36  ;;  %v1081_v40 = vpop.f32.mrf.mxu0 }
  0xfe   : > { %v1113_v41 = vpop.f32.mrf.mxu1 }
  0xff   : > { %v806_v42 = vmax.f32 %v790_v38, 0.0  ;;  %v788_v43 = vadd.f32 %v1445_v34, %v719_v39  ;;  %v730_v44 = vadd.f32 %v1113_v41, %v1081_v40  ;;  %v528_v45 = vpop.f32.mrf.mxu0 }
 0x100   : > { %v721_v46 = vpop.f32.mrf.mxu1 }
 0x101   : > { %822 = vst [vmem:[%s1451_s10 + $0x10] sm:$0xff] %v806_v42  ;;  %v804_v47 = vmax.f32 %v788_v43, 0.0  ;;  %v791_v48 = vadd.f32 %v1445_v34, %v730_v44  ;;  %v722_v49 = vadd.f32 %v721_v46, %v528_v45  ;;  %v1084_v50 = vpop.f32.mrf.mxu0 }
 0x102   : > { %v1116_v51 = vpop.f32.mrf.mxu1 }
 0x103   : > { %820 = vst [vmem:[%s1451_s10] sm:$0xff] %v804_v47  ;;  %v807_v52 = vmax.f32 %v791_v48, 0.0  ;;  %v789_v53 = vadd.f32 %v1445_v34, %v722_v49  ;;  %v743_v54 = vadd.f32 %v1116_v51, %v1084_v50  ;;  %v541_v55 = vpop.f32.mrf.mxu0 }
 0x104   : > { %v734_v56 = vpop.f32.mrf.mxu1 }
 0x105   : > { %823 = vst [vmem:[%s1451_s10 + $0x18] sm:$0xff] %v807_v52  ;;  %v805_v57 = vmax.f32 %v789_v53, 0.0  ;;  %v794_v58 = vadd.f32 %v1445_v34, %v743_v54  ;;  %v735_v59 = vadd.f32 %v734_v56, %v541_v55  ;;  %v1085_v60 = vpop.f32.mrf.mxu0 }
 0x106   : > { %v1117_v61 = vpop.f32.mrf.mxu1 }
 0x107   : > { %821 = vst [vmem:[%s1451_s10 + $0x8] sm:$0xff] %v805_v57  ;;  %v810_v62 = vmax.f32 %v794_v58, 0.0  ;;  %v792_v63 = vadd.f32 %v1445_v34, %v735_v59  ;;  %v746_v0 = vadd.f32 %v1117_v61, %v1085_v60  ;;  %v544_v1 = vpop.f32.mrf.mxu0 }
 0x108   : > { %v737_v2 = vpop.f32.mrf.mxu1 }
 0x109   : > { %826 = vst [vmem:[%s1451_s10 + $0x30] sm:$0xff] %v810_v62  ;;  %v808_v3 = vmax.f32 %v792_v63, 0.0  ;;  %v795_v4 = vadd.f32 %v1445_v34, %v746_v0  ;;  %v738_v5 = vadd.f32 %v737_v2, %v544_v1  ;;  %v1088_v6 = vpop.f32.mrf.mxu0 }
 0x10a   : > { %v1120_v7 = vpop.f32.mrf.mxu1 }
 0x10b   : > { %824 = vst [vmem:[%s1451_s10 + $0x20] sm:$0xff] %v808_v3  ;;  %v811_v8 = vmax.f32 %v795_v4, 0.0  ;;  %v793_v9 = vadd.f32 %v1445_v34, %v738_v5  ;;  %v759_v10 = vadd.f32 %v1120_v7, %v1088_v6  ;;  %v557_v11 = vpop.f32.mrf.mxu0 }
 0x10c   : > { %v750_v12 = vpop.f32.mrf.mxu1 }
 0x10d   : > { %827 = vst [vmem:[%s1451_s10 + $0x38] sm:$0xff] %v811_v8  ;;  %v809_v13 = vmax.f32 %v793_v9, 0.0  ;;  %v798_v14 = vadd.f32 %v1445_v34, %v759_v10  ;;  %v751_v15 = vadd.f32 %v750_v12, %v557_v11  ;;  %v1089_v16 = vpop.f32.mrf.mxu0 }
 0x10e   : > { %v1121_v17 = vpop.f32.mrf.mxu1 }
 0x10f   : > { %825 = vst [vmem:[%s1451_s10 + $0x28] sm:$0xff] %v809_v13  ;;  %v814_v18 = vmax.f32 %v798_v14, 0.0  ;;  %v796_v19 = vadd.f32 %v1445_v34, %v751_v15  ;;  %v762_v20 = vadd.f32 %v1121_v17, %v1089_v16  ;;  %v560_v21 = vpop.f32.mrf.mxu0 }
 0x110   : > { %v753_v22 = vpop.f32.mrf.mxu1 }
 0x111   : > { %830 = vst [vmem:[%s1451_s10 + $0x50] sm:$0xff] %v814_v18  ;;  %v812_v23 = vmax.f32 %v796_v19, 0.0  ;;  %v799_v24 = vadd.f32 %v1445_v34, %v762_v20  ;;  %v754_v25 = vadd.f32 %v753_v22, %v560_v21  ;;  %v1092_v26 = vpop.f32.mrf.mxu0 }
 0x112   : > { %v1124_v27 = vpop.f32.mrf.mxu1 }
 0x113   : > { %828 = vst [vmem:[%s1451_s10 + $0x40] sm:$0xff] %v812_v23  ;;  %v815_v28 = vmax.f32 %v799_v24, 0.0  ;;  %v797_v29 = vadd.f32 %v1445_v34, %v754_v25  ;;  %v775_v30 = vadd.f32 %v1124_v27, %v1092_v26  ;;  %v573_v31 = vpop.f32.mrf.mxu0 }
 0x114   : > { %v766_v32 = vpop.f32.mrf.mxu1 }
 0x115   : > { %831 = vst [vmem:[%s1451_s10 + $0x58] sm:$0xff] %v815_v28  ;;  %v813_v33 = vmax.f32 %v797_v29, 0.0  ;;  %v802_v35 = vadd.f32 %v1445_v34, %v775_v30  ;;  %v767_v36 = vadd.f32 %v766_v32, %v573_v31  ;;  %v1093_v37 = vpop.f32.mrf.mxu0 }
 0x116   : > { %v1125_v38 = vpop.f32.mrf.mxu1 }
 0x117   : > { %829 = vst [vmem:[%s1451_s10 + $0x48] sm:$0xff] %v813_v33  ;;  %v818_v39 = vmax.f32 %v802_v35, 0.0  ;;  %v800_v40 = vadd.f32 %v1445_v34, %v767_v36  ;;  %v778_v41 = vadd.f32 %v1125_v38, %v1093_v37  ;;  %v576_v42 = vpop.f32.mrf.mxu0 }
 0x118   : > { %v769_v43 = vpop.f32.mrf.mxu1 }
 0x119   : > { %834 = vst [vmem:[%s1451_s10 + $0x70] sm:$0xff] %v818_v39  ;;  %v816_v44 = vmax.f32 %v800_v40, 0.0  ;;  %v803_v45 = vadd.f32 %v1445_v34, %v778_v41  ;;  %v770_v46 = vadd.f32 %v769_v43, %v576_v42 }
 0x11b   : > { %832 = vst [vmem:[%s1451_s10 + $0x60] sm:$0xff] %v816_v44  ;;  %v819_v47 = vmax.f32 %v803_v45, 0.0  ;;  %v801_v48 = vadd.f32 %v1445_v34, %v770_v46 }
 0x11d   : > { %835 = vst [vmem:[%s1451_s10 + $0x78] sm:$0xff] %v819_v47  ;;  %v817_v49 = vmax.f32 %v801_v48, 0.0 }
 0x11f   : > { %833 = vst [vmem:[%s1451_s10 + $0x68] sm:$0xff] %v817_v49 }
 0x120   : > { %1228 = shalt.err (!%p1225_p5)
}
 0x121   : > { %s1229_s27 = scalar_lea.hbm %s1486_s15, 2048  ;;  %s1233_s8 = scalar_lea.hbm %s1544_s5, 8192 }
 0x122   : > { %p1230_p6 = scmp.ne.s32.totalorder %s1486_s15, %s1229_s27  ;;  %p1234_p10 = scmp.lt.s32.totalorder %s1486_s15, %s1544_s5 }
 0x123   : > { %p1235_p11 = scmp.lt.s32.totalorder %s1233_s8, %s1229_s27 }
 0x124   : > { %p1231_p7 = pnand %p1230_p6, %p1366_p4 }
 0x125   : > { %p1236_p12 = por %p1235_p11, %p1234_p10 }
 0x126   : > { %p1232_p9 = pneg %p1231_p7 }
 0x128   : > { %p1237_p13 = pnand %p1236_p12, %p1232_p9 }
 0x12a   : > { %1240 = shalt.err (!%p1237_p13)
}
 0x12b   : > { %s1294_s11 = smov 128   ;;  %s1295_s13 = smov 8  }
 0x12c   : > { %1126 = dma.vmem_to_hbm [thread:$0]  (%p1366_p4), %s1488_s12, 2048, %s1486_s15, %s1494_s21, %s1294_s11, %s1294_s11, %s1295_s13  }
 0x12d PF: > { %p1132_p0 = scmp.ge.s32.totalorder %s1291_s23, 2  ;;  %s867_s14 = sand.u32 1, %s1271_s18  }
 0x12e   : > { %s868_s16 = scalar_lea.sflag [#allocation3], %s867_s14 }
 0x12f   : > { %p1129_p1 = pnand %p1132_p0, %p1373_p8 }
 0x131   : > { %p1130_p2 = pneg %p1129_p1 }
 0x133   : > { %1266 = dma.done.wait (%p1130_p2), %s868_s16, 2048  }
 0x134   : > { %1268 = vsyncadd (%p1130_p2), %s868_s16, 4294965248  ;;  %s18_s23 = sadd.s32 1, %s1291_s23   ;;  %s1547_s18 = smov %s1275_s19 }
 0x135   : > { %p15_p3 = scmp.ge.s32.totalorder %s18_s23, 6   ;;  %s1548_s19 = smov %s1279_s20 }
 0x136   : > { %s1549_s20 = smov %s1379_s6  ;;  %s1550_s21 = smov %s1287_s22 }
 0x137   : > { %s1551_s22 = smov %s1553_s26  ;;  %17 = sbr.rel (!%p15_p3) target bundleno = 4 (0x4), region = 84 }
 0x13c   :  { %873 = vsyncpa [#allocation3], 1 }
 0x13d   :  { %875 = vsyncpa [#allocation3 + $0x1], 1 }

</bundles_post_ra>
